<compile_context>
chip_gen: v7x
topology: tpu7x:2x2x1
jax: 0.10.0
libtpu: 0.0.40
codegen_flags: <defaults>
</compile_context>

<pallas_src>
import functools

import jax
import jax.numpy as jnp
from jax.experimental import pallas as pl
from jax.experimental.pallas import tpu as pltpu


def _round_up(v, m):
    return (v + m - 1) // m * m


def back_kernel(x_ref, w1e_ref, w1o_ref, b1_ref, w2_ref, b2_ref, o_ref, *,
                hw, inv_hw):
    # x_ref  : (TM, C//2, 2*HW)  f32/bf16 — row r packs [ch 2r | ch 2r+1] spatial
    # w1e_ref: (C//2, 1024) bf16 — even-channel rows of w1
    # w1o_ref: (C//2, 1024) bf16 — odd-channel rows of w1
    # b1_ref : (1, 1024) f32
    # w2_ref : (1024, 10) bf16
    # b2_ref : (1, 10) f32
    # o_ref  : (TM, 10) f32
    x = x_ref[...].astype(jnp.float32)  # f32 pooling accumulation (v5e: no bf16 VPU)

    # AdaptiveAvgPool2d(1) + Flatten on the folded layout: masked lane sums
    # split the row back into its two channels (VPU/XLU work, hidden under DMA).
    lane = jax.lax.broadcasted_iota(jnp.int32, x.shape, dimension=2)
    pooled_even = jnp.sum(jnp.where(lane < hw, x, 0.0), axis=-1) * inv_hw   # ch 0,2,4,...
    pooled_odd = jnp.sum(jnp.where(lane >= hw, x, 0.0), axis=-1) * inv_hw   # ch 1,3,5,...

    # Linear(576 -> 1024), split over even/odd channel halves: bf16 MXU, f32 acc.
    h = jnp.dot(pooled_even.astype(jnp.bfloat16), w1e_ref[...],
                preferred_element_type=jnp.float32)
    h = h + jnp.dot(pooled_odd.astype(jnp.bfloat16), w1o_ref[...],
                    preferred_element_type=jnp.float32)
    h = h + b1_ref[...]

    # Hardswish in f32: x * relu6(x + 3) / 6
    h = h * jnp.clip(h + 3.0, 0.0, 6.0) * (1.0 / 6.0)

    # Dropout(p=0.2) is identity in eval mode.
    # TODO(synk): training-mode dropout (stochastic masking) not implemented.

    # Linear(1024 -> 10): bf16 operands, f32 accumulation.
    out = jnp.dot(h.astype(jnp.bfloat16), w2_ref[...],
                  preferred_element_type=jnp.float32)
    o_ref[...] = (out + b2_ref[...]).astype(o_ref.dtype)


def back_forward(x_nchw, w1, b1, w2, b2, *, tm=None):
    """x_nchw: (N, 576, H, W) float32 or bfloat16. Returns (N, 10) float32."""
    N, C, H, W = x_nchw.shape
    assert C == 576, "MobileNetV3-Small backbone emits 576 channels"
    assert C % 2 == 0
    HW = H * W
    HID = w1.shape[1]
    OUT = w2.shape[1]
    Ch = C // 2
    L = 2 * HW

    # Free view reshape of the contiguous NCHW buffer: row r = channels (2r, 2r+1).
    x = x_nchw.reshape(N, Ch, L)

    # First-linear weights gathered once (trace-time) into even/odd channel rows
    # matching the folded pooling order; all matmul weights stored/moved as bf16.
    w1e = w1[0::2, :].astype(jnp.bfloat16)   # (288, 1024)
    w1o = w1[1::2, :].astype(jnp.bfloat16)   # (288, 1024)
    w2_bf = w2.astype(jnp.bfloat16)          # (1024, 10)
    b1_2d = b1.reshape(1, HID).astype(jnp.float32)
    b2_2d = b2.reshape(1, OUT).astype(jnp.float32)

    # Batch tile. Default: 128 (fits v7x with the folded layout). If the batch
    # spans >1 grid step, prefer an even grid length for v7x's 2 TensorCores.
    if tm is None:
        tm = min(N, 128)
        nb = pl.cdiv(N, tm)
        if nb > 1 and nb % 2 == 1:
            tm = min(128, max(8, _round_up(pl.cdiv(N, nb + 1), 8)))
    grid = (pl.cdiv(N, tm),)

    # VMEM accounting with PADDED tile sizes (lanes -> 128, sublanes -> 8 for
    # f32 / 16 for bf16); every operand counted double-buffered, plus margin.
    x_item = x.dtype.itemsize
    x_sub = 16 if x_item == 2 else 8
    x_blk = tm * _round_up(Ch, x_sub) * _round_up(L, 128) * x_item
    w_res = 2 * (_round_up(Ch, 16) * _round_up(HID, 128) * 2)      # w1e + w1o (bf16)
    w_res += _round_up(HID, 16) * _round_up(OUT, 128) * 2          # w2 (bf16)
    w_res += _round_up(1, 8) * _round_up(HID, 128) * 4             # b1 (f32)
    w_res += _round_up(1, 8) * _round_up(OUT, 128) * 4             # b2 (f32)
    o_blk = _round_up(tm, 8) * _round_up(OUT, 128) * 4
    vmem_limit = 2 * (x_blk + w_res + o_blk) + (4 << 20)
    vmem_limit = int(min(max(vmem_limit, 16 << 20), 100 << 20))

    kernel = functools.partial(back_kernel, hw=HW, inv_hw=1.0 / float(HW))

    return pl.pallas_call(
        kernel,
        out_shape=jax.ShapeDtypeStruct((N, OUT), jnp.float32),
        grid=grid,
        in_specs=[
            pl.BlockSpec((tm, Ch, L), lambda i: (i, 0, 0)),  # activations: batch-tiled
            pl.BlockSpec((Ch, HID), lambda i: (0, 0)),        # w1 (even rows): resident
            pl.BlockSpec((Ch, HID), lambda i: (0, 0)),        # w1 (odd rows): resident
            pl.BlockSpec((1, HID), lambda i: (0, 0)),          # b1: resident
            pl.BlockSpec((HID, OUT), lambda i: (0, 0)),        # w2: resident
            pl.BlockSpec((1, OUT), lambda i: (0, 0)),          # b2: resident
        ],
        out_specs=pl.BlockSpec((tm, OUT), lambda i: (i, 0)),
        compiler_params=pltpu.CompilerParams(
            dimension_semantics=("parallel",),
            vmem_limit_bytes=vmem_limit,
        ),
    )(x, w1e, w1o, b1_2d, w2_bf, b2_2d)


def back_forward_ref(x_nchw, w1, b1, w2, b2):
    """Pure-JAX f32 reference for correctness checking."""
    pooled = jnp.mean(x_nchw.astype(jnp.float32), axis=(2, 3))    # (N, 576)
    h = pooled @ w1 + b1
    h = h * jnp.clip(h + 3.0, 0.0, 6.0) / 6.0
    return h @ w2 + b2


if __name__ == "__main__":
    key = jax.random.PRNGKey(0)
    k_x, k_w1, k_b1, k_w2, k_b2 = jax.random.split(key, 5)

    # C must be 576 (feeds Linear(576, 1024)); spatial 7x7 like the real
    # MobileNetV3-Small feature map.
    C, H, W = 576, 7, 7
    w1 = jax.random.normal(k_w1, (576, 1024), dtype=jnp.float32) * 0.02
    b1 = jax.random.normal(k_b1, (1024,), dtype=jnp.float32) * 0.01
    w2 = jax.random.normal(k_w2, (1024, 10), dtype=jnp.float32) * 0.02
    b2 = jax.random.normal(k_b2, (10,), dtype=jnp.float32) * 0.01

    # Test 1: small batch, single grid step (tm == N == 2).
    x_small = jax.random.normal(k_x, (2, C, H, W), dtype=jnp.float32)
    out = jax.block_until_ready(back_forward(x_small, w1, b1, w2, b2))
    ref = back_forward_ref(x_small, w1, b1, w2, b2)
    assert out.shape == (2, 10), out.shape
    assert jnp.allclose(out, ref, atol=1e-2, rtol=1e-2), \
        float(jnp.max(jnp.abs(out - ref)))

    # Test 2: multi-block grid with a partial last block (N=20, tm=8 -> 3 grid
    # steps, last block only 4 valid rows) — exercises tiling + VMEM-limit path.
    x_big = jax.random.normal(jax.random.PRNGKey(1), (20, C, H, W),
                              dtype=jnp.float32)
    out2 = jax.block_until_ready(back_forward(x_big, w1, b1, w2, b2, tm=8))
    ref2 = back_forward_ref(x_big, w1, b1, w2, b2)
    assert out2.shape == (20, 10), out2.shape
    assert jnp.allclose(out2, ref2, atol=1e-2, rtol=1e-2), \
        float(jnp.max(jnp.abs(out2 - ref2)))

    print("KERNEL_OK")
</pallas_src>

<mosaic_0001>
module attributes {stable_mosaic.version = 11 : i64} {
  func.func @back_kernel(%arg0: i32, %arg1: memref<2x288x98xf32, #tpu.memory_space<vmem>>, %arg2: memref<288x1024xbf16, #tpu.memory_space<vmem>>, %arg3: memref<288x1024xbf16, #tpu.memory_space<vmem>>, %arg4: memref<1x1024xf32, #tpu.memory_space<vmem>>, %arg5: memref<1024x10xbf16, #tpu.memory_space<vmem>>, %arg6: memref<1x10xf32, #tpu.memory_space<vmem>>, %arg7: memref<2x10xf32, #tpu.memory_space<vmem>>) attributes {dimension_semantics = [#tpu.dimension_semantics<parallel>], iteration_bounds = array<i64: 1>, scalar_prefetch = 0 : i64, scratch_operands = 0 : i64, tpu.core_type = #tpu.core_type<tc>, window_params = [{transform_indices = @transform_0, window_bounds = array<i64: 2, 288, 98>}, {pipeline_mode = #tpu.pipeline_mode<synchronous>, transform_indices = @transform_1, window_bounds = array<i64: 288, 1024>}, {pipeline_mode = #tpu.pipeline_mode<synchronous>, transform_indices = @transform_2, window_bounds = array<i64: 288, 1024>}, {pipeline_mode = #tpu.pipeline_mode<synchronous>, transform_indices = @transform_3, window_bounds = array<i64: 1, 1024>}, {pipeline_mode = #tpu.pipeline_mode<synchronous>, transform_indices = @transform_4, window_bounds = array<i64: 1024, 10>}, {pipeline_mode = #tpu.pipeline_mode<synchronous>, transform_indices = @transform_5, window_bounds = array<i64: 1, 10>}, {transform_indices = @transform_6, window_bounds = array<i64: 2, 10>}]} {
    %c0 = arith.constant 0 : index
    %c0_0 = arith.constant 0 : index
    %c0_1 = arith.constant 0 : index
    %0 = vector.load %arg1[%c0, %c0_0, %c0_1] : memref<2x288x98xf32, #tpu.memory_space<vmem>>, vector<2x288x98xf32>
    %1 = tpu.iota {dimensions = array<i32: 2>} : vector<2x288x98xi32>
    %c49_i32 = arith.constant 49 : i32
    %2 = vector.broadcast %c49_i32 : i32 to vector<2x288x98xi32>
    %3 = arith.cmpi slt, %1, %2 : vector<2x288x98xi32>
    %cst = arith.constant 0.000000e+00 : f32
    %4 = vector.broadcast %cst : f32 to vector<2x288x98xf32>
    %5 = arith.select %3, %0, %4 : vector<2x288x98xi1>, vector<2x288x98xf32>
    %cst_2 = arith.constant dense<0.000000e+00> : vector<2x288xf32>
    %6 = vector.multi_reduction <add>, %5, %cst_2 [2] : vector<2x288x98xf32> to vector<2x288xf32>
    %cst_3 = arith.constant 0.0204081628 : f32
    %7 = vector.broadcast %cst_3 : f32 to vector<2x288xf32>
    %8 = arith.mulf %6, %7 : vector<2x288xf32>
    %c49_i32_4 = arith.constant 49 : i32
    %9 = vector.broadcast %c49_i32_4 : i32 to vector<2x288x98xi32>
    %10 = arith.cmpi sge, %1, %9 : vector<2x288x98xi32>
    %cst_5 = arith.constant 0.000000e+00 : f32
    %11 = vector.broadcast %cst_5 : f32 to vector<2x288x98xf32>
    %12 = arith.select %10, %0, %11 : vector<2x288x98xi1>, vector<2x288x98xf32>
    %cst_6 = arith.constant dense<0.000000e+00> : vector<2x288xf32>
    %13 = vector.multi_reduction <add>, %12, %cst_6 [2] : vector<2x288x98xf32> to vector<2x288xf32>
    %cst_7 = arith.constant 0.0204081628 : f32
    %14 = vector.broadcast %cst_7 : f32 to vector<2x288xf32>
    %15 = arith.mulf %13, %14 : vector<2x288xf32>
    %16 = arith.truncf %8 : vector<2x288xf32> to vector<2x288xbf16>
    %c0_8 = arith.constant 0 : index
    %c0_9 = arith.constant 0 : index
    %17 = vector.load %arg2[%c0_8, %c0_9] : memref<288x1024xbf16, #tpu.memory_space<vmem>>, vector<288x1024xbf16>
    %cst_10 = arith.constant dense<0.000000e+00> : vector<2x1024xf32>
    %18 = tpu.matmul %16, %17, %cst_10 {dimension_numbers = #tpu.dot_dimension_numbers<[1], [0], [0], [1], [0, 0, 1, 1], [], []>} : vector<2x288xbf16>, vector<288x1024xbf16>, vector<2x1024xf32> -> vector<2x1024xf32>
    %19 = arith.truncf %15 : vector<2x288xf32> to vector<2x288xbf16>
    %c0_11 = arith.constant 0 : index
    %c0_12 = arith.constant 0 : index
    %20 = vector.load %arg3[%c0_11, %c0_12] : memref<288x1024xbf16, #tpu.memory_space<vmem>>, vector<288x1024xbf16>
    %cst_13 = arith.constant dense<0.000000e+00> : vector<2x1024xf32>
    %21 = tpu.matmul %19, %20, %cst_13 {dimension_numbers = #tpu.dot_dimension_numbers<[1], [0], [0], [1], [0, 0, 1, 1], [], []>} : vector<2x288xbf16>, vector<288x1024xbf16>, vector<2x1024xf32> -> vector<2x1024xf32>
    %22 = arith.addf %18, %21 : vector<2x1024xf32>
    %c0_14 = arith.constant 0 : index
    %c0_15 = arith.constant 0 : index
    %23 = vector.load %arg4[%c0_14, %c0_15] : memref<1x1024xf32, #tpu.memory_space<vmem>>, vector<1x1024xf32>
    %24 = vector.broadcast %23 : vector<1x1024xf32> to vector<2x1024xf32>
    %25 = arith.addf %22, %24 : vector<2x1024xf32>
    %cst_16 = arith.constant 3.000000e+00 : f32
    %26 = vector.broadcast %cst_16 : f32 to vector<2x1024xf32>
    %27 = arith.addf %25, %26 : vector<2x1024xf32>
    %cst_17 = arith.constant 0.000000e+00 : f32
    %cst_18 = arith.constant 6.000000e+00 : f32
    %28 = vector.broadcast %cst_17 : f32 to vector<2x1024xf32>
    %29 = arith.maximumf %28, %27 : vector<2x1024xf32>
    %30 = vector.broadcast %cst_18 : f32 to vector<2x1024xf32>
    %31 = arith.minimumf %30, %29 : vector<2x1024xf32>
    %32 = arith.mulf %25, %31 : vector<2x1024xf32>
    %cst_19 = arith.constant 0.166666672 : f32
    %33 = vector.broadcast %cst_19 : f32 to vector<2x1024xf32>
    %34 = arith.mulf %32, %33 : vector<2x1024xf32>
    %35 = arith.truncf %34 : vector<2x1024xf32> to vector<2x1024xbf16>
    %c0_20 = arith.constant 0 : index
    %c0_21 = arith.constant 0 : index
    %36 = vector.load %arg5[%c0_20, %c0_21] : memref<1024x10xbf16, #tpu.memory_space<vmem>>, vector<1024x10xbf16>
    %cst_22 = arith.constant dense<0.000000e+00> : vector<2x10xf32>
    %37 = tpu.matmul %35, %36, %cst_22 {dimension_numbers = #tpu.dot_dimension_numbers<[1], [0], [0], [1], [0, 0, 1, 1], [], []>} : vector<2x1024xbf16>, vector<1024x10xbf16>, vector<2x10xf32> -> vector<2x10xf32>
    %c0_23 = arith.constant 0 : index
    %c0_24 = arith.constant 0 : index
    %38 = vector.load %arg6[%c0_23, %c0_24] : memref<1x10xf32, #tpu.memory_space<vmem>>, vector<1x10xf32>
    %39 = vector.broadcast %38 : vector<1x10xf32> to vector<2x10xf32>
    %40 = arith.addf %37, %39 : vector<2x10xf32>
    %c0_25 = arith.constant 0 : index
    %c0_26 = arith.constant 0 : index
    %41 = vector.load %arg7[%c0_25, %c0_26] : memref<2x10xf32, #tpu.memory_space<vmem>>, vector<2x10xf32>
    tpu.vector_store %arg7[%c0_25, %c0_26], %40 {strides = array<i32>} : memref<2x10xf32, #tpu.memory_space<vmem>>, vector<2x10xf32>,
    return
  }
  func.func @transform_0(%arg0: i32) -> (i32, i32, i32) {
    %c0_i32 = arith.constant 0 : i32
    %c0_i32_0 = arith.constant 0 : i32
    %c0_i32_1 = arith.constant 0 : i32
    return %arg0, %c0_i32, %c0_i32_0 : i32, i32, i32
  }
  func.func @transform_1(%arg0: i32) -> (i32, i32) {
    %c0_i32 = arith.constant 0 : i32
    %c0_i32_0 = arith.constant 0 : i32
    %c0_i32_1 = arith.constant 0 : i32
    return %c0_i32, %c0_i32_0 : i32, i32
  }
  func.func @transform_2(%arg0: i32) -> (i32, i32) {
    %c0_i32 = arith.constant 0 : i32
    %c0_i32_0 = arith.constant 0 : i32
    %c0_i32_1 = arith.constant 0 : i32
    return %c0_i32, %c0_i32_0 : i32, i32
  }
  func.func @transform_3(%arg0: i32) -> (i32, i32) {
    %c0_i32 = arith.constant 0 : i32
    %c0_i32_0 = arith.constant 0 : i32
    %c0_i32_1 = arith.constant 0 : i32
    return %c0_i32, %c0_i32_0 : i32, i32
  }
  func.func @transform_4(%arg0: i32) -> (i32, i32) {
    %c0_i32 = arith.constant 0 : i32
    %c0_i32_0 = arith.constant 0 : i32
    %c0_i32_1 = arith.constant 0 : i32
    return %c0_i32, %c0_i32_0 : i32, i32
  }
  func.func @transform_5(%arg0: i32) -> (i32, i32) {
    %c0_i32 = arith.constant 0 : i32
    %c0_i32_0 = arith.constant 0 : i32
    %c0_i32_1 = arith.constant 0 : i32
    return %c0_i32, %c0_i32_0 : i32, i32
  }
  func.func @transform_6(%arg0: i32) -> (i32, i32) {
    %c0_i32 = arith.constant 0 : i32
    %c0_i32_0 = arith.constant 0 : i32
    return %arg0, %c0_i32 : i32, i32
  }
}

</mosaic_0001>

<bundles_post_ra>
// kernel: tpu_custom_call.1
= control target key start
LH: loop header
LB: loop body
LE: loop exit
PB: predicated region body
PF: predicated region fallthrough
CT: control target
= control target key end

     0   :  { %11 = vsyncpa [#allocation3], 0  ;;  %s8417_s0 = inlined_call_operand.vmem [shape: f32[2,288,98], index: 0, kind: input, shape index: {}]   ;;  %s8418_s1 = inlined_call_operand.hbm [shape: bf16[288,1024], index: 1, kind: input, shape index: {}]   ;;  %s8419_s2 = inlined_call_operand.hbm [shape: bf16[288,1024], index: 2, kind: input, shape index: {}]   ;;  %s8420_s3 = inlined_call_operand.hbm [shape: f32[1,1024], index: 3, kind: input, shape index: {}]   ;;  %s8421_s4 = inlined_call_operand.vmem [shape: bf16[1024,10], index: 4, kind: input, shape index: {}]   ;;  %s8422_s5 = inlined_call_operand.vmem [shape: f32[1,10], index: 5, kind: input, shape index: {}]   ;;  %s8423_s6 = inlined_call_operand.hbm [shape: f32[2,10], index: 6, kind: output, shape index: {}]  }
   0x1   :  { %12 = vsyncpa [#allocation6], 0 }
   0x2   :  { %13 = vsyncpa [#allocation4], 0  ;;  %s5770_s21 = smov [#allocation5]   ;;  %s5771_s23 = smov [#allocation2]  }
   0x3   :  { %s33_s22 = sshll.u32 %s5770_s21, 4  ;;  %s21_s24 = sshll.u32 %s5771_s23, 4  ;;  %s34_s22 = int_to_ptr.vmem [resolvable:$true] %s33_s22  ;;  %s5812_s24 = int_to_ptr.vmem [resolvable:$true] %s21_s24 }
   0x4   :  { %s5676_s27 = scalar_lea.hbm %s8419_s2, 18432 }
   0x5   :  { %p5677_p0 = scmp.ne.s32.totalorder %s8419_s2, %s5676_s27  ;;  %p5680_p1 = scmp.lt.u32.totalorder %s5676_s27, %s8419_s2 }
   0x7   :  { %p5682_p2 = pnand %p5680_p1, %p5677_p0 }
   0x9   :  { %5685 = shalt.err (!%p5682_p2)
}
   0xa   :  { %s5686_s8 = scalar_lea.vmem %s34_s22, 18432  ;;  %p5691_p4 = scmp.lt.s32.totalorder %s34_s22, %s34_s22 }
   0xb   :  { %p5687_p3 = scmp.ne.s32.totalorder %s34_s22, %s5686_s8  ;;  %p5692_p5 = scmp.lt.s32.totalorder %s5686_s8, %s5686_s8 }
   0xd   :  { %p5693_p6 = por %p5692_p5, %p5691_p4 }
   0xf   :  { %p5694_p7 = pnand %p5693_p6, %p5687_p3 }
  0x11   :  { %5697 = shalt.err (!%p5694_p7)
}
  0x12   :  { %s5772_s9 = smov 512   ;;  %s5773_s10 = smov 32  }
  0x13   :  { %39 = dma.hbm_to_vmem [thread:$0]  %s8419_s2, 18432, %s34_s22, [#allocation6], %s5772_s9, %s5772_s9, %s5773_s10  }
  0x14   :  { %s5698_s15 = scalar_lea.hbm %s8418_s1, 18432 }
  0x15   :  { %p5699_p8 = scmp.ne.s32.totalorder %s8418_s1, %s5698_s15  ;;  %p5702_p9 = scmp.lt.u32.totalorder %s5698_s15, %s8418_s1 }
  0x17   :  { %p5704_p10 = pnand %p5702_p9, %p5699_p8 }
  0x19   :  { %5707 = shalt.err (!%p5704_p10)
}
  0x1a   :  { %s5708_s20 = scalar_lea.vmem %s5812_s24, 18432  ;;  %p5713_p12 = scmp.lt.s32.totalorder %s5812_s24, %s5812_s24 }
  0x1b   :  { %p5709_p11 = scmp.ne.s32.totalorder %s5812_s24, %s5708_s20  ;;  %p5714_p13 = scmp.lt.s32.totalorder %s5708_s20, %s5708_s20 }
  0x1d   :  { %p5715_p0 = por %p5714_p13, %p5713_p12 }
  0x1f   :  { %p5716_p1 = pnand %p5715_p0, %p5709_p11 }
  0x21   :  { %5719 = shalt.err (!%p5716_p1)
}
  0x22   :  { %27 = dma.hbm_to_vmem [thread:$0]  %s8418_s1, 18432, %s5812_s24, [#allocation3], %s5772_s9, %s5772_s9, %s5773_s10  }
  0x23   :  { %s5774_s22 = smov [#allocation7]   ;;  %s5720_s27 = scalar_lea.hbm %s8420_s3, 128 }
  0x24   :  { %s46_s23 = sshll.u32 %s5774_s22, 4  ;;  %p5721_p2 = scmp.ne.s32.totalorder %s8420_s3, %s5720_s27  ;;  %s47_s23 = int_to_ptr.vmem [resolvable:$true] %s46_s23 }
  0x25   :  { %p5724_p3 = scmp.lt.u32.totalorder %s5720_s27, %s8420_s3 }
  0x27   :  { %p5726_p4 = pnand %p5724_p3, %p5721_p2 }
  0x29   :  { %5729 = shalt.err (!%p5726_p4)
}
  0x2a   :  { %s5730_s8 = scalar_lea.vmem %s47_s23, 128  ;;  %p5735_p6 = scmp.lt.s32.totalorder %s47_s23, %s47_s23 }
  0x2b   :  { %p5731_p5 = scmp.ne.s32.totalorder %s47_s23, %s5730_s8  ;;  %p5736_p7 = scmp.lt.s32.totalorder %s5730_s8, %s5730_s8 }
  0x2d   :  { %p5737_p8 = por %p5736_p7, %p5735_p6 }
  0x2f   :  { %p5738_p9 = pnand %p5737_p8, %p5731_p5 }
  0x31   :  { %5741 = shalt.err (!%p5738_p9)
}
  0x32   :  { %49 = dma.hbm_to_vmem [thread:$0]  %s8420_s3, 128, %s47_s23, [#allocation6]  }
  0x33   :  { %5764 = dma.done.wait [#allocation3], 18432  }
  0x34   :  { %5765 = vsyncadd [#allocation3], 4294948864 }
  0x35   :  { %5766 = dma.done.wait [#allocation6], 18560  }
  0x36   :  { %5767 = vsyncadd [#allocation6], 4294948736  ;;  %v136_v0 = vlaneseq  ;;  %vm211_vm1 = vcmask 801792   ;;  %v5862_v2 = vld [vmem:[%s8417_s0 + $0x220] sm:$0xff]  ;;  %v5872_v4 = vld [vmem:[%s8417_s0 + $0x228] sm:$0xff]  ;;  %vm1338_vm3 = vcmask 130112  }
  0x37   :  { %v5867_v3 = vld [vmem:[%s8417_s0 + $0x100] sm:$0xff]  ;;  %v5886_v8 = vld [vmem:[%s8417_s0 + $0x108] sm:$0xff]  ;;  %v5896_v12 = vld [vmem:[%s8417_s0 + $0x118] sm:$0xff]  ;;  %vm1345_vm4 = vcmask 195712   ;;  %vm1352_vm5 = vcmask 261312   ;;  %vm1713_vm6 = vcmask 1041409  }
  0x38   :  { %v5856_v1 = vand.u32 127, %v136_v0  ;;  %v5901_v13 = vld [vmem:[%s8417_s0 + $0x110] sm:$0xff]  ;;  %v135_v18 = vld [vmem:[%s8417_s0 + $0x238] sm:$0xff]  ;;  %v81_v24 = vld [vmem:[%s8417_s0 + $0x88] sm:$0xff]  ;;  %vm2442_vm7 = vcmask 261120   ;;  %vm1359_vm8 = vcmask 326912  }
  0x39   :  { %v134_v19 = vld [vmem:[%s8417_s0 + $0x230] sm:$0xff]  ;;  %v80_v25 = vld [vmem:[%s8417_s0 + $0x80] sm:$0xff]  ;;  %v117_v30 = vld [vmem:[%s8417_s0 + $0x1a8] sm:$0xff]  ;;  %vm1366_vm9 = vcmask 392512   ;;  %vm1373_vm10 = vcmask 458112   ;;  %vm1380_vm11 = vcmask 523712  }
  0x3a   :  { %vm500_vm0 = vcmp.ge.s32.totalorder %v5856_v1, 49  ;;  %v116_v31 = vld [vmem:[%s8417_s0 + $0x1a0] sm:$0xff]  ;;  %v65_v36 = vld [vmem:[%s8417_s0 + $0x8] sm:$0xff]  ;;  %v83_v42 = vld [vmem:[%s8417_s0 + $0x98] sm:$0xff]  ;;  %vm138_vm2 = vcmp.lt.s32.totalorder %v5856_v1, 49  ;;  %vm8448_vm12 = vcmask 589312  }
  0x3b   :  { %v569_v5 = vsel %vm500_vm0, %v5862_v2, 0.0  ;;  %v533_v6 = vsel %vm500_vm0, %v5867_v3, 0.0  ;;  %v570_v7 = vsel %vm500_vm0, %v5872_v4, 0.0  ;;  %v534_v11 = vsel %vm500_vm0, %v5886_v8, 0.0  ;;  %v64_v37 = vld [vmem:[%s8417_s0] sm:$0xff]  ;;  %v82_v43 = vld [vmem:[%s8417_s0 + $0x90] sm:$0xff] }
  0x3c   :  { %v777_v9 = vsel %vm211_vm1, %v569_v5, 0.0  ;;  %v669_v10 = vsel %vm211_vm1, %v533_v6, 0.0  ;;  %v780_v14 = vsel %vm211_vm1, %v570_v7, 0.0  ;;  %v672_v15 = vsel %vm211_vm1, %v534_v11, 0.0  ;;  %v101_v48 = vld [vmem:[%s8417_s0 + $0x128] sm:$0xff]  ;;  %v100_v49 = vld [vmem:[%s8417_s0 + $0x120] sm:$0xff] }
  0x3d   :  { %778 = vadd.xlane.f32.xlu1 %v777_v9  ;;  %670 = vadd.xlane.f32.xlu0 %v669_v10  ;;  %v536_v16 = vsel %vm500_vm0, %v5896_v12, 0.0  ;;  %v535_v17 = vsel %vm500_vm0, %v5901_v13, 0.0  ;;  %v572_v22 = vsel %vm500_vm0, %v135_v18, 0.0  ;;  %v571_v23 = vsel %vm500_vm0, %v134_v19, 0.0  ;;  %v119_v54 = vld [vmem:[%s8417_s0 + $0x1b8] sm:$0xff]  ;;  %v118_v55 = vld [vmem:[%s8417_s0 + $0x1b0] sm:$0xff] }
  0x3e   :  { %v678_v20 = vsel %vm211_vm1, %v536_v16, 0.0  ;;  %v675_v21 = vsel %vm211_vm1, %v535_v17, 0.0  ;;  %v786_v26 = vsel %vm211_vm1, %v572_v22, 0.0  ;;  %v783_v27 = vsel %vm211_vm1, %v571_v23, 0.0  ;;  %v67_v60 = vld [vmem:[%s8417_s0 + $0x18] sm:$0xff]  ;;  %v66_v61 = vld [vmem:[%s8417_s0 + $0x10] sm:$0xff] }
  0x3f   :  { %v518_v28 = vsel %vm500_vm0, %v81_v24, 0.0  ;;  %v517_v29 = vsel %vm500_vm0, %v80_v25, 0.0  ;;  %v554_v34 = vsel %vm500_vm0, %v117_v30, 0.0  ;;  %v553_v35 = vsel %vm500_vm0, %v116_v31, 0.0  ;;  %v103_v7 = vld [vmem:[%s8417_s0 + $0x138] sm:$0xff]  ;;  %v102_v9 = vld [vmem:[%s8417_s0 + $0x130] sm:$0xff] }
  0x40   :  { %v624_v32 = vsel %vm211_vm1, %v518_v28, 0.0  ;;  %v621_v33 = vsel %vm211_vm1, %v517_v29, 0.0  ;;  %v732_v38 = vsel %vm211_vm1, %v554_v34, 0.0  ;;  %v729_v39 = vsel %vm211_vm1, %v553_v35, 0.0  ;;  %v1205_v16 = vld [vmem:[#allocation5 + $0x400] sm:$0xff]  ;;  %v121_v22 = vld [vmem:[%s8417_s0 + $0x1c8] sm:$0xff] }
  0x41   :  { %781 = vadd.xlane.f32.xlu1 %v780_v14  ;;  %673 = vadd.xlane.f32.xlu0 %v672_v15  ;;  %v502_v40 = vsel %vm500_vm0, %v65_v36, 0.0  ;;  %v501_v41 = vsel %vm500_vm0, %v64_v37, 0.0  ;;  %v520_v46 = vsel %vm500_vm0, %v83_v42, 0.0  ;;  %v519_v47 = vsel %vm500_vm0, %v82_v43, 0.0  ;;  %v85_v14 = vld [vmem:[%s8417_s0 + $0xa8] sm:$0xff]  ;;  %v84_v15 = vld [vmem:[%s8417_s0 + $0xa0] sm:$0xff] }
  0x42   :  { %v576_v44 = vsel %vm211_vm1, %v502_v40, 0.0  ;;  %v573_v45 = vsel %vm211_vm1, %v501_v41, 0.0  ;;  %v630_v50 = vsel %vm211_vm1, %v520_v46, 0.0  ;;  %v627_v51 = vsel %vm211_vm1, %v519_v47, 0.0  ;;  %v1209_v17 = vld [vmem:[#allocation5 + $0x420] sm:$0xff]  ;;  %v87_v46 = vld [vmem:[%s8417_s0 + $0xb8] sm:$0xff] }
  0x43   :  { %v538_v52 = vsel %vm500_vm0, %v101_v48, 0.0  ;;  %v537_v53 = vsel %vm500_vm0, %v100_v49, 0.0  ;;  %v556_v58 = vsel %vm500_vm0, %v119_v54, 0.0  ;;  %v555_v59 = vsel %vm500_vm0, %v118_v55, 0.0  ;;  %v120_v23 = vld [vmem:[%s8417_s0 + $0x1c0] sm:$0xff]  ;;  %v86_v49 = vld [vmem:[%s8417_s0 + $0xb0] sm:$0xff] }
  0x44   :  { %v684_v56 = vsel %vm211_vm1, %v538_v52, 0.0  ;;  %v681_v57 = vsel %vm211_vm1, %v537_v53, 0.0  ;;  %v738_v62 = vsel %vm211_vm1, %v556_v58, 0.0  ;;  %v735_v63 = vsel %vm211_vm1, %v555_v59, 0.0  ;;  %v68_v34 = vld [vmem:[%s8417_s0 + $0x20] sm:$0xff]  ;;  %v123_v53 = vld [vmem:[%s8417_s0 + $0x1d8] sm:$0xff] }
  0x45   :  { %679 = vadd.xlane.f32.xlu1 %v678_v20  ;;  %676 = vadd.xlane.f32.xlu0 %v675_v21  ;;  %v504_v5 = vsel %vm500_vm0, %v67_v60, 0.0  ;;  %v503_v6 = vsel %vm500_vm0, %v66_v61, 0.0  ;;  %v540_v18 = vsel %vm500_vm0, %v103_v7, 0.0  ;;  %v539_v19 = vsel %vm500_vm0, %v102_v9, 0.0  ;;  %v1213_v20 = vld [vmem:[#allocation5 + $0x440] sm:$0xff]  ;;  %v71_v59 = vld [vmem:[%s8417_s0 + $0x38] sm:$0xff] }
  0x46   :  { %v582_v10 = vsel %vm211_vm1, %v504_v5, 0.0  ;;  %v579_v11 = vsel %vm211_vm1, %v503_v6, 0.0  ;;  %v1217_v21 = vld [vmem:[#allocation5 + $0x460] sm:$0xff]  ;;  %v5219_v24 = vcombine.high %v1205_v16, %v1209_v17  ;;  %v5218_v25 = vcombine.low %v1205_v16, %v1209_v17  ;;  %v107_v5 = vld [vmem:[%s8417_s0 + $0x158] sm:$0xff]  ;;  %s5776_s30 = smov [#allocation8]  }
  0x47   :  { %v5227_v28 = vcombine.high %v1213_v20, %v1217_v21  ;;  %v522_v29 = vsel %vm500_vm0, %v85_v14, 0.0  ;;  %v521_v30 = vsel %vm500_vm0, %v84_v15, 0.0  ;;  %v558_v31 = vsel %vm500_vm0, %v121_v22, 0.0  ;;  %v89_v15 = vld [vmem:[%s8417_s0 + $0xc8] sm:$0xff]  ;;  %s5080_s7 = sshll.u32 %s5776_s30, 4  ;;  %s5081_s7 = int_to_ptr.vmem [resolvable:$true] %s5080_s7 }
  0x48   :  { %2487 = vmatprep.subr.bf16.mxu1 %v5219_v24  ;;  %v5226_v35 = vcombine.low %v1213_v20, %v1217_v21  ;;  %v636_v36 = vsel %vm211_vm1, %v522_v29, 0.0  ;;  %v633_v37 = vsel %vm211_vm1, %v521_v30, 0.0  ;;  %v744_v40 = vsel %vm211_vm1, %v558_v31, 0.0  ;;  %v125_v20 = vld [vmem:[%s8417_s0 + $0x1e8] sm:$0xff]  ;;  %v72_v30 = vld [vmem:[%s8417_s0 + $0x40] sm:$0xff]  ;;  %p5747_p11 = scmp.lt.s32.totalorder %s5081_s7, %s5081_s7 }
  0x49   :  { %787 = vadd.xlane.f32.xlu1 %v786_v26  ;;  %784 = vadd.xlane.f32.xlu0 %v783_v27  ;;  %v690_v26 = vsel %vm211_vm1, %v540_v18, 0.0  ;;  %v687_v27 = vsel %vm211_vm1, %v539_v19, 0.0  ;;  %v505_v43 = vsel %vm500_vm0, %v68_v34, 0.0  ;;  %v524_v52 = vsel %vm500_vm0, %v87_v46, 0.0  ;;  %v88_v18 = vld [vmem:[%s8417_s0 + $0xc0] sm:$0xff]  ;;  %v109_v31 = vld [vmem:[%s8417_s0 + $0x168] sm:$0xff] }
  0x4a   :  { %2488 = vmatpush1.bf16.msra.mxu1 %v5218_v25  ;;  %v585_v48 = vsel %vm211_vm1, %v505_v43, 0.0  ;;  %v523_v55 = vsel %vm500_vm0, %v86_v49, 0.0  ;;  %v560_v58 = vsel %vm500_vm0, %v123_v53, 0.0  ;;  %v508_v7 = vsel %vm500_vm0, %v71_v59, 0.0  ;;  %v90_v43 = vld [vmem:[%s8417_s0 + $0xd0] sm:$0xff] }
  0x4b   :  { %2489 = vmatprep.subr.bf16.mxu1 %v5227_v28  ;;  %v639_v60 = vsel %vm211_vm1, %v523_v55, 0.0  ;;  %v750_v61 = vsel %vm211_vm1, %v560_v58, 0.0  ;;  %v594_v14 = vsel %vm211_vm1, %v508_v7, 0.0  ;;  %v526_v22 = vsel %vm500_vm0, %v89_v15, 0.0  ;;  %v73_v28 = vld [vmem:[%s8417_s0 + $0x48] sm:$0xff]  ;;  %v126_v49 = vld [vmem:[%s8417_s0 + $0x1f0] sm:$0xff] }
  0x4c   :  { %v525_v24 = vsel %vm500_vm0, %v88_v18, 0.0  ;;  %v562_v25 = vsel %vm500_vm0, %v125_v20, 0.0  ;;  %v563_v53 = vsel %vm500_vm0, %v126_v49, 0.0  ;;  %v74_v55 = vld [vmem:[%s8417_s0 + $0x50] sm:$0xff]  ;;  %v6208_v7 = vld [vmem:[#allocation5 + $0x8] sm:$0xff]  ;;  %v112_v49 = vld [vmem:[%s8417_s0 + $0x180] sm:$0xff] }
  0x4d   :  { %625 = vadd.xlane.f32.xlu1 %v624_v32  ;;  %622 = vadd.xlane.f32.xlu0 %v621_v33  ;;  %v557_v32 = vsel %vm500_vm0, %v120_v23, 0.0  ;;  %v69_v33 = vld [vmem:[%s8417_s0 + $0x28] sm:$0xff]  ;;  %v124_v23 = vld [vmem:[%s8417_s0 + $0x1e0] sm:$0xff]  ;;  %v511_v59 = vsel %vm500_vm0, %v74_v55, 0.0  ;;  %vm1394_vm13 = vcmask 654912   ;;  %vm1401_vm14 = vcmask 720512  }
  0x4e   :  { %v741_v41 = vsel %vm211_vm1, %v557_v32, 0.0  ;;  %v506_v42 = vsel %vm500_vm0, %v69_v33, 0.0  ;;  %2490 = vmatpush1.bf16.msra.mxu1 %v5226_v35  ;;  %v561_v29 = vsel %vm500_vm0, %v124_v23, 0.0  ;;  %v756_v32 = vsel %vm211_vm1, %v562_v25, 0.0  ;;  %v108_v33 = vld [vmem:[%s8417_s0 + $0x160] sm:$0xff]  ;;  %v93_v15 = vld [vmem:[%s8417_s0 + $0xe8] sm:$0xff] }
  0x4f   :  { %v588_v47 = vsel %vm211_vm1, %v506_v42, 0.0  ;;  %v753_v34 = vsel %vm211_vm1, %v561_v29, 0.0  ;;  %v510_v35 = vsel %vm500_vm0, %v73_v28, 0.0  ;;  %v545_v42 = vsel %vm500_vm0, %v108_v33, 0.0  ;;  %v1089_v23 = vld [vmem:[#allocation5 + $0x60] sm:$0xff] }
  0x50   :  { %v128_v28 = vld [vmem:[%s8417_s0 + $0x200] sm:$0xff]  ;;  %vm1408_vm15 = vcmask 786112  }
  0x51   :  { %733 = vadd.xlane.f32.xlu1 %v732_v38  ;;  %730 = vadd.xlane.f32.xlu0 %v729_v39  ;;  %v105_v38 = vld [vmem:[%s8417_s0 + $0x148] sm:$0xff]  ;;  %v8424_v39 = vmov 0   ;;  %v1097_v33 = vld [vmem:[#allocation5 + $0xa0] sm:$0xff] }
  0x52   :  { %2519 = vmatprep.mubr.bf16.mxu1 %v8424_v39 }
  0x55   :  { %577 = vadd.xlane.f32.xlu1 %v576_v44  ;;  %574 = vadd.xlane.f32.xlu0 %v573_v45  ;;  %v104_v44 = vld [vmem:[%s8417_s0 + $0x140] sm:$0xff]  ;;  %v542_v45 = vsel %vm500_vm0, %v105_v38, 0.0  ;;  %v600_v38 = vsel %vm211_vm1, %v510_v35, 0.0  ;;  %v565_v35 = vsel %vm500_vm0, %v128_v28, 0.0 }
  0x59   :  { %631 = vadd.xlane.f32.xlu1 %v630_v50  ;;  %628 = vadd.xlane.f32.xlu0 %v627_v51  ;;  %v696_v50 = vsel %vm211_vm1, %v542_v45, 0.0  ;;  %v541_v51 = vsel %vm500_vm0, %v104_v44, 0.0  ;;  %v705_v45 = vsel %vm211_vm1, %v545_v42, 0.0  ;;  %v765_v42 = vsel %vm211_vm1, %v565_v35, 0.0  ;;  %v115_v35 = vld [vmem:[%s8417_s0 + $0x198] sm:$0xff] }
  0x5a   :  { %v693_v54 = vsel %vm211_vm1, %v541_v51, 0.0 }
  0x5d   :  { %685 = vadd.xlane.f32.xlu1 %v684_v56  ;;  %682 = vadd.xlane.f32.xlu0 %v681_v57  ;;  %v122_v56 = vld [vmem:[%s8417_s0 + $0x1d0] sm:$0xff]  ;;  %v642_v57 = vsel %vm211_vm1, %v524_v52, 0.0 }
  0x61   :  { %739 = vadd.xlane.f32.xlu1 %v738_v62  ;;  %736 = vadd.xlane.f32.xlu0 %v735_v63  ;;  %v70_v62 = vld [vmem:[%s8417_s0 + $0x30] sm:$0xff]  ;;  %v559_v63 = vsel %vm500_vm0, %v122_v56, 0.0 }
  0x62   :  { %v747_v6 = vsel %vm211_vm1, %v559_v63, 0.0  ;;  %v507_v9 = vsel %vm500_vm0, %v70_v62, 0.0  ;;  %v603_v63 = vsel %vm211_vm1, %v511_v59, 0.0  ;;  %v94_v59 = vld [vmem:[%s8417_s0 + $0xf0] sm:$0xff] }
  0x63   :  { %v591_v16 = vsel %vm211_vm1, %v507_v9, 0.0 }
  0x65   :  { %583 = vadd.xlane.f32.xlu1 %v582_v10  ;;  %580 = vadd.xlane.f32.xlu0 %v579_v11  ;;  %v544_v10 = vsel %vm500_vm0, %v107_v5, 0.0  ;;  %v106_v11 = vld [vmem:[%s8417_s0 + $0x150] sm:$0xff]  ;;  %v1077_v5 = vld [vmem:[#allocation5] sm:$0xff] }
  0x66   :  { %v702_v17 = vsel %vm211_vm1, %v544_v10, 0.0  ;;  %v543_v19 = vsel %vm500_vm0, %v106_v11, 0.0 }
  0x67   :  { %v699_v21 = vsel %vm211_vm1, %v543_v19, 0.0 }
  0x69   :  { %691 = vadd.xlane.f32.xlu1 %v690_v26  ;;  %688 = vadd.xlane.f32.xlu0 %v687_v27  ;;  %v648_v26 = vsel %vm211_vm1, %v526_v22, 0.0  ;;  %v645_v27 = vsel %vm211_vm1, %v525_v24, 0.0  ;;  %v1085_v22 = vld [vmem:[#allocation5 + $0x40] sm:$0xff]  ;;  %v530_v24 = vsel %vm500_vm0, %v93_v15, 0.0  ;;  %v130_v15 = vld [vmem:[%s8417_s0 + $0x210] sm:$0xff] }
  0x6a   :  { %v5098_v29 = vcombine.low %v1085_v22, %v1089_v23 }
  0x6d   :  { %637 = vadd.xlane.f32.xlu1 %v636_v36  ;;  %634 = vadd.xlane.f32.xlu0 %v633_v37  ;;  %v509_v36 = vsel %vm500_vm0, %v72_v30, 0.0  ;;  %v546_v37 = vsel %vm500_vm0, %v109_v31, 0.0  ;;  %v660_v30 = vsel %vm211_vm1, %v530_v24, 0.0 }
  0x6e   :  { %v708_v44 = vsel %vm211_vm1, %v546_v37, 0.0  ;;  %v77_v37 = vld [vmem:[%s8417_s0 + $0x68] sm:$0xff] }
  0x71   :  { %745 = vadd.xlane.f32.xlu1 %v744_v40  ;;  %742 = vadd.xlane.f32.xlu0 %v741_v41  ;;  %v91_v40 = vld [vmem:[%s8417_s0 + $0xd8] sm:$0xff]  ;;  %v597_v41 = vsel %vm211_vm1, %v509_v36, 0.0 }
  0x72   :  { %v528_v46 = vsel %vm500_vm0, %v91_v40, 0.0 }
  0x75   :  { %589 = vadd.xlane.f32.xlu1 %v588_v47  ;;  %586 = vadd.xlane.f32.xlu0 %v585_v48  ;;  %v527_v47 = vsel %vm500_vm0, %v90_v43, 0.0  ;;  %v127_v48 = vld [vmem:[%s8417_s0 + $0x1f8] sm:$0xff]  ;;  %v1101_v43 = vld [vmem:[#allocation5 + $0xc0] sm:$0xff] }
  0x76   :  { %v651_v51 = vsel %vm211_vm1, %v527_v47, 0.0  ;;  %v564_v52 = vsel %vm500_vm0, %v127_v48, 0.0  ;;  %v113_v48 = vld [vmem:[%s8417_s0 + $0x188] sm:$0xff] }
  0x77   :  { %v762_v56 = vsel %vm211_vm1, %v564_v52, 0.0  ;;  %v550_v55 = vsel %vm500_vm0, %v113_v48, 0.0 }
  0x79   :  { %697 = vadd.xlane.f32.xlu1 %v696_v50  ;;  %694 = vadd.xlane.f32.xlu0 %v693_v54  ;;  %v654_v50 = vsel %vm211_vm1, %v528_v46, 0.0  ;;  %v75_v54 = vld [vmem:[%s8417_s0 + $0x58] sm:$0xff] }
  0x7a   :  { %v512_v58 = vsel %vm500_vm0, %v75_v54, 0.0  ;;  %v1113_v54 = vld [vmem:[#allocation5 + $0x120] sm:$0xff] }
  0x7b   :  { %v606_v62 = vsel %vm211_vm1, %v512_v58, 0.0  ;;  %v95_v58 = vld [vmem:[%s8417_s0 + $0xf8] sm:$0xff] }
  0x7d   :  { %643 = vadd.xlane.f32.xlu1 %v642_v57  ;;  %640 = vadd.xlane.f32.xlu0 %v639_v60  ;;  %v759_v57 = vsel %vm211_vm1, %v563_v53, 0.0  ;;  %v111_v60 = vld [vmem:[%s8417_s0 + $0x178] sm:$0xff]  ;;  %v1109_v53 = vld [vmem:[#allocation5 + $0x100] sm:$0xff] }
  0x7e   :  { %v548_v9 = vsel %vm500_vm0, %v111_v60, 0.0  ;;  %v5122_v60 = vcombine.low %v1109_v53, %v1113_v54 }
  0x7f   :  { %v714_v20 = vsel %vm211_vm1, %v548_v9, 0.0  ;;  %v531_v9 = vsel %vm500_vm0, %v94_v59, 0.0 }
  0x81   :  { %751 = vadd.xlane.f32.xlu1 %v750_v61  ;;  %748 = vadd.xlane.f32.xlu0 %v747_v6  ;;  %v110_v61 = vld [vmem:[%s8417_s0 + $0x170] sm:$0xff]  ;;  %v1081_v6 = vld [vmem:[#allocation5 + $0x20] sm:$0xff] }
  0x82   :  { %v547_v10 = vsel %vm500_vm0, %v110_v61, 0.0  ;;  %v5091_v11 = vcombine.high %v1077_v5, %v1081_v6  ;;  %v5090_v19 = vcombine.low %v1077_v5, %v1081_v6  ;;  %v720_v61 = vsel %vm211_vm1, %v550_v55, 0.0  ;;  %v1121_v5 = vld [vmem:[#allocation5 + $0x160] sm:$0xff] }
  0x83   :  { %v532_v6 = vsel %vm500_vm0, %v95_v58, 0.0  ;;  %v6326_v55 = vshrl.u32 %v136_v0, 7  ;;  %v207_v0 = vsel %vm138_vm2, %v5862_v2, 0.0  ;;  %v174_v2 = vsel %vm138_vm2, %v5896_v12, 0.0 }
  0x84   :  { %2446 = vmatprep.subr.bf16.mxu0 %v5091_v11  ;;  %v131_v11 = vld [vmem:[%s8417_s0 + $0x218] sm:$0xff] }
  0x85   :  { %595 = vadd.xlane.f32.xlu1 %v594_v14  ;;  %592 = vadd.xlane.f32.xlu0 %v591_v16  ;;  %v6214_v14 = vld [vmem:[#allocation5 + $0x28] sm:$0xff]  ;;  %v92_v16 = vld [vmem:[%s8417_s0 + $0xe0] sm:$0xff]  ;;  %8500 = vst [vmem:[#allocation12_spill] sm:$0xff] %v6326_v55 }
  0x86   :  { %v5093_v18 = vcombine.high %v6208_v7, %v6214_v14  ;;  %v529_v25 = vsel %vm500_vm0, %v92_v16, 0.0  ;;  %2447 = vmatpush1.bf16.msra.mxu0 %v5090_v19  ;;  %v663_v19 = vsel %vm211_vm1, %v531_v9, 0.0  ;;  %v1347_v9 = vadd.s32 4294967272, %v5856_v1 }
  0x87   :  { %v657_v31 = vsel %vm211_vm1, %v529_v25, 0.0  ;;  %v79_v25 = vld [vmem:[%s8417_s0 + $0x78] sm:$0xff] }
  0x88   :  { %2528 = vmatprep.subr.bf16.mxu1 %v5093_v18  ;;  %v666_v18 = vsel %vm211_vm1, %v532_v6, 0.0  ;;  %v1340_v6 = vadd.s32 4294967280, %v5856_v1 }
  0x89   :  { %703 = vadd.xlane.f32.xlu1 %v702_v17  ;;  %700 = vadd.xlane.f32.xlu0 %v699_v21  ;;  %v5092_v17 = vcombine.low %v6208_v7, %v6214_v14  ;;  %v711_v21 = vsel %vm211_vm1, %v547_v10, 0.0 }
  0x8d   :  { %649 = vadd.xlane.f32.xlu1 %v648_v26  ;;  %646 = vadd.xlane.f32.xlu0 %v645_v27  ;;  %v5099_v26 = vcombine.high %v1085_v22, %v1089_v23  ;;  %v129_v27 = vld [vmem:[%s8417_s0 + $0x208] sm:$0xff]  ;;  %v568_v22 = vsel %vm500_vm0, %v131_v11, 0.0  ;;  %v567_v23 = vsel %vm500_vm0, %v130_v15, 0.0  ;;  %v416_v15 = vsel %vm211_vm1, %v207_v0, 0.0  ;;  %v1181_v0 = vld [vmem:[#allocation5 + $0x340] sm:$0xff] }
  0x8e   :  { %v774_v28 = vsel %vm211_vm1, %v568_v22, 0.0 }
  0x8f   :  { %2448 = vmatprep.subr.bf16.mxu0 %v5099_v26  ;;  %v78_v26 = vld [vmem:[%s8417_s0 + $0x70] sm:$0xff] }
  0x90   :  { %2449 = vmatpush1.bf16.msra.mxu0 %v5098_v29  ;;  %v771_v29 = vsel %vm211_vm1, %v567_v23, 0.0 }
  0x91   :  { %757 = vadd.xlane.f32.xlu1 %v756_v32  ;;  %754 = vadd.xlane.f32.xlu0 %v753_v34  ;;  %v1093_v32 = vld [vmem:[#allocation5 + $0x80] sm:$0xff]  ;;  %v566_v34 = vsel %vm500_vm0, %v129_v27, 0.0 }
  0x92   :  { %v5107_v36 = vcombine.high %v1093_v32, %v1097_v33  ;;  %v5106_v40 = vcombine.low %v1093_v32, %v1097_v33  ;;  %v516_v32 = vsel %vm500_vm0, %v79_v25, 0.0  ;;  %v515_v33 = vsel %vm500_vm0, %v78_v26, 0.0  ;;  %v5610_v25 = vld [vmem:[%s8417_s0 + $0x238] sm:$0xff] }
  0x93   :  { %v210_v12 = vsel %vm138_vm2, %v5610_v25, 0.0 }
  0x94   :  { %2450 = vmatprep.subr.bf16.mxu0 %v5107_v36  ;;  %v114_v36 = vld [vmem:[%s8417_s0 + $0x190] sm:$0xff] }
  0x95   :  { %601 = vadd.xlane.f32.xlu1 %v600_v38  ;;  %598 = vadd.xlane.f32.xlu0 %v597_v41  ;;  %v76_v38 = vld [vmem:[%s8417_s0 + $0x60] sm:$0xff]  ;;  %v768_v41 = vsel %vm211_vm1, %v566_v34, 0.0 }
  0x96   :  { %v513_v46 = vsel %vm500_vm0, %v76_v38, 0.0  ;;  %2451 = vmatpush1.bf16.msra.mxu0 %v5106_v40  ;;  %v618_v38 = vsel %vm211_vm1, %v516_v32, 0.0  ;;  %v615_v40 = vsel %vm211_vm1, %v515_v33, 0.0 }
  0x97   :  { %v609_v52 = vsel %vm211_vm1, %v513_v46, 0.0 }
  0x99   :  { %709 = vadd.xlane.f32.xlu1 %v708_v44  ;;  %706 = vadd.xlane.f32.xlu0 %v705_v45  ;;  %v1105_v44 = vld [vmem:[#allocation5 + $0xe0] sm:$0xff]  ;;  %v514_v45 = vsel %vm500_vm0, %v77_v37, 0.0 }
  0x9a   :  { %v5115_v47 = vcombine.high %v1101_v43, %v1105_v44 }
  0x9c   :  { %2452 = vmatprep.subr.bf16.mxu0 %v5115_v47 }
  0x9d   :  { %655 = vadd.xlane.f32.xlu1 %v654_v50  ;;  %652 = vadd.xlane.f32.xlu0 %v651_v51  ;;  %v5114_v50 = vcombine.low %v1101_v43, %v1105_v44  ;;  %v612_v51 = vsel %vm211_vm1, %v514_v45, 0.0  ;;  %v552_v43 = vsel %vm500_vm0, %v115_v35, 0.0  ;;  %v551_v44 = vsel %vm500_vm0, %v114_v36, 0.0  ;;  %v5612_v36 = vld [vmem:[%s8417_s0 + $0x88] sm:$0xff] }
  0x9e   :  { %v726_v47 = vsel %vm211_vm1, %v552_v43, 0.0  ;;  %v723_v48 = vsel %vm211_vm1, %v551_v44, 0.0 }
  0x9f   :  { %2453 = vmatpush1.bf16.msra.mxu0 %v5114_v50  ;;  %v1153_v50 = vld [vmem:[#allocation5 + $0x260] sm:$0xff] }
  0xa1   :  { %763 = vadd.xlane.f32.xlu1 %v762_v56  ;;  %760 = vadd.xlane.f32.xlu0 %v759_v57  ;;  %v549_v56 = vsel %vm500_vm0, %v112_v49, 0.0  ;;  %v5123_v57 = vcombine.high %v1109_v53, %v1113_v54  ;;  %v1149_v49 = vld [vmem:[#allocation5 + $0x240] sm:$0xff]  ;;  %vm1415_vm0 = vcmask 851712  }
  0xa2   :  { %v5163_v53 = vcombine.high %v1149_v49, %v1153_v50  ;;  %v5162_v54 = vcombine.low %v1149_v49, %v1153_v50 }
  0xa3   :  { %2454 = vmatprep.subr.bf16.mxu0 %v5123_v57 }
  0xa4   :  { %2455 = vmatpush1.bf16.msra.mxu0 %v5122_v60  ;;  %v1161_v60 = vld [vmem:[#allocation5 + $0x2a0] sm:$0xff] }
  0xa5   :  { %607 = vadd.xlane.f32.xlu1 %v606_v62  ;;  %604 = vadd.xlane.f32.xlu0 %v603_v63  ;;  %v717_v62 = vsel %vm211_vm1, %v549_v56, 0.0  ;;  %v1117_v63 = vld [vmem:[#allocation5 + $0x140] sm:$0xff] }
  0xa6   :  { %v5131_v10 = vcombine.high %v1117_v63, %v1121_v5  ;;  %v5130_v16 = vcombine.low %v1117_v63, %v1121_v5  ;;  %v6339_v5 = vsub.s32 %v5856_v1, %v6326_v55 }
  0xa8   :  { %2456 = vmatprep.subr.bf16.mxu0 %v5131_v10  ;;  %8501 = vst [vmem:[#allocation13_spill] sm:$0xff] %v6339_v5 }
  0xa9   :  { %715 = vadd.xlane.f32.xlu1 %v714_v20  ;;  %712 = vadd.xlane.f32.xlu0 %v711_v21  ;;  %v1125_v20 = vld [vmem:[#allocation5 + $0x180] sm:$0xff] }
  0xaa   :  { %v1129_v21 = vld [vmem:[#allocation5 + $0x1a0] sm:$0xff]  ;;  %2457 = vmatpush1.bf16.msra.mxu0 %v5130_v16  ;;  %v173_v16 = vsel %vm138_vm2, %v5901_v13, 0.0 }
  0xab   :  { %v5139_v24 = vcombine.high %v1125_v20, %v1129_v21  ;;  %v5138_v27 = vcombine.low %v1125_v20, %v1129_v21  ;;  %v314_v44 = vsel %vm211_vm1, %v173_v16, 0.0 }
  0xad   :  { %661 = vadd.xlane.f32.xlu1 %v660_v30  ;;  %658 = vadd.xlane.f32.xlu0 %v657_v31  ;;  %v1133_v30 = vld [vmem:[#allocation5 + $0x1c0] sm:$0xff] }
  0xae   :  { %2458 = vmatprep.subr.bf16.mxu0 %v5139_v24  ;;  %v1137_v31 = vld [vmem:[#allocation5 + $0x1e0] sm:$0xff] }
  0xaf   :  { %2459 = vmatpush1.bf16.msra.mxu0 %v5138_v27  ;;  %v5147_v34 = vcombine.high %v1133_v30, %v1137_v31  ;;  %v5146_v37 = vcombine.low %v1133_v30, %v1137_v31  ;;  %v317_v30 = vsel %vm211_vm1, %v174_v2, 0.0 }
  0xb1   :  { %769 = vadd.xlane.f32.xlu1 %v768_v41  ;;  %766 = vadd.xlane.f32.xlu0 %v765_v42  ;;  %v1141_v41 = vld [vmem:[#allocation5 + $0x200] sm:$0xff] }
  0xb2   :  { %2460 = vmatprep.subr.bf16.mxu0 %v5147_v34  ;;  %v1145_v42 = vld [vmem:[#allocation5 + $0x220] sm:$0xff]  ;;  %v5611_v34 = vld [vmem:[%s8417_s0 + $0x230] sm:$0xff] }
  0xb3   :  { %2461 = vmatpush1.bf16.msra.mxu0 %v5146_v37  ;;  %v5155_v45 = vcombine.high %v1141_v41, %v1145_v42  ;;  %v5154_v46 = vcombine.low %v1141_v41, %v1145_v42  ;;  %v209_v35 = vsel %vm138_vm2, %v5611_v34, 0.0  ;;  %v156_v37 = vsel %vm138_vm2, %v5612_v36, 0.0  ;;  %v1173_v41 = vld [vmem:[#allocation5 + $0x300] sm:$0xff] }
  0xb4   :  { %v1177_v42 = vld [vmem:[#allocation5 + $0x320] sm:$0xff] }
  0xb5   :  { %613 = vadd.xlane.f32.xlu1 %v612_v51  ;;  %610 = vadd.xlane.f32.xlu0 %v609_v52  ;;  %v172_v51 = vsel %vm138_vm2, %v5886_v8, 0.0  ;;  %v171_v52 = vsel %vm138_vm2, %v5867_v3, 0.0  ;;  %v1157_v8 = vld [vmem:[#allocation5 + $0x280] sm:$0xff]  ;;  %v208_v3 = vsel %vm138_vm2, %v5872_v4, 0.0 }
  0xb6   :  { %2462 = vmatprep.subr.bf16.mxu0 %v5155_v45  ;;  %v311_v58 = vsel %vm211_vm1, %v172_v51, 0.0  ;;  %v308_v59 = vsel %vm211_vm1, %v171_v52, 0.0  ;;  %v5170_v63 = vcombine.low %v1157_v8, %v1161_v60  ;;  %v419_v4 = vsel %vm211_vm1, %v208_v3, 0.0  ;;  %v5614_v45 = vld [vmem:[%s8417_s0 + $0x1a8] sm:$0xff] }
  0xb7   :  { %2463 = vmatpush1.bf16.msra.mxu0 %v5154_v46  ;;  %v192_v46 = vsel %vm138_vm2, %v5614_v45, 0.0  ;;  %v5187_v52 = vcombine.high %v1173_v41, %v1177_v42  ;;  %v5618_v45 = vld [vmem:[%s8417_s0 + $0x98] sm:$0xff] }
  0xb8   :  { %2464 = vmatprep.subr.bf16.mxu0 %v5163_v53  ;;  %v425_v53 = vsel %vm211_vm1, %v210_v12, 0.0  ;;  %v6397_v3 = vsel %vm211_vm1, %v192_v46, 0.0  ;;  %v158_v46 = vsel %vm138_vm2, %v5618_v45, 0.0 }
  0xb9   :  { %721 = vadd.xlane.f32.xlu1 %v720_v61  ;;  %718 = vadd.xlane.f32.xlu0 %v717_v62  ;;  %v1333_v61 = vadd.s32 4294967288, %v5856_v1  ;;  %v5171_v62 = vcombine.high %v1157_v8, %v1161_v60 }
  0xbb   :  { %2465 = vmatpush1.bf16.msra.mxu0 %v5162_v54  ;;  %v6352_v21 = vsub.s32 %v1333_v61, %v6326_v55  ;;  %v422_v54 = vsel %vm211_vm1, %v209_v35, 0.0 }
  0xbc   :  { %2466 = vmatprep.subr.bf16.mxu0 %v5171_v62  ;;  %v1185_v62 = vld [vmem:[#allocation5 + $0x360] sm:$0xff] }
  0xbd   :  { %667 = vadd.xlane.f32.xlu1 %v666_v18  ;;  %664 = vadd.xlane.f32.xlu0 %v663_v19  ;;  %v1165_v18 = vld [vmem:[#allocation5 + $0x2c0] sm:$0xff]  ;;  %8502 = vst [vmem:[#allocation14_spill] sm:$0xff] %v6352_v21  ;;  %v5194_v34 = vcombine.low %v1181_v0, %v1185_v62 }
  0xbe   :  { %v1169_v19 = vld [vmem:[#allocation5 + $0x2e0] sm:$0xff] }
  0xbf   :  { %2467 = vmatpush1.bf16.msra.mxu0 %v5170_v63  ;;  %v5179_v26 = vcombine.high %v1165_v18, %v1169_v19  ;;  %v5178_v13 = vcombine.low %v1165_v18, %v1169_v19  ;;  %v5195_v18 = vcombine.high %v1181_v0, %v1185_v62  ;;  %v6443_v0 = vld [vmem:[#allocation5 + $0x48] sm:$0xff] }
  0xc0   :  { %v6445_v62 = vld [vmem:[#allocation5 + $0x68] sm:$0xff] }
  0xc1   :  { %775 = vadd.xlane.f32.xlu1 %v774_v28  ;;  %772 = vadd.xlane.f32.xlu0 %v771_v29  ;;  %v6360_v28 = vsub.s32 %v1340_v6, %v6326_v55  ;;  %v6363_v29 = vsub.s32 %v1347_v9, %v6326_v55 }
  0xc2   :  { %2468 = vmatprep.subr.bf16.mxu0 %v5179_v26 }
  0xc3   :  { %8503 = vst [vmem:[#allocation15_spill] sm:$0xff] %v6360_v28  ;;  %8504 = vst [vmem:[#allocation16_spill] sm:$0xff] %v6363_v29  ;;  %2469 = vmatpush1.bf16.msra.mxu0 %v5178_v13 }
  0xc4   :  { %2470 = vmatprep.subr.bf16.mxu0 %v5187_v52  ;;  %v1201_v52 = vld [vmem:[#allocation5 + $0x3e0] sm:$0xff] }
  0xc5   :  { %619 = vadd.xlane.f32.xlu1 %v618_v38  ;;  %616 = vadd.xlane.f32.xlu0 %v615_v40  ;;  %v5613_v38 = vld [vmem:[%s8417_s0 + $0x80] sm:$0xff] }
  0xc6   :  { %v155_v40 = vsel %vm138_vm2, %v5613_v38, 0.0 }
  0xc9   :  { %727 = vadd.xlane.f32.xlu1 %v726_v47  ;;  %724 = vadd.xlane.f32.xlu0 %v723_v48  ;;  %v5615_v47 = vld [vmem:[%s8417_s0 + $0x1a0] sm:$0xff] }
  0xca   :  { %v779_v56 = vpop.xlane.xlu1 %778  ;;  %v671_v57 = vpop.xlane.xlu0 %670  ;;  %v191_v48 = vsel %vm138_vm2, %v5615_v47, 0.0 }
  0xcb   :  { %v821_v20 = vmul.f32 0.020408163, %v671_v57  ;;  %v857_v24 = vmul.f32 0.020408163, %v779_v56  ;;  %v263_v56 = vsel %vm211_vm1, %v156_v37, 0.0  ;;  %v260_v57 = vsel %vm211_vm1, %v155_v40, 0.0 }
  0xcc   :  { %v6400_v9 = vsel %vm211_vm1, %v191_v48, 0.0 }
  0xcd   :  { %312 = vadd.xlane.f32.xlu1 %v311_v58  ;;  %309 = vadd.xlane.f32.xlu0 %v308_v59 }
  0xce   :  { %v782_v10 = vpop.xlane.xlu1 %781  ;;  %v674_v11 = vpop.xlane.xlu0 %673 }
  0xcf   :  { %v858_v22 = vmul.f32 0.020408163, %v782_v10  ;;  %v822_v23 = vmul.f32 0.020408163, %v674_v11 }
  0xd1   :  { %v1057_v27 = vpack.c.bf16 %v822_v23, %v821_v20  ;;  %420 = vadd.xlane.f32.xlu1 %v419_v4  ;;  %417 = vadd.xlane.f32.xlu0 %v416_v15  ;;  %v1075_v31 = vpack.c.bf16 %v858_v22, %v857_v24  ;;  %v5186_v15 = vcombine.low %v1173_v41, %v1177_v42 }
  0xd2   :  { %v680_v32 = vpop.xlane.xlu1 %679  ;;  %v677_v33 = vpop.xlane.xlu0 %676 }
  0xd3   :  { %v1289_v43 = vunpack.c.l.b16 %v1057_v27  ;;  %v1290_v49 = vunpack.c.h.b16 %v1057_v27  ;;  %v824_v50 = vmul.f32 0.020408163, %v680_v32  ;;  %v823_v51 = vmul.f32 0.020408163, %v677_v33  ;;  %2471 = vmatpush1.bf16.msra.mxu0 %v5186_v15  ;;  %v1189_v27 = vld [vmem:[#allocation5 + $0x380] sm:$0xff]  ;;  %v5616_v32 = vld [vmem:[%s8417_s0 + $0x8] sm:$0xff] }
  0xd4   :  { %v1325_v58 = vunpack.c.l.b16 %v1075_v31  ;;  %v1326_v59 = vunpack.c.h.b16 %v1075_v31  ;;  %2472 = vmatprep.subr.bf16.mxu0 %v5195_v18  ;;  %v140_v33 = vsel %vm138_vm2, %v5616_v32, 0.0  ;;  %v5621_v18 = vld [vmem:[%s8417_s0 + $0x120] sm:$0xff] }
  0xd5   :  { %318 = vadd.xlane.f32.xlu1 %v317_v30  ;;  %v1058_v8 = vpack.c.bf16 %v824_v50, %v823_v51  ;;  %315 = vadd.xlane.f32.xlu0 %v314_v44  ;;  %v1520_v10 = vrot.slane %v1289_v43, %v6339_v5  ;;  %v1524_v11 = vrot.slane %v1290_v49, %v6352_v21  ;;  %v1193_v30 = vld [vmem:[#allocation5 + $0x3a0] sm:$0xff] }
  0xd6   :  { %v788_v60 = vpop.xlane.xlu1 %787  ;;  %v785_v61 = vpop.xlane.xlu0 %784  ;;  %v1697_v19 = vrot.slane %v1325_v58, %v6339_v5  ;;  %v1701_v20 = vrot.slane %v1326_v59, %v6352_v21  ;;  %v5617_v43 = vld [vmem:[%s8417_s0] sm:$0xff]  ;;  %v5203_v47 = vcombine.high %v1189_v27, %v1193_v30  ;;  %v5202_v58 = vcombine.low %v1189_v27, %v1193_v30  ;;  %v5623_v27 = vld [vmem:[%s8417_s0 + $0x1b0] sm:$0xff] }
  0xd7   :  { %v860_v63 = vmul.f32 0.020408163, %v788_v60  ;;  %v859_v6 = vmul.f32 0.020408163, %v785_v61  ;;  %v1291_v4 = vunpack.c.l.b16 %v1058_v8  ;;  %v1292_v2 = vunpack.c.h.b16 %v1058_v8  ;;  %2473 = vmatpush1.bf16.msra.mxu0 %v5194_v34  ;;  %v1197_v51 = vld [vmem:[#allocation5 + $0x3c0] sm:$0xff]  ;;  %v6489_v34 = vld [vmem:[#allocation5 + $0xa8] sm:$0xff] }
  0xd8   :  { %v1525_v31 = vsel %vm1338_vm3, %v1524_v11, %v1520_v10  ;;  %v139_v44 = vsel %vm138_vm2, %v5617_v43, 0.0  ;;  %v1702_v48 = vsel %vm1338_vm3, %v1701_v20, %v1697_v19  ;;  %2474 = vmatprep.subr.bf16.mxu0 %v5203_v47  ;;  %v269_v11 = vsel %vm211_vm1, %v158_v46, 0.0  ;;  %v5622_v20 = vld [vmem:[%s8417_s0 + $0x1b8] sm:$0xff] }
  0xd9   :  { %v1076_v16 = vpack.c.bf16 %v860_v63, %v859_v6  ;;  %426 = vadd.xlane.f32.xlu1 %v425_v53  ;;  %v1529_v22 = vrot.slane %v1291_v4, %v6360_v28  ;;  %423 = vadd.xlane.f32.xlu0 %v422_v54  ;;  %v1534_v35 = vrot.slane %v1292_v2, %v6363_v29  ;;  %v215_v54 = vsel %vm211_vm1, %v140_v33, 0.0  ;;  %v6455_v2 = vld [vmem:[#allocation5 + $0x408] sm:$0xff] }
  0xda   :  { %v626_v23 = vpop.xlane.xlu1 %625  ;;  %v623_v24 = vpop.xlane.xlu0 %622  ;;  %v212_v61 = vsel %vm211_vm1, %v139_v44, 0.0  ;;  %v5211_v15 = vcombine.high %v1197_v51, %v1201_v52  ;;  %8505 = vst [vmem:[#allocation17_spill] sm:$0xff] %v6455_v2  ;;  %v175_v19 = vsel %vm138_vm2, %v5621_v18, 0.0  ;;  %v193_v30 = vsel %vm138_vm2, %v5623_v27, 0.0  ;;  %v6487_v33 = vld [vmem:[#allocation5 + $0x88] sm:$0xff] }
  0xdb   :  { %v1327_v25 = vunpack.c.l.b16 %v1076_v16  ;;  %v1328_v12 = vunpack.c.h.b16 %v1076_v16  ;;  %v806_v26 = vmul.f32 0.020408163, %v626_v23  ;;  %v805_v13 = vmul.f32 0.020408163, %v623_v24  ;;  %2475 = vmatpush1.bf16.msra.mxu0 %v5202_v58  ;;  %v6457_v16 = vld [vmem:[#allocation5 + $0x428] sm:$0xff]  ;;  %v6469_v23 = vld [vmem:[#allocation5 + $0x410] sm:$0xff] }
  0xdc   :  { %v1530_v42 = vsel %vm1345_vm4, %v1529_v22, %v1525_v31  ;;  %8506 = vst [vmem:[#allocation18_spill] sm:$0xff] %v6457_v16  ;;  %v194_v22 = vsel %vm138_vm2, %v5622_v20, 0.0  ;;  %8507 = vst [vmem:[#allocation19_spill] sm:$0xff] %v6469_v23  ;;  %v6471_v24 = vld [vmem:[#allocation5 + $0x430] sm:$0xff]  ;;  %2476 = vmatprep.subr.bf16.mxu0 %v5211_v15  ;;  %v5624_v31 = vld [vmem:[%s8417_s0 + $0x18] sm:$0xff]  ;;  %v374_v7 = vsel %vm211_vm1, %v193_v30, 0.0 }
  0xdd   :  { %v1706_v36 = vrot.slane %v1327_v25, %v6360_v28  ;;  %v1711_v37 = vrot.slane %v1328_v12, %v6363_v29  ;;  %v6416_v38 = vpack.c.bf16 %v806_v26, %v805_v13  ;;  %264 = vadd.xlane.f32.xlu1 %v263_v56  ;;  %261 = vadd.xlane.f32.xlu0 %v260_v57  ;;  %v5619_v56 = vld [vmem:[%s8417_s0 + $0x90] sm:$0xff]  ;;  %v142_v32 = vsel %vm138_vm2, %v5624_v31, 0.0 }
  0xde   :  { %v734_v40 = vpop.xlane.xlu1 %733  ;;  %v731_v41 = vpop.xlane.xlu0 %730  ;;  %v157_v57 = vsel %vm138_vm2, %v5619_v56, 0.0  ;;  %v1535_v8 = vsel %vm1352_vm5, %v1534_v35, %v1530_v42  ;;  %8508 = vst [vmem:[#allocation20_spill] sm:$0xff] %v6471_v24  ;;  %v5101_v26 = vcombine.high %v6443_v0, %v6445_v62  ;;  %v5210_v13 = vcombine.low %v1197_v51, %v1201_v52  ;;  %v6525_v56 = vld [vmem:[#allocation5 + $0xe8] sm:$0xff]  ;;  %v5627_v15 = vld [vmem:[%s8417_s0 + $0x130] sm:$0xff] }
  0xdf   :  { %v842_v49 = vmul.f32 0.020408163, %v734_v40  ;;  %v841_v50 = vmul.f32 0.020408163, %v731_v41  ;;  %v1707_v53 = vsel %vm1345_vm4, %v1706_v36, %v1702_v48  ;;  %v5221_v36 = vcombine.high %v6455_v2, %v6457_v16 }
  0xe0   :  { %v1712_v60 = vsel %vm1352_vm5, %v1711_v37, %v1707_v53  ;;  %v1273_v37 = vunpack.c.l.b16 %v6416_v38  ;;  %v1274_v40 = vunpack.c.h.b16 %v6416_v38  ;;  %v266_v47 = vsel %vm211_vm1, %v157_v57, 0.0  ;;  %2477 = vmatpush1.bf16.msra.mxu0 %v5210_v13  ;;  %v1114_v13 = vld [vmem:[#allocation5 + $0x128] sm:$0xff] }
  0xe1   :  { %v6437_v59 = vpack.c.bf16 %v842_v49, %v841_v50  ;;  %372 = vadd.xlane.f32.xlu1 %v6397_v3  ;;  %369 = vadd.xlane.f32.xlu0 %v6400_v9  ;;  %v1716_v10 = vsel %vm1713_vm6, %v1712_v60, %v1535_v8  ;;  %v5620_v3 = vld [vmem:[%s8417_s0 + $0x128] sm:$0xff]  ;;  %v5100_v38 = vcombine.low %v6443_v0, %v6445_v62  ;;  %v320_v49 = vsel %vm211_vm1, %v175_v19, 0.0 }
  0xe2   :  { %v578_v63 = vpop.xlane.xlu1 %577  ;;  %v575_v6 = vpop.xlane.xlu0 %574  ;;  %v176_v4 = vsel %vm138_vm2, %v5620_v3, 0.0  ;;  %v6473_v12 = vpack.c.b16 %v1716_v10, %v1716_v10  ;;  %v377_v50 = vsel %vm211_vm1, %v194_v22, 0.0  ;;  %v5109_v51 = vcombine.high %v6487_v33, %v6489_v34  ;;  %2569 = vmatprep.subr.bf16.mxu0 %v5221_v36 }
  0xe3   :  { %v790_v9 = vmul.f32 0.020408163, %v578_v63  ;;  %v789_v25 = vmul.f32 0.020408163, %v575_v6  ;;  %v323_v48 = vsel %vm211_vm1, %v176_v4, 0.0  ;;  %v6516_v14 = vsel %vm211_vm1, %v142_v32, 0.0 }
  0xe4   :  { %8509 = vst [vmem:[#allocation21_spill] sm:$0xff] %v6473_v12  ;;  %5234 = vmatmul.mubr.msk.bf16.vlgmr.msra.gmra.mrb[0].mxu1 %vm2442_vm7, %v6473_v12  ;;  %v1441_v57 = vrot.slane %v1273_v37, %v6339_v5  ;;  %v1445_v58 = vrot.slane %v1274_v40, %v6352_v21  ;;  %v5108_v62 = vcombine.low %v6487_v33, %v6489_v34  ;;  %v1309_v3 = vunpack.c.l.b16 %v6437_v59  ;;  %v5629_v34 = vld [vmem:[%s8417_s0 + $0xa0] sm:$0xff]  ;;  %v5670_v12 = vld [vmem:[%s8417_s0 + $0x218] sm:$0xff] }
  0xe5   :  { %216 = vadd.xlane.f32.xlu1 %v215_v54  ;;  %v6497_v41 = vpack.c.bf16 %v790_v9, %v789_v25  ;;  %213 = vadd.xlane.f32.xlu0 %v212_v61  ;;  %v6523_v54 = vld [vmem:[#allocation5 + $0xc8] sm:$0xff]  ;;  %v5626_v61 = vld [vmem:[%s8417_s0 + $0x138] sm:$0xff]  ;;  %v177_v9 = vsel %vm138_vm2, %v5627_v15, 0.0  ;;  %v1310_v19 = vunpack.c.h.b16 %v6437_v59  ;;  %v159_v36 = vsel %vm138_vm2, %v5629_v34, 0.0 }
  0xe6   :  { %v632_v42 = vpop.xlane.xlu1 %631  ;;  %v629_v43 = vpop.xlane.xlu0 %628  ;;  %2529 = vmatpush1.bf16.msra.mxu1 %v5092_v17  ;;  %v5625_v17 = vld [vmem:[%s8417_s0 + $0x10] sm:$0xff]  ;;  %v178_v0 = vsel %vm138_vm2, %v5626_v61, 0.0  ;;  %v5117_v18 = vcombine.high %v6523_v54, %v6525_v56  ;;  %v1446_v27 = vsel %vm1338_vm3, %v1445_v58, %v1441_v57  ;;  %v5628_v59 = vld [vmem:[%s8417_s0 + $0xa8] sm:$0xff]  ;;  %v1361_v58 = vadd.s32 4294967256, %v5856_v1 }
  0xe7   :  { %v808_v45 = vmul.f32 0.020408163, %v632_v42  ;;  %v807_v46 = vmul.f32 0.020408163, %v629_v43  ;;  %2530 = vmatprep.subr.bf16.mxu1 %v5101_v26  ;;  %v141_v53 = vsel %vm138_vm2, %v5625_v17, 0.0  ;;  %v6552_v26 = vld [vmem:[#allocation5 + $0x108] sm:$0xff]  ;;  %v5116_v43 = vcombine.low %v6523_v54, %v6525_v56 }
  0xe8   :  { %v6538_v4 = vsel %vm211_vm1, %v141_v53, 0.0  ;;  %v6556_v32 = vsel %vm211_vm1, %v178_v0, 0.0  ;;  %v160_v33 = vsel %vm138_vm2, %v5628_v59, 0.0  ;;  %v1354_v42 = vadd.s32 4294967264, %v5856_v1  ;;  %v6583_v17 = vld [vmem:[#allocation5 + $0x148] sm:$0xff] }
  0xe9   :  { %v1050_v52 = vpack.c.bf16 %v808_v45, %v807_v46  ;;  %270 = vadd.xlane.f32.xlu1 %v269_v11  ;;  %267 = vadd.xlane.f32.xlu0 %v266_v47  ;;  %v6576_v47 = vsel %vm211_vm1, %v177_v9, 0.0  ;;  %v6585_v53 = vld [vmem:[#allocation5 + $0x168] sm:$0xff] }
  0xea   :  { %v686_v8 = vpop.xlane.xlu1 %685  ;;  %v683_v60 = vpop.xlane.xlu0 %682  ;;  %2531 = vmatpush1.bf16.msra.mxu1 %v5100_v38  ;;  %v5125_v38 = vcombine.high %v6552_v26, %v1114_v13  ;;  %v6606_v9 = vld [vmem:[#allocation5 + $0x188] sm:$0xff] }
  0xeb   :  { %v1275_v63 = vunpack.c.l.b16 %v1050_v52  ;;  %v1276_v6 = vunpack.c.h.b16 %v1050_v52  ;;  %v826_v10 = vmul.f32 0.020408163, %v686_v8  ;;  %v825_v11 = vmul.f32 0.020408163, %v683_v60  ;;  %2532 = vmatprep.subr.bf16.mxu1 %v5109_v51  ;;  %v5630_v34 = vld [vmem:[%s8417_s0 + $0x1c8] sm:$0xff] }
  0xec   :  { %v1257_v51 = vunpack.c.l.b16 %v6497_v41  ;;  %v1258_v52 = vunpack.c.h.b16 %v6497_v41  ;;  %v6589_v8 = vsel %vm211_vm1, %v160_v33, 0.0  ;;  %v6592_v60 = vsel %vm211_vm1, %v159_v36, 0.0 }
  0xed   :  { %v1450_v20 = vrot.slane %v1275_v63, %v6360_v28  ;;  %v1455_v22 = vrot.slane %v1276_v6, %v6363_v29  ;;  %v6550_v25 = vpack.c.bf16 %v826_v10, %v825_v11  ;;  %324 = vadd.xlane.f32.xlu1 %v323_v48  ;;  %321 = vadd.xlane.f32.xlu0 %v320_v49 }
  0xee   :  { %v740_v30 = vpop.xlane.xlu1 %739  ;;  %v737_v31 = vpop.xlane.xlu0 %736  ;;  %2533 = vmatpush1.bf16.msra.mxu1 %v5108_v62  ;;  %v1618_v48 = vrot.slane %v1309_v3, %v6339_v5  ;;  %v1622_v49 = vrot.slane %v1310_v19, %v6352_v21  ;;  %v6595_v41 = vsub.s32 %v1354_v42, %v6326_v55  ;;  %v5132_v63 = vcombine.low %v6583_v17, %v6585_v53 }
  0xef   :  { %v1451_v37 = vsel %vm1345_vm4, %v1450_v20, %v1446_v27  ;;  %v844_v40 = vmul.f32 0.020408163, %v740_v30  ;;  %v843_v46 = vmul.f32 0.020408163, %v737_v31  ;;  %2534 = vmatprep.subr.bf16.mxu1 %v5117_v18  ;;  %v5133_v6 = vcombine.high %v6583_v17, %v6585_v53  ;;  %v6608_v18 = vld [vmem:[#allocation5 + $0x1a8] sm:$0xff] }
  0xf0   :  { %v6573_v45 = vsel %vm1352_vm5, %v1455_v22, %v1451_v37  ;;  %8510 = vst [vmem:[#allocation22_spill] sm:$0xff] %v6595_v41  ;;  %v1623_v10 = vsel %vm1338_vm3, %v1622_v49, %v1618_v48  ;;  %v1332_v11 = vrot.slane %v1257_v51, %v6339_v5  ;;  %v1337_v3 = vrot.slane %v1258_v52, %v6352_v21  ;;  %v6636_v48 = vld [vmem:[#allocation5 + $0x1e8] sm:$0xff] }
  0xf1   :  { %378 = vadd.xlane.f32.xlu1 %v377_v50  ;;  %v1068_v54 = vpack.c.bf16 %v844_v40, %v843_v46  ;;  %375 = vadd.xlane.f32.xlu0 %v374_v7  ;;  %v5124_v50 = vcombine.low %v6552_v26, %v1114_v13  ;;  %v1293_v19 = vunpack.c.l.b16 %v6550_v25  ;;  %v1294_v20 = vunpack.c.h.b16 %v6550_v25 }
  0xf2   :  { %v584_v56 = vpop.xlane.xlu1 %583  ;;  %v581_v57 = vpop.xlane.xlu0 %580  ;;  %2535 = vmatpush1.bf16.msra.mxu1 %v5116_v43  ;;  %v196_v25 = vsel %vm138_vm2, %v5630_v34, 0.0  ;;  %v5141_v37 = vcombine.high %v6606_v9, %v6608_v18  ;;  %v1339_v49 = vsel %vm1338_vm3, %v1337_v3, %v1332_v11  ;;  %v6658_v11 = vld [vmem:[#allocation5 + $0x208] sm:$0xff] }
  0xf3   :  { %v792_v61 = vmul.f32 0.020408163, %v584_v56  ;;  %v791_v0 = vmul.f32 0.020408163, %v581_v57  ;;  %v1311_v62 = vunpack.c.l.b16 %v1068_v54  ;;  %v1312_v7 = vunpack.c.h.b16 %v1068_v54  ;;  %2536 = vmatprep.subr.bf16.mxu1 %v5125_v38  ;;  %v6634_v38 = vld [vmem:[#allocation5 + $0x1c8] sm:$0xff] }
  0xf4   :  { %v1539_v51 = vrot.slane %v1293_v19, %v6339_v5  ;;  %v1543_v52 = vrot.slane %v1294_v20, %v6352_v21  ;;  %v5140_v54 = vcombine.low %v6606_v9, %v6608_v18  ;;  %v6660_v3 = vld [vmem:[#allocation5 + $0x228] sm:$0xff]  ;;  %v5633_v20 = vld [vmem:[%s8417_s0 + $0x20] sm:$0xff] }
  0xf5   :  { %v1042_v15 = vpack.c.bf16 %v792_v61, %v791_v0  ;;  %222 = vadd.xlane.f32.xlu1 %v6516_v14  ;;  %v1627_v22 = vrot.slane %v1311_v62, %v6360_v28  ;;  %v1632_v26 = vrot.slane %v1312_v7, %v6363_v29  ;;  %219 = vadd.xlane.f32.xlu0 %v6538_v4  ;;  %v5631_v4 = vld [vmem:[%s8417_s0 + $0x1c0] sm:$0xff]  ;;  %v5632_v19 = vld [vmem:[%s8417_s0 + $0x28] sm:$0xff] }
  0xf6   :  { %v692_v13 = vpop.xlane.xlu1 %691  ;;  %v689_v27 = vpop.xlane.xlu0 %688  ;;  %2537 = vmatpush1.bf16.msra.mxu1 %v5124_v50  ;;  %v195_v36 = vsel %vm138_vm2, %v5631_v4, 0.0  ;;  %v6649_v50 = vsub.s32 %v1361_v58, %v6326_v55  ;;  %v1544_v58 = vsel %vm1338_vm3, %v1543_v52, %v1539_v51  ;;  %v5634_v4 = vld [vmem:[%s8417_s0 + $0x148] sm:$0xff]  ;;  %v5156_v52 = vcombine.low %v6658_v11, %v6660_v3 }
  0xf7   :  { %v1259_v30 = vunpack.c.l.b16 %v1042_v15  ;;  %v1260_v31 = vunpack.c.h.b16 %v1042_v15  ;;  %v828_v59 = vmul.f32 0.020408163, %v692_v13  ;;  %v827_v14 = vmul.f32 0.020408163, %v689_v27  ;;  %2538 = vmatprep.subr.bf16.mxu1 %v5133_v6 }
  0xf8   :  { %v1628_v33 = vsel %vm1345_vm4, %v1627_v22, %v1623_v10  ;;  %8511 = vst [vmem:[#allocation23_spill] sm:$0xff] %v6649_v50  ;;  %v383_v10 = vsel %vm211_vm1, %v196_v25, 0.0  ;;  %v143_v22 = vsel %vm138_vm2, %v5633_v20, 0.0  ;;  %v5148_v27 = vcombine.low %v6634_v38, %v6636_v48 }
  0xf9   :  { %v6629_v40 = vsel %vm1352_vm5, %v1632_v26, %v1628_v33  ;;  %v1344_v42 = vrot.slane %v1259_v30, %v6360_v28  ;;  %v1351_v43 = vrot.slane %v1260_v31, %v6363_v29  ;;  %v1060_v46 = vpack.c.bf16 %v828_v59, %v827_v14  ;;  %330 = vadd.xlane.f32.xlu1 %v6556_v32 }
  0xfa   :  { %327 = vadd.xlane.f32.xlu0 %v6576_v47  ;;  %v638_v17 = vpop.xlane.xlu1 %637  ;;  %v635_v53 = vpop.xlane.xlu0 %634  ;;  %2539 = vmatpush1.bf16.msra.mxu1 %v5132_v63  ;;  %v5149_v47 = vcombine.high %v6634_v38, %v6636_v48  ;;  %v380_v63 = vsel %vm211_vm1, %v195_v36, 0.0  ;;  %v5157_v14 = vcombine.high %v6658_v11, %v6660_v3  ;;  %v224_v25 = vsel %vm211_vm1, %v143_v22, 0.0 }
  0xfb   :  { %v1346_v32 = vsel %vm1345_vm4, %v1344_v42, %v1339_v49  ;;  %v1295_v56 = vunpack.c.l.b16 %v1060_v46  ;;  %v1296_v57 = vunpack.c.h.b16 %v1060_v46  ;;  %v810_v61 = vmul.f32 0.020408163, %v638_v17  ;;  %2540 = vmatprep.subr.bf16.mxu1 %v5141_v37  ;;  %v1150_v37 = vld [vmem:[#allocation5 + $0x248] sm:$0xff]  ;;  %v5635_v49 = vld [vmem:[%s8417_s0 + $0x140] sm:$0xff] }
  0xfc   :  { %v6646_v0 = vsel %vm1352_vm5, %v1351_v43, %v1346_v32  ;;  %v809_v62 = vmul.f32 0.020408163, %v635_v53  ;;  %v180_v36 = vsel %vm138_vm2, %v5634_v4, 0.0  ;;  %v1154_v42 = vld [vmem:[#allocation5 + $0x268] sm:$0xff]  ;;  %v179_v51 = vsel %vm138_vm2, %v5635_v49, 0.0 }
  0xfd   :  { %v1548_v7 = vrot.slane %v1295_v56, %v6360_v28  ;;  %v1553_v6 = vrot.slane %v1296_v57, %v6363_v29  ;;  %276 = vadd.xlane.f32.xlu1 %v6589_v8  ;;  %v144_v8 = vsel %vm138_vm2, %v5632_v19, 0.0  ;;  %v335_v57 = vsel %vm211_vm1, %v180_v36, 0.0 }
  0xfe   :  { %v1051_v15 = vpack.c.bf16 %v810_v61, %v809_v62  ;;  %273 = vadd.xlane.f32.xlu0 %v6592_v60  ;;  %v746_v9 = vpop.xlane.xlu1 %745  ;;  %v743_v18 = vpop.xlane.xlu0 %742  ;;  %2541 = vmatpush1.bf16.msra.mxu1 %v5140_v54  ;;  %v227_v34 = vsel %vm211_vm1, %v144_v8, 0.0  ;;  %v5165_v61 = vcombine.high %v1150_v37, %v1154_v42  ;;  %v5164_v19 = vcombine.low %v1150_v37, %v1154_v42  ;;  %v5638_v42 = vld [vmem:[%s8417_s0 + $0x1d8] sm:$0xff] }
  0xff   :  { %v1549_v26 = vsel %vm1345_vm4, %v1548_v7, %v1544_v58  ;;  %v846_v13 = vmul.f32 0.020408163, %v746_v9  ;;  %v845_v60 = vmul.f32 0.020408163, %v743_v18  ;;  %2542 = vmatprep.subr.bf16.mxu1 %v5149_v47  ;;  %v5636_v58 = vld [vmem:[%s8417_s0 + $0xb8] sm:$0xff]  ;;  %v5637_v9 = vld [vmem:[%s8417_s0 + $0xb0] sm:$0xff] }
 0x100   :  { %v6678_v30 = vsel %vm1352_vm5, %v1553_v6, %v1549_v26  ;;  %v1277_v31 = vunpack.c.l.b16 %v1051_v15  ;;  %v1278_v59 = vunpack.c.h.b16 %v1051_v15  ;;  %v162_v15 = vsel %vm138_vm2, %v5636_v58, 0.0 }
 0x101   :  { %v1069_v33 = vpack.c.bf16 %v846_v13, %v845_v60  ;;  %384 = vadd.xlane.f32.xlu1 %v383_v10  ;;  %v1158_v10 = vld [vmem:[#allocation5 + $0x288] sm:$0xff]  ;;  %v161_v18 = vsel %vm138_vm2, %v5637_v9, 0.0  ;;  %v281_v4 = vsel %vm211_vm1, %v162_v15, 0.0 }
 0x102   :  { %v1460_v43 = vrot.slane %v1277_v31, %v6595_v41  ;;  %v1465_v46 = vrot.slane %v1278_v59, %v6649_v50  ;;  %381 = vadd.xlane.f32.xlu0 %v380_v63  ;;  %v590_v38 = vpop.xlane.xlu1 %589  ;;  %v587_v48 = vpop.xlane.xlu0 %586  ;;  %2543 = vmatpush1.bf16.msra.mxu1 %v5148_v27  ;;  %v1162_v63 = vld [vmem:[#allocation5 + $0x2a8] sm:$0xff]  ;;  %v278_v36 = vsel %vm211_vm1, %v161_v18, 0.0 }
 0x103   :  { %v1313_v17 = vunpack.c.l.b16 %v1069_v33  ;;  %v1314_v53 = vunpack.c.h.b16 %v1069_v33  ;;  %v794_v54 = vmul.f32 0.020408163, %v590_v38  ;;  %v793_v32 = vmul.f32 0.020408163, %v587_v48  ;;  %2544 = vmatprep.subr.bf16.mxu1 %v5157_v14  ;;  %v1166_v14 = vld [vmem:[#allocation5 + $0x2c8] sm:$0xff] }
 0x104   :  { %v1461_v56 = vsel %vm1359_vm8, %v1460_v43, %v6573_v45  ;;  %v332_v45 = vsel %vm211_vm1, %v179_v51, 0.0  ;;  %v5173_v27 = vcombine.high %v1158_v10, %v1162_v63  ;;  %v1170_v33 = vld [vmem:[#allocation5 + $0x2e8] sm:$0xff]  ;;  %v198_v43 = vsel %vm138_vm2, %v5638_v42, 0.0 }
 0x105   :  { %v6702_v62 = vsel %vm1366_vm9, %v1465_v46, %v1461_v56  ;;  %v1637_v47 = vrot.slane %v1313_v17, %v6595_v41  ;;  %v1642_v7 = vrot.slane %v1314_v53, %v6649_v50  ;;  %v1043_v6 = vpack.c.bf16 %v794_v54, %v793_v32  ;;  %228 = vadd.xlane.f32.xlu1 %v227_v34  ;;  %v5639_v46 = vld [vmem:[%s8417_s0 + $0x1d0] sm:$0xff]  ;;  %v1174_v17 = vld [vmem:[#allocation5 + $0x308] sm:$0xff] }
 0x106   :  { %225 = vadd.xlane.f32.xlu0 %v224_v25  ;;  %v698_v11 = vpop.xlane.xlu1 %697  ;;  %v695_v3 = vpop.xlane.xlu0 %694  ;;  %2545 = vmatpush1.bf16.msra.mxu1 %v5156_v52  ;;  %v197_v38 = vsel %vm138_vm2, %v5639_v46, 0.0  ;;  %v5172_v48 = vcombine.low %v1158_v10, %v1162_v63  ;;  %v5181_v52 = vcombine.high %v1166_v14, %v1170_v33  ;;  %v1178_v53 = vld [vmem:[#allocation5 + $0x328] sm:$0xff]  ;;  %v5180_v10 = vcombine.low %v1166_v14, %v1170_v33  ;;  %v5645_v46 = vld [vmem:[%s8417_s0 + $0xc0] sm:$0xff] }
 0x107   :  { %v1638_v8 = vsel %vm1359_vm8, %v1637_v47, %v6629_v40  ;;  %v1261_v20 = vunpack.c.l.b16 %v1043_v6  ;;  %v1262_v22 = vunpack.c.h.b16 %v1043_v6  ;;  %v830_v26 = vmul.f32 0.020408163, %v698_v11  ;;  %2546 = vmatprep.subr.bf16.mxu1 %v5165_v61  ;;  %v5641_v11 = vld [vmem:[%s8417_s0 + $0x30] sm:$0xff]  ;;  %v1182_v15 = vld [vmem:[#allocation5 + $0x348] sm:$0xff] }
 0x108   :  { %v6720_v13 = vsel %vm1366_vm9, %v1642_v7, %v1638_v8  ;;  %v829_v60 = vmul.f32 0.020408163, %v695_v3  ;;  %v389_v61 = vsel %vm211_vm1, %v198_v43, 0.0  ;;  %v386_v47 = vsel %vm211_vm1, %v197_v38, 0.0  ;;  %v5640_v7 = vld [vmem:[%s8417_s0 + $0x38] sm:$0xff]  ;;  %v1186_v9 = vld [vmem:[#allocation5 + $0x368] sm:$0xff] }
 0x109   :  { %v1358_v31 = vrot.slane %v1261_v20, %v6595_v41  ;;  %v1365_v59 = vrot.slane %v1262_v22, %v6649_v50  ;;  %336 = vadd.xlane.f32.xlu1 %v335_v57  ;;  %v146_v6 = vsel %vm138_vm2, %v5640_v7, 0.0  ;;  %v145_v3 = vsel %vm138_vm2, %v5641_v11, 0.0  ;;  %v5642_v20 = vld [vmem:[%s8417_s0 + $0x158] sm:$0xff]  ;;  %v1194_v14 = vld [vmem:[#allocation5 + $0x3a8] sm:$0xff] }
 0x10a   :  { %v1061_v34 = vpack.c.bf16 %v830_v26, %v829_v60  ;;  %333 = vadd.xlane.f32.xlu0 %v332_v45  ;;  %v6724_v40 = vpop.xlane.xlu1 %643  ;;  %v6726_v25 = vpop.xlane.xlu0 %640  ;;  %2547 = vmatpush1.bf16.msra.mxu1 %v5164_v19  ;;  %v5189_v45 = vcombine.high %v1174_v17, %v1178_v53  ;;  %v230_v8 = vsel %vm211_vm1, %v145_v3, 0.0  ;;  %v182_v22 = vsel %vm138_vm2, %v5642_v20, 0.0  ;;  %v5643_v60 = vld [vmem:[%s8417_s0 + $0x150] sm:$0xff] }
 0x10b   :  { %v1360_v37 = vsel %vm1359_vm8, %v1358_v31, %v6646_v0  ;;  %2548 = vmatprep.subr.bf16.mxu1 %v5173_v27  ;;  %v5188_v26 = vcombine.low %v1174_v17, %v1178_v53  ;;  %v181_v27 = vsel %vm138_vm2, %v5643_v60, 0.0  ;;  %v5197_v31 = vcombine.high %v1182_v15, %v1186_v9  ;;  %v1202_v17 = vld [vmem:[#allocation5 + $0x3e8] sm:$0xff] }
 0x10c   :  { %v6743_v49 = vsel %vm1366_vm9, %v1365_v59, %v1360_v37  ;;  %v1297_v0 = vunpack.c.l.b16 %v1061_v34  ;;  %v1298_v51 = vunpack.c.h.b16 %v1061_v34  ;;  %v1190_v59 = vld [vmem:[#allocation5 + $0x388] sm:$0xff]  ;;  %v5196_v43 = vcombine.low %v1182_v15, %v1186_v9 }
 0x10d   :  { %282 = vadd.xlane.f32.xlu1 %v281_v4  ;;  %v341_v4 = vsel %vm211_vm1, %v182_v22, 0.0  ;;  %v5644_v37 = vld [vmem:[%s8417_s0 + $0xc8] sm:$0xff]  ;;  %v163_v38 = vsel %vm138_vm2, %v5645_v46, 0.0  ;;  %v1382_v11 = vadd.s32 4294967232, %v5856_v1  ;;  %v1389_v9 = vadd.s32 4294967224, %v5856_v1 }
 0x10e   :  { %v1558_v54 = vrot.slane %v1297_v0, %v6595_v41  ;;  %v1563_v32 = vrot.slane %v1298_v51, %v6649_v50  ;;  %279 = vadd.xlane.f32.xlu0 %v278_v36  ;;  %v6747_v56 = vpop.xlane.xlu1 %751  ;;  %v6749_v57 = vpop.xlane.xlu0 %748  ;;  %2549 = vmatpush1.bf16.msra.mxu1 %v5172_v48  ;;  %v338_v36 = vsel %vm211_vm1, %v181_v27, 0.0  ;;  %v164_v42 = vsel %vm138_vm2, %v5644_v37, 0.0  ;;  %v5649_v27 = vld [vmem:[%s8417_s0 + $0x40] sm:$0xff]  ;;  %v5652_v37 = vld [vmem:[%s8417_s0 + $0xd8] sm:$0xff] }
 0x10f   :  { %2550 = vmatprep.subr.bf16.mxu1 %v5181_v52  ;;  %v5205_v48 = vcombine.high %v1190_v59, %v1194_v14  ;;  %v1368_v0 = vadd.s32 4294967248, %v5856_v1  ;;  %v1375_v51 = vadd.s32 4294967240, %v5856_v1  ;;  %v6802_v52 = vld [vmem:[#allocation5 + $0x3c8] sm:$0xff]  ;;  %v6862_v46 = vsub.s32 %v1382_v11, %v6326_v55  ;;  %v5654_v11 = vld [vmem:[%s8417_s0 + $0x1f8] sm:$0xff] }
 0x110   :  { %v1559_v63 = vsel %vm1359_vm8, %v1558_v54, %v6678_v30  ;;  %v233_v30 = vsel %vm211_vm1, %v146_v6, 0.0  ;;  %v5647_v6 = vld [vmem:[%s8417_s0 + $0x1e0] sm:$0xff]  ;;  %v5213_v3 = vcombine.high %v6802_v52, %v1202_v17 }
 0x111   :  { %v6766_v58 = vsel %vm1366_vm9, %v1563_v32, %v1559_v63  ;;  %390 = vadd.xlane.f32.xlu1 %v389_v61  ;;  %v287_v32 = vsel %vm211_vm1, %v164_v42, 0.0  ;;  %v284_v61 = vsel %vm211_vm1, %v163_v38, 0.0  ;;  %v5204_v63 = vcombine.low %v1190_v59, %v1194_v14  ;;  %v5650_v59 = vld [vmem:[%s8417_s0 + $0x168] sm:$0xff]  ;;  %8512 = vst [vmem:[#allocation24_spill] sm:$0xff] %v6862_v46 }
 0x112   :  { %387 = vadd.xlane.f32.xlu0 %v386_v47  ;;  %v6768_v18 = vpop.xlane.xlu1 %595  ;;  %v6770_v19 = vpop.xlane.xlu0 %592  ;;  %2551 = vmatpush1.bf16.msra.mxu1 %v5180_v10  ;;  %v5646_v47 = vld [vmem:[%s8417_s0 + $0x1e8] sm:$0xff]  ;;  %v199_v10 = vsel %vm138_vm2, %v5647_v6, 0.0  ;;  %v6826_v15 = vsub.s32 %v1375_v51, %v6326_v55  ;;  %v184_v14 = vsel %vm138_vm2, %v5650_v59, 0.0  ;;  %v166_v42 = vsel %vm138_vm2, %v5652_v37, 0.0 }
 0x113   :  { %2552 = vmatprep.subr.bf16.mxu1 %v5189_v45  ;;  %v200_v7 = vsel %vm138_vm2, %v5646_v47, 0.0  ;;  %v6823_v45 = vsub.s32 %v1368_v0, %v6326_v55  ;;  %v392_v22 = vsel %vm211_vm1, %v199_v10, 0.0  ;;  %v1396_v38 = vadd.s32 4294967216, %v5856_v1 }
 0x114   :  { %v395_v20 = vsel %vm211_vm1, %v200_v7, 0.0  ;;  %v5223_v51 = vcombine.high %v6469_v23, %v6471_v24  ;;  %v347_v6 = vsel %vm211_vm1, %v184_v14, 0.0  ;;  %v5658_v14 = vld [vmem:[%s8417_s0 + $0x178] sm:$0xff] }
 0x115   :  { %234 = vadd.xlane.f32.xlu1 %v233_v30  ;;  %v6911_v59 = vsub.s32 %v1396_v38, %v6326_v55 }
 0x116   :  { %231 = vadd.xlane.f32.xlu0 %v230_v8  ;;  %v6784_v33 = vpop.xlane.xlu1 %703  ;;  %v6786_v34 = vpop.xlane.xlu0 %700  ;;  %2553 = vmatpush1.bf16.msra.mxu1 %v5188_v26  ;;  %v5648_v26 = vld [vmem:[%s8417_s0 + $0x48] sm:$0xff] }
 0x117   :  { %2554 = vmatprep.subr.bf16.mxu1 %v5197_v31  ;;  %v148_v60 = vsel %vm138_vm2, %v5648_v26, 0.0  ;;  %v147_v31 = vsel %vm138_vm2, %v5649_v27, 0.0  ;;  %v5656_v26 = vld [vmem:[%s8417_s0 + $0x58] sm:$0xff]  ;;  %v5657_v27 = vld [vmem:[%s8417_s0 + $0x50] sm:$0xff]  ;;  %8514 = vst [vmem:[#allocation26_spill] sm:$0xff] %v6911_v59 }
 0x118   :  { %v832_v5 = vmul.f32 0.020408163, %v6784_v33 }
 0x119   :  { %342 = vadd.xlane.f32.xlu1 %v341_v4  ;;  %v5651_v4 = vld [vmem:[%s8417_s0 + $0x160] sm:$0xff] }
 0x11a   :  { %339 = vadd.xlane.f32.xlu0 %v338_v36  ;;  %v6804_v53 = vpop.xlane.xlu1 %649  ;;  %v6806_v54 = vpop.xlane.xlu0 %646  ;;  %2555 = vmatpush1.bf16.msra.mxu1 %v5196_v43  ;;  %v183_v36 = vsel %vm138_vm2, %v5651_v4, 0.0  ;;  %v5212_v43 = vcombine.low %v6802_v52, %v1202_v17  ;;  %v239_v52 = vsel %vm211_vm1, %v148_v60, 0.0  ;;  %v236_v17 = vsel %vm211_vm1, %v147_v31, 0.0 }
 0x11b   :  { %2556 = vmatprep.subr.bf16.mxu1 %v5205_v48  ;;  %v5653_v48 = vld [vmem:[%s8417_s0 + $0xd0] sm:$0xff]  ;;  %v344_v10 = vsel %vm211_vm1, %v183_v36, 0.0  ;;  %v150_v60 = vsel %vm138_vm2, %v5656_v26, 0.0  ;;  %v149_v31 = vsel %vm138_vm2, %v5657_v27, 0.0  ;;  %v186_v4 = vsel %vm138_vm2, %v5658_v14, 0.0 }
 0x11c   :  { %v165_v0 = vsel %vm138_vm2, %v5653_v48, 0.0  ;;  %v5659_v36 = vld [vmem:[%s8417_s0 + $0x170] sm:$0xff]  ;;  %v5660_v48 = vld [vmem:[%s8417_s0 + $0xe8] sm:$0xff]  ;;  %v6951_v26 = vsel %vm211_vm1, %v149_v31, 0.0  ;;  %v1417_v27 = vadd.s32 4294967192, %v5856_v1 }
 0x11d   :  { %288 = vadd.xlane.f32.xlu1 %v287_v32  ;;  %v6873_v32 = vsub.s32 %v1389_v9, %v6326_v55  ;;  %v6893_v9 = vsel %vm211_vm1, %v165_v0, 0.0  ;;  %v185_v37 = vsel %vm138_vm2, %v5659_v36, 0.0  ;;  %v168_v0 = vsel %vm138_vm2, %v5660_v48, 0.0 }
 0x11e   :  { %285 = vadd.xlane.f32.xlu0 %v284_v61  ;;  %v6829_v30 = vpop.xlane.xlu1 %757  ;;  %v6831_v8 = vpop.xlane.xlu0 %754  ;;  %2557 = vmatpush1.bf16.msra.mxu1 %v5204_v63  ;;  %v1403_v61 = vadd.s32 4294967208, %v5856_v1  ;;  %v6885_v63 = vsel %vm211_vm1, %v166_v42, 0.0  ;;  %v1410_v42 = vadd.s32 4294967200, %v5856_v1  ;;  %v812_v14 = vmul.f32 0.020408163, %v6724_v40  ;;  %v5662_v40 = vld [vmem:[%s8417_s0 + $0x208] sm:$0xff] }
 0x11f   :  { %2558 = vmatprep.subr.bf16.mxu1 %v5213_v3  ;;  %8513 = vst [vmem:[#allocation25_spill] sm:$0xff] %v6873_v32  ;;  %v202_v3 = vsel %vm138_vm2, %v5654_v11, 0.0  ;;  %v5661_v11 = vld [vmem:[%s8417_s0 + $0xe0] sm:$0xff]  ;;  %v811_v36 = vmul.f32 0.020408163, %v6726_v25  ;;  %v6960_v48 = vsel %vm211_vm1, %v185_v37, 0.0 }
 0x120   :  { %v6928_v38 = vsel %vm211_vm1, %v202_v3, 0.0  ;;  %v204_v25 = vsel %vm138_vm2, %v5662_v40, 0.0  ;;  %v5663_v37 = vld [vmem:[%s8417_s0 + $0x200] sm:$0xff]  ;;  %v796_v40 = vmul.f32 0.020408163, %v6768_v18 }
 0x121   :  { %396 = vadd.xlane.f32.xlu1 %v395_v20  ;;  %v5655_v20 = vld [vmem:[%s8417_s0 + $0x1f0] sm:$0xff]  ;;  %v7002_v35 = vpack.c.bf16 %v812_v14, %v811_v36  ;;  %v7005_v50 = vsel %vm211_vm1, %v204_v25, 0.0  ;;  %v1424_v14 = vadd.s32 4294967184, %v5856_v1  ;;  %v1431_v36 = vadd.s32 4294967176, %v5856_v1  ;;  %v5668_v25 = vld [vmem:[%s8417_s0 + $0xf8] sm:$0xff] }
 0x122   :  { %393 = vadd.xlane.f32.xlu0 %v392_v22  ;;  %v6878_v47 = vpop.xlane.xlu1 %601  ;;  %v6880_v7 = vpop.xlane.xlu0 %598  ;;  %v201_v22 = vsel %vm138_vm2, %v5655_v20, 0.0  ;;  %2559 = vmatpush1.bf16.msra.mxu1 %v5212_v43  ;;  %v6925_v43 = vsub.s32 %v1403_v61, %v6326_v55  ;;  %v6948_v20 = vsel %vm211_vm1, %v150_v60, 0.0  ;;  %v6966_v60 = vsel %vm211_vm1, %v168_v0, 0.0  ;;  %v5664_v0 = vld [vmem:[%s8417_s0 + $0x68] sm:$0xff] }
 0x123   :  { %2651 = vmatprep.subr.bf16.mxu1 %v5223_v51  ;;  %v167_v51 = vsel %vm138_vm2, %v5661_v11, 0.0  ;;  %v6945_v3 = vsel %vm211_vm1, %v201_v22, 0.0  ;;  %v6963_v22 = vsub.s32 %v1410_v42, %v6326_v55  ;;  %v203_v42 = vsel %vm138_vm2, %v5663_v37, 0.0 }
 0x124   :  { %8515 = vst [vmem:[#allocation27_spill] sm:$0xff] %v6925_v43  ;;  %v6969_v31 = vsel %vm211_vm1, %v167_v51, 0.0  ;;  %v152_v11 = vsel %vm138_vm2, %v5664_v0, 0.0  ;;  %v5665_v51 = vld [vmem:[%s8417_s0 + $0x60] sm:$0xff]  ;;  %v795_v37 = vmul.f32 0.020408163, %v6770_v19  ;;  %v7000_v0 = vsub.s32 %v1417_v27, %v6326_v55 }
 0x125   :  { %240 = vadd.xlane.f32.xlu1 %v239_v52  ;;  %8516 = vst [vmem:[#allocation28_spill] sm:$0xff] %v6963_v22  ;;  %v5667_v19 = vld [vmem:[%s8417_s0 + $0x180] sm:$0xff]  ;;  %v7018_v27 = vsel %vm211_vm1, %v203_v42, 0.0  ;;  %v5669_v42 = vld [vmem:[%s8417_s0 + $0xf0] sm:$0xff]  ;;  %v1279_v21 = vunpack.c.l.b16 %v7002_v35  ;;  %v813_v33 = vmul.f32 0.020408163, %v6806_v54 }
 0x126   :  { %237 = vadd.xlane.f32.xlu0 %v236_v17  ;;  %v6940_v52 = vpop.xlane.xlu1 %709  ;;  %v6942_v61 = vpop.xlane.xlu0 %706  ;;  %v6957_v17 = vsel %vm211_vm1, %v186_v4, 0.0  ;;  %v848_v4 = vmul.f32 0.020408163, %v6747_v56  ;;  %v151_v56 = vsel %vm138_vm2, %v5665_v51, 0.0  ;;  %8517 = vst [vmem:[#allocation29_spill] sm:$0xff] %v7000_v0  ;;  %v170_v51 = vsel %vm138_vm2, %v5668_v25, 0.0 }
 0x127   :  { %v169_v41 = vsel %vm138_vm2, %v5669_v42, 0.0  ;;  %v850_v23 = vmul.f32 0.020408163, %v6829_v30  ;;  %v849_v2 = vmul.f32 0.020408163, %v6831_v8 }
 0x129   :  { %348 = vadd.xlane.f32.xlu1 %v347_v6  ;;  %v847_v6 = vmul.f32 0.020408163, %v6749_v57  ;;  %v5666_v57 = vld [vmem:[%s8417_s0 + $0x188] sm:$0xff] }
 0x12a   :  { %345 = vadd.xlane.f32.xlu0 %v344_v10  ;;  %v6995_v39 = vpop.xlane.xlu1 %655  ;;  %v6997_v44 = vpop.xlane.xlu0 %652  ;;  %v188_v18 = vsel %vm138_vm2, %v5666_v57, 0.0  ;;  %v187_v10 = vsel %vm138_vm2, %v5667_v19, 0.0  ;;  %v7029_v57 = vsel %vm211_vm1, %v152_v11, 0.0  ;;  %v7032_v19 = vsel %vm211_vm1, %v151_v56, 0.0 }
 0x12b   :  { %v1070_v25 = vpack.c.bf16 %v848_v4, %v847_v6  ;;  %v7044_v11 = vpack.c.bf16 %v796_v40, %v795_v37  ;;  %v7052_v28 = vsel %vm211_vm1, %v188_v18, 0.0  ;;  %v7055_v42 = vsel %vm211_vm1, %v187_v10, 0.0 }
 0x12c   :  { %v7061_v4 = vsel %vm211_vm1, %v170_v51, 0.0  ;;  %v7067_v6 = vsub.s32 %v1431_v36, %v6326_v55  ;;  %v7070_v40 = vsel %vm211_vm1, %v169_v41, 0.0  ;;  %v814_v18 = vmul.f32 0.020408163, %v6804_v53  ;;  %v5672_v41 = vld [vmem:[%s8417_s0 + $0x78] sm:$0xff]  ;;  %v5673_v51 = vld [vmem:[%s8417_s0 + $0x70] sm:$0xff] }
 0x12d   :  { %294 = vadd.xlane.f32.xlu1 %v6885_v63  ;;  %v206_v63 = vsel %vm138_vm2, %v5670_v12, 0.0  ;;  %v831_v12 = vmul.f32 0.020408163, %v6786_v34  ;;  %v5671_v34 = vld [vmem:[%s8417_s0 + $0x210] sm:$0xff]  ;;  %v1315_v36 = vunpack.c.l.b16 %v1070_v25  ;;  %v1263_v53 = vunpack.c.l.b16 %v7044_v11 }
 0x12e   :  { %291 = vadd.xlane.f32.xlu0 %v6893_v9  ;;  %v7047_v56 = vpop.xlane.xlu1 %763  ;;  %v7049_v29 = vpop.xlane.xlu0 %760  ;;  %v7064_v9 = vsub.s32 %v1424_v14, %v6326_v55  ;;  %8519 = vst [vmem:[#allocation31_spill] sm:$0xff] %v7067_v6  ;;  %v7073_v37 = vsel %vm211_vm1, %v206_v63, 0.0  ;;  %v205_v10 = vsel %vm138_vm2, %v5671_v34, 0.0  ;;  %v154_v14 = vsel %vm138_vm2, %v5672_v41, 0.0  ;;  %v5674_v34 = vld [vmem:[%s8417_s0 + $0x198] sm:$0xff] }
 0x12f   :  { %v153_v63 = vsel %vm138_vm2, %v5673_v51, 0.0  ;;  %v190_v41 = vsel %vm138_vm2, %v5674_v34, 0.0  ;;  %v1280_v55 = vunpack.c.h.b16 %v7002_v35  ;;  %v7102_v24 = vpack.c.bf16 %v832_v5, %v831_v12 }
 0x130   :  { %8518 = vst [vmem:[#allocation30_spill] sm:$0xff] %v7064_v9  ;;  %v1316_v16 = vunpack.c.h.b16 %v1070_v25  ;;  %v798_v51 = vmul.f32 0.020408163, %v6878_v47  ;;  %v797_v6 = vmul.f32 0.020408163, %v6880_v7  ;;  %v1053_v9 = vpack.c.bf16 %v814_v18, %v813_v33 }
 0x131   :  { %402 = vadd.xlane.f32.xlu1 %v6928_v38  ;;  %v7110_v34 = vsel %vm211_vm1, %v205_v10, 0.0  ;;  %v7113_v35 = vsel %vm211_vm1, %v154_v14, 0.0  ;;  %v7116_v5 = vsel %vm211_vm1, %v153_v63, 0.0  ;;  %v1264_v30 = vunpack.c.h.b16 %v7044_v11  ;;  %v5675_v11 = vld [vmem:[%s8417_s0 + $0x190] sm:$0xff] }
 0x132   :  { %399 = vadd.xlane.f32.xlu0 %v6945_v3  ;;  %v608_v54 = vpop.xlane.xlu1 %607  ;;  %v605_v38 = vpop.xlane.xlu0 %604  ;;  %v1470_v3 = vrot.slane %v1279_v21, %v6823_v45  ;;  %v1647_v21 = vrot.slane %v1315_v36, %v6823_v45  ;;  %v1372_v8 = vrot.slane %v1263_v53, %v6823_v45  ;;  %v1475_v12 = vrot.slane %v1280_v55, %v6826_v15 }
 0x133   :  { %v1299_v18 = vunpack.c.l.b16 %v7102_v24  ;;  %v1652_v33 = vrot.slane %v1316_v16, %v6826_v15  ;;  %v1071_v10 = vpack.c.bf16 %v850_v23, %v849_v2  ;;  %v1045_v14 = vpack.c.bf16 %v798_v51, %v797_v6 }
 0x134   :  { %v1471_v25 = vsel %vm1373_vm10, %v1470_v3, %v6702_v62  ;;  %v834_v36 = vmul.f32 0.020408163, %v6940_v52  ;;  %v1281_v53 = vunpack.c.l.b16 %v1053_v9  ;;  %v833_v62 = vmul.f32 0.020408163, %v6942_v61 }
 0x135   :  { %246 = vadd.xlane.f32.xlu1 %v6948_v20  ;;  %v7127_v20 = vsel %vm211_vm1, %v190_v41, 0.0  ;;  %v816_v55 = vmul.f32 0.020408163, %v6995_v39  ;;  %v815_v63 = vmul.f32 0.020408163, %v6997_v44  ;;  %v1648_v41 = vsel %vm1373_vm10, %v1647_v21, %v6720_v13 }
 0x136   :  { %243 = vadd.xlane.f32.xlu0 %v6951_v26  ;;  %v7122_v47 = vpop.xlane.xlu1 %715  ;;  %v7124_v7 = vpop.xlane.xlu0 %712  ;;  %v189_v26 = vsel %vm138_vm2, %v5675_v11, 0.0  ;;  %v1374_v1 = vsel %vm1373_vm10, %v1372_v8, %v6743_v49  ;;  %v1379_v2 = vrot.slane %v1264_v30, %v6826_v15  ;;  %v1300_v16 = vunpack.c.h.b16 %v7102_v24 }
 0x137   :  { %v1568_v39 = vrot.slane %v1299_v18, %v6823_v45  ;;  %v1282_v44 = vunpack.c.h.b16 %v1053_v9  ;;  %v852_v61 = vmul.f32 0.020408163, %v7047_v56  ;;  %v1317_v13 = vunpack.c.l.b16 %v1071_v10 }
 0x138   :  { %v1265_v6 = vunpack.c.l.b16 %v1045_v14  ;;  %v800_v3 = vmul.f32 0.020408163, %v608_v54  ;;  %v799_v49 = vmul.f32 0.020408163, %v605_v38  ;;  %v1480_v51 = vrot.slane %v1281_v53, %v6862_v46 }
 0x139   :  { %354 = vadd.xlane.f32.xlu1 %v6957_v17  ;;  %v851_v17 = vmul.f32 0.020408163, %v7049_v29  ;;  %v7155_v21 = vpack.c.bf16 %v834_v36, %v833_v62  ;;  %v7157_v24 = vpack.c.bf16 %v816_v55, %v815_v63  ;;  %v1476_v9 = vsel %vm1380_vm11, %v1475_v12, %v1471_v25 }
 0x13a   :  { %351 = vadd.xlane.f32.xlu0 %v6960_v48  ;;  %v662_v23 = vpop.xlane.xlu1 %661  ;;  %v659_v52 = vpop.xlane.xlu0 %658  ;;  %v7161_v48 = vsel %vm211_vm1, %v189_v26, 0.0  ;;  %v1653_v56 = vsel %vm1380_vm11, %v1652_v33, %v1648_v41  ;;  %v1381_v29 = vsel %vm1380_vm11, %v1379_v2, %v1374_v1  ;;  %v1318_v30 = vunpack.c.h.b16 %v1071_v10 }
 0x13b   :  { %v1569_v8 = vsel %vm1373_vm10, %v1568_v39, %v6766_v58  ;;  %v1266_v18 = vunpack.c.h.b16 %v1045_v14  ;;  %v1072_v11 = vpack.c.bf16 %v852_v61, %v851_v17  ;;  %v1485_v26 = vrot.slane %v1282_v44, %v6873_v32 }
 0x13c   :  { %v1657_v25 = vrot.slane %v1317_v13, %v6862_v46  ;;  %v1386_v12 = vrot.slane %v1265_v6, %v6862_v46  ;;  %v7173_v33 = vpack.c.bf16 %v800_v3, %v799_v49  ;;  %v1481_v10 = vsel %vm8448_vm12, %v1480_v51, %v1476_v9 }
 0x13d   :  { %300 = vadd.xlane.f32.xlu1 %v6966_v60  ;;  %v1573_v60 = vrot.slane %v1300_v16, %v6826_v15  ;;  %v1283_v36 = vunpack.c.l.b16 %v7157_v24  ;;  %v818_v53 = vmul.f32 0.020408163, %v662_v23  ;;  %v1662_v58 = vrot.slane %v1318_v30, %v6873_v32 }
 0x13e   :  { %297 = vadd.xlane.f32.xlu0 %v6969_v31  ;;  %v770_v54 = vpop.xlane.xlu1 %769  ;;  %v767_v38 = vpop.xlane.xlu0 %766  ;;  %v1301_v31 = vunpack.c.l.b16 %v7155_v21  ;;  %v817_v14 = vmul.f32 0.020408163, %v659_v52  ;;  %v1393_v1 = vrot.slane %v1266_v18, %v6873_v32  ;;  %v1319_v2 = vunpack.c.l.b16 %v1072_v11 }
 0x13f   :  { %v854_v62 = vmul.f32 0.020408163, %v770_v54  ;;  %v853_v55 = vmul.f32 0.020408163, %v767_v38  ;;  %v836_v16 = vmul.f32 0.020408163, %v7122_v47  ;;  %v1574_v23 = vsel %vm1380_vm11, %v1573_v60, %v1569_v8 }
 0x140   :  { %v835_v39 = vmul.f32 0.020408163, %v7124_v7  ;;  %v1388_v52 = vsel %vm8448_vm12, %v1386_v12, %v1381_v29  ;;  %v1267_v44 = vunpack.c.l.b16 %v7173_v33  ;;  %v1578_v61 = vrot.slane %v1301_v31, %v6862_v46  ;;  %v7669_v46 = vld [vmem:[#allocation2 + $0x248] sm:$0xff] }
 0x141   :  { %408 = vadd.xlane.f32.xlu1 %v7005_v50  ;;  %v1658_v50 = vsel %vm8448_vm12, %v1657_v25, %v1653_v56  ;;  %v1284_v17 = vunpack.c.h.b16 %v7157_v24  ;;  %v1490_v13 = vrot.slane %v1283_v36, %v6911_v59  ;;  %v1486_v47 = vsel %vm1394_vm13, %v1485_v26, %v1481_v10 }
 0x142   :  { %405 = vadd.xlane.f32.xlu0 %v7018_v27  ;;  %v614_v63 = vpop.xlane.xlu1 %613  ;;  %v611_v41 = vpop.xlane.xlu0 %610  ;;  %v1302_v27 = vunpack.c.h.b16 %v7155_v21  ;;  %v1320_v7 = vunpack.c.h.b16 %v1072_v11  ;;  %v1055_v6 = vpack.c.bf16 %v818_v53, %v817_v14  ;;  %v1073_v3 = vpack.c.bf16 %v854_v62, %v853_v55 }
 0x143   :  { %v1663_v9 = vsel %vm1394_vm13, %v1662_v58, %v1658_v50  ;;  %v1395_v21 = vsel %vm1394_vm13, %v1393_v1, %v1388_v52  ;;  %v1667_v56 = vrot.slane %v1319_v2, %v6911_v59  ;;  %v1064_v24 = vpack.c.bf16 %v836_v16, %v835_v39 }
 0x144   :  { %v1268_v29 = vunpack.c.h.b16 %v7173_v33  ;;  %v802_v30 = vmul.f32 0.020408163, %v614_v63  ;;  %v801_v54 = vmul.f32 0.020408163, %v611_v41  ;;  %v1579_v38 = vsel %vm8448_vm12, %v1578_v61, %v1574_v23 }
 0x145   :  { %252 = vadd.xlane.f32.xlu1 %v7029_v57  ;;  %v1400_v57 = vrot.slane %v1267_v44, %v6911_v59  ;;  %v1491_v8 = vsel %vm1401_vm14, %v1490_v13, %v1486_v47  ;;  %v1495_v60 = vrot.slane %v1284_v17, %v6925_v43  ;;  %v1672_v18 = vrot.slane %v1320_v7, %v6925_v43 }
 0x146   :  { %249 = vadd.xlane.f32.xlu0 %v7032_v19  ;;  %v722_v49 = vpop.xlane.xlu1 %721  ;;  %v719_v51 = vpop.xlane.xlu0 %718  ;;  %v1583_v19 = vrot.slane %v1302_v27, %v6873_v32  ;;  %vm1422_vm1 = vcmask 917312   ;;  %v1285_v11 = vunpack.c.l.b16 %v1055_v6  ;;  %v1321_v26 = vunpack.c.l.b16 %v1073_v3  ;;  %v7667_v32 = vld [vmem:[#allocation2 + $0x260] sm:$0xff] }
 0x147   :  { %v838_v25 = vmul.f32 0.020408163, %v722_v49  ;;  %v1303_v10 = vunpack.c.l.b16 %v1064_v24  ;;  %v837_v31 = vmul.f32 0.020408163, %v719_v51  ;;  %vm1429_vm2 = vcmask 982912  }
 0x148   :  { %v1668_v58 = vsel %vm1401_vm14, %v1667_v56, %v1663_v9  ;;  %v1402_v14 = vsel %vm1401_vm14, %v1400_v57, %v1395_v21  ;;  %v1047_v62 = vpack.c.bf16 %v802_v30, %v801_v54  ;;  %v1304_v55 = vunpack.c.h.b16 %v1064_v24  ;;  %v8520_v9 = vld [vmem:[#allocation30_spill] sm:$0xff] }
 0x149   :  { %360 = vadd.xlane.f32.xlu1 %v7052_v28  ;;  %v1407_v28 = vrot.slane %v1268_v29, %v6925_v43  ;;  %v1286_v63 = vunpack.c.h.b16 %v1055_v6  ;;  %v1322_v41 = vunpack.c.h.b16 %v1073_v3  ;;  %v1496_v2 = vsel %vm1408_vm15, %v1495_v60, %v1491_v8 }
 0x14a   :  { %357 = vadd.xlane.f32.xlu0 %v7055_v42  ;;  %v668_v12 = vpop.xlane.xlu1 %667  ;;  %v665_v33 = vpop.xlane.xlu0 %664  ;;  %v1584_v42 = vsel %vm1394_vm13, %v1583_v19, %v1579_v38  ;;  %v1500_v16 = vrot.slane %v1285_v11, %v6963_v22  ;;  %v1677_v39 = vrot.slane %v1321_v26, %v6963_v22  ;;  %vm1436_vm12 = vcmask 1048512   ;;  %v8521_v26 = vld [vmem:[#allocation31_spill] sm:$0xff] }
 0x14b   :  { %v820_v36 = vmul.f32 0.020408163, %v668_v12  ;;  %v819_v53 = vmul.f32 0.020408163, %v665_v33  ;;  %v1588_v52 = vrot.slane %v1303_v10, %v6911_v59  ;;  %v1065_v44 = vpack.c.bf16 %v838_v25, %v837_v31  ;;  %v7654_v59 = vld [vmem:[#allocation2 + $0x228] sm:$0xff] }
 0x14c   :  { %v1409_v17 = vsel %vm1408_vm15, %v1407_v28, %v1402_v14  ;;  %v1269_v13 = vunpack.c.l.b16 %v1047_v62  ;;  %v1593_v7 = vrot.slane %v1304_v55, %v6925_v43  ;;  %v1505_v6 = vrot.slane %v1286_v63, %v7000_v0  ;;  %v7652_v43 = vld [vmem:[#allocation2 + $0x208] sm:$0xff] }
 0x14d   :  { %v1056_v1 = vpack.c.bf16 %v820_v36, %v819_v53  ;;  %306 = vadd.xlane.f32.xlu1 %v7061_v4  ;;  %v1673_v4 = vsel %vm1408_vm15, %v1672_v18, %v1668_v58  ;;  %v1501_v49 = vsel %vm1415_vm0, %v1500_v16, %v1496_v2  ;;  %v1589_v57 = vsel %vm1401_vm14, %v1588_v52, %v1584_v42 }
 0x14e   :  { %303 = vadd.xlane.f32.xlu0 %v7070_v40  ;;  %v776_v23 = vpop.xlane.xlu1 %775  ;;  %v773_v50 = vpop.xlane.xlu0 %772  ;;  %v1682_v40 = vrot.slane %v1322_v41, %v7000_v0  ;;  %v1678_v51 = vsel %vm1415_vm0, %v1677_v39, %v1673_v4  ;;  %v1305_v30 = vunpack.c.l.b16 %v1065_v44  ;;  %v1270_v19 = vunpack.c.h.b16 %v1047_v62 }
 0x14f   :  { %v1287_v27 = vunpack.c.l.b16 %v1056_v1  ;;  %v856_v61 = vmul.f32 0.020408163, %v776_v23  ;;  %v855_v47 = vmul.f32 0.020408163, %v773_v50  ;;  %v1288_v3 = vunpack.c.h.b16 %v1056_v1 }
 0x150   :  { %v1414_v8 = vrot.slane %v1269_v13, %v6963_v22  ;;  %v1506_v18 = vsel %vm1422_vm1, %v1505_v6, %v1501_v49  ;;  %v1683_v11 = vsel %vm1422_vm1, %v1682_v40, %v1678_v51  ;;  %v1598_v58 = vrot.slane %v1305_v30, %v6963_v22  ;;  %v1215_v30 = vld [vmem:[#allocation5 + $0x450] sm:$0xff]  ;;  %v7638_v22 = vld [vmem:[#allocation2 + $0x200] sm:$0xff] }
 0x151   :  { %414 = vadd.xlane.f32.xlu1 %v7073_v37  ;;  %v1510_v21 = vrot.slane %v1287_v27, %v8520_v9  ;;  %v1074_v56 = vpack.c.bf16 %v856_v61, %v855_v47  ;;  %v1515_v25 = vrot.slane %v1288_v3, %v8521_v26  ;;  %v1594_v16 = vsel %vm1408_vm15, %v1593_v7, %v1589_v57 }
 0x152   :  { %411 = vadd.xlane.f32.xlu0 %v7110_v34  ;;  %v620_v24 = vpop.xlane.xlu1 %619  ;;  %v617_v29 = vpop.xlane.xlu0 %616  ;;  %v1306_v34 = vunpack.c.h.b16 %v1065_v44  ;;  %v1416_v55 = vsel %vm1415_vm0, %v1414_v8, %v1409_v17  ;;  %v1599_v44 = vsel %vm1415_vm0, %v1598_v58, %v1594_v16 }
 0x153   :  { %v804_v54 = vmul.f32 0.020408163, %v620_v24  ;;  %v803_v38 = vmul.f32 0.020408163, %v617_v29  ;;  %v1323_v37 = vunpack.c.l.b16 %v1074_v56  ;;  %v1324_v60 = vunpack.c.h.b16 %v1074_v56  ;;  %v1218_v56 = vld [vmem:[#allocation5 + $0x468] sm:$0xff] }
 0x154   :  { %v1511_v33 = vsel %vm1429_vm2, %v1510_v21, %v1506_v18  ;;  %v1603_v39 = vrot.slane %v1306_v34, %v7000_v0  ;;  %v1214_v21 = vld [vmem:[#allocation5 + $0x448] sm:$0xff] }
 0x155   :  { %v1048_v12 = vpack.c.bf16 %v804_v54, %v803_v38  ;;  %258 = vadd.xlane.f32.xlu1 %v7113_v35  ;;  %v1687_v10 = vrot.slane %v1323_v37, %v8520_v9  ;;  %v1692_v31 = vrot.slane %v1324_v60, %v8521_v26  ;;  %v1421_v35 = vrot.slane %v1270_v19, %v7000_v0  ;;  %v1219_v54 = vld [vmem:[#allocation5 + $0x470] sm:$0xff]  ;;  %v7636_v0 = vld [vmem:[#allocation2 + $0x1e8] sm:$0xff] }
 0x156   :  { %255 = vadd.xlane.f32.xlu0 %v7116_v5  ;;  %v728_v36 = vpop.xlane.xlu1 %727  ;;  %v725_v53 = vpop.xlane.xlu0 %724  ;;  %v1516_v5 = vsel %vm1436_vm12, %v1515_v25, %v1511_v33  ;;  %v1604_v40 = vsel %vm1422_vm1, %v1603_v39, %v1599_v44  ;;  %v7266_v60 = vld [vmem:[#allocation5 + $0x10] sm:$0xff]  ;;  %v5231_v34 = vcombine.high %v1215_v30, %v1219_v54 }
 0x157   :  { %v1271_v14 = vunpack.c.l.b16 %v1048_v12  ;;  %v840_v28 = vmul.f32 0.020408163, %v728_v36  ;;  %v839_v62 = vmul.f32 0.020408163, %v725_v53  ;;  %v1688_v63 = vsel %vm1429_vm2, %v1687_v10, %v1683_v11  ;;  %v7270_v33 = vld [vmem:[#allocation5 + $0x30] sm:$0xff]  ;;  %v7272_v10 = vld [vmem:[#allocation5 + $0x18] sm:$0xff] }
 0x158   :  { %v1272_v41 = vunpack.c.h.b16 %v1048_v12  ;;  %v1693_v2 = vsel %vm1436_vm12, %v1692_v31, %v1688_v63  ;;  %v5229_v12 = vcombine.high %v1214_v21, %v1218_v56  ;;  %v7274_v31 = vld [vmem:[#allocation5 + $0x38] sm:$0xff]  ;;  %v7290_v39 = vld [vmem:[#allocation5 + $0x50] sm:$0xff] }
 0x159   :  { %v1428_v1 = vrot.slane %v1271_v14, %v8520_v9  ;;  %v1066_v42 = vpack.c.bf16 %v840_v28, %v839_v62  ;;  %366 = vadd.xlane.f32.xlu1 %v7127_v20  ;;  %v1715_v52 = vsel %vm1713_vm6, %v1693_v2, %v1516_v5  ;;  %v1423_v20 = vsel %vm1422_vm1, %v1421_v35, %v1416_v55  ;;  %v8522_v55 = vld [vmem:[#allocation17_spill] sm:$0xff]  ;;  %v8523_v35 = vld [vmem:[#allocation18_spill] sm:$0xff] }
 0x15a   :  { %363 = vadd.xlane.f32.xlu0 %v7161_v48  ;;  %v313_v23 = vpop.xlane.xlu1 %312  ;;  %v310_v50 = vpop.xlane.xlu0 %309  ;;  %v1435_v17 = vrot.slane %v1272_v41, %v8521_v26  ;;  %v7252_v47 = vpack.c.b16 %v1715_v52, %v1715_v52  ;;  %v5228_v28 = vcombine.low %v1214_v21, %v1218_v56  ;;  %v5230_v62 = vcombine.low %v1215_v30, %v1219_v54  ;;  %v8525_v41 = vld [vmem:[#allocation19_spill] sm:$0xff]  ;;  %v1095_v30 = vld [vmem:[#allocation5 + $0x90] sm:$0xff] }
 0x15b   :  { %v1307_v27 = vunpack.c.l.b16 %v1066_v42  ;;  %v1308_v61 = vunpack.c.h.b16 %v1066_v42  ;;  %v461_v4 = vmul.f32 0.020408163, %v313_v23  ;;  %v460_v13 = vmul.f32 0.020408163, %v310_v50  ;;  %v7292_v23 = vld [vmem:[#allocation5 + $0x70] sm:$0xff]  ;;  %v8531_v54 = vld [vmem:[#allocation15_spill] sm:$0xff] }
 0x15c   :  { %v1430_v7 = vsel %vm1429_vm2, %v1428_v1, %v1423_v20  ;;  %2478 = vmatprep.mubr.bf16.mxu0 %v7252_v47  ;;  %2560 = vmatprep.mubr.bf16.mxu1 %v7252_v47  ;;  %v8524_v63 = vcombine.low %v8522_v55, %v8523_v35  ;;  %v8526_v1 = vld [vmem:[#allocation20_spill] sm:$0xff]  ;;  %v5094_v5 = vcombine.low %v7266_v60, %v7270_v33  ;;  %v8528_v50 = vld [vmem:[#allocation13_spill] sm:$0xff] }
 0x15d   :  { %v1608_v48 = vrot.slane %v1307_v27, %v8520_v9  ;;  %v1613_v6 = vrot.slane %v1308_v61, %v8521_v26  ;;  %v877_v3 = vpack.c.bf16 %v461_v4, %v460_v13  ;;  %v1437_v38 = vsel %vm1436_vm12, %v1435_v17, %v1430_v7  ;;  %v7297_v4 = vld [vmem:[#allocation5 + $0x58] sm:$0xff]  ;;  %v7622_v26 = vld [vmem:[#allocation2 + $0x1e0] sm:$0xff] }
 0x15e   :  { %v421_v49 = vpop.xlane.xlu1 %420  ;;  %v418_v51 = vpop.xlane.xlu0 %417  ;;  %v8527_v42 = vcombine.low %v8525_v41, %v8526_v1  ;;  %v5095_v2 = vcombine.high %v7266_v60, %v7270_v33  ;;  %v5096_v16 = vcombine.low %v7272_v10, %v7274_v31  ;;  %v5097_v61 = vcombine.high %v7272_v10, %v7274_v31  ;;  %v1092_v20 = vld [vmem:[#allocation5 + $0x78] sm:$0xff] }
 0x15f   :  { %v1609_v24 = vsel %vm1429_vm2, %v1608_v48, %v1604_v40  ;;  %v497_v29 = vmul.f32 0.020408163, %v421_v49  ;;  %v496_v57 = vmul.f32 0.020408163, %v418_v51  ;;  %v2842_v18 = vunpack.c.l.b16 %v877_v3  ;;  %v8529_v17 = vld [vmem:[#allocation14_spill] sm:$0xff] }
 0x160   :  { %v1614_v19 = vsel %vm1436_vm12, %v1613_v6, %v1609_v24  ;;  %v2843_v36 = vunpack.c.h.b16 %v877_v3  ;;  %v8530_v3 = vmov 0   ;;  %v5102_v56 = vcombine.low %v7290_v39, %v7292_v23  ;;  %8541 = vst [vmem:[#allocation14_spill] sm:$0xff] %v7622_v26  ;;  %v7693_v26 = vld [vmem:[#allocation2 + $0x288] sm:$0xff] }
 0x161   :  { %v7263_v8 = vpack.c.bf16 %v497_v29, %v496_v57  ;;  %v1714_v37 = vsel %vm1713_vm6, %v1614_v19, %v1437_v38  ;;  %v3043_v52 = vrot.slane %v2842_v18, %v8528_v50  ;;  %v5103_v24 = vcombine.high %v7290_v39, %v7292_v23  ;;  %v8532_v19 = vld [vmem:[#allocation16_spill] sm:$0xff] }
 0x162   :  { %v319_v11 = vpop.xlane.xlu1 %318  ;;  %v7268_v25 = vpack.c.b16 %v1714_v37, %v1714_v37  ;;  %v316_v58 = vpop.xlane.xlu0 %315  ;;  %v3047_v13 = vrot.slane %v2843_v36, %v8529_v17  ;;  %v5104_v29 = vcombine.low %v7297_v4, %v1092_v20  ;;  %v5105_v57 = vcombine.high %v7297_v4, %v1092_v20  ;;  %v1099_v18 = vld [vmem:[#allocation5 + $0xb0] sm:$0xff]  ;;  %8543 = vst [vmem:[#allocation16_spill] sm:$0xff] %v7636_v0 }
 0x163   :  { %v463_v53 = vmul.f32 0.020408163, %v319_v11  ;;  %v462_v14 = vmul.f32 0.020408163, %v316_v58  ;;  %v2878_v7 = vunpack.c.l.b16 %v7263_v8  ;;  %v2879_v48 = vunpack.c.h.b16 %v7263_v8  ;;  %v1096_v11 = vld [vmem:[#allocation5 + $0x98] sm:$0xff]  ;;  %v1103_v39 = vld [vmem:[#allocation5 + $0xd0] sm:$0xff] }
 0x164   :  { %2479 = vmatmul.mubr.bf16.vlgmr.msra.gmra.mrb[0].mxu0 %v7268_v25  ;;  %2561 = vmatmul.mubr.bf16.vlgmr.msra.gmra.mrb[4].mxu1 %v7268_v25  ;;  %v5111_v35 = vcombine.high %v1095_v30, %v1099_v18 }
 0x165   :  { %2570 = vmatpush1.bf16.msra.mxu0 %v8524_v63  ;;  %2652 = vmatpush1.bf16.msra.mxu1 %v8527_v42  ;;  %v878_v44 = vpack.c.bf16 %v463_v53, %v462_v14  ;;  %v3220_v33 = vrot.slane %v2878_v7, %v8528_v50  ;;  %v3224_v10 = vrot.slane %v2879_v48, %v8529_v17 }
 0x166   :  { %v427_v27 = vpop.xlane.xlu1 %426  ;;  %2571 = vmatprep.subr.bf16.mxu0 %v5229_v12  ;;  %2653 = vmatprep.subr.bf16.mxu1 %v5231_v34  ;;  %v424_v40 = vpop.xlane.xlu0 %423  ;;  %v1100_v12 = vld [vmem:[#allocation5 + $0xb8] sm:$0xff]  ;;  %v3048_v34 = vsel %vm1338_vm3, %v3047_v13, %v3043_v52  ;;  %v5110_v13 = vcombine.low %v1095_v30, %v1099_v18 }
 0x167   :  { %v499_v6 = vmul.f32 0.020408163, %v427_v27  ;;  %2601 = vmatprep.mubr.bf16.mxu0 %v8530_v3  ;;  %2683 = vmatprep.mubr.bf16.mxu1 %v8530_v3  ;;  %v2844_v49 = vunpack.c.l.b16 %v878_v44  ;;  %v2845_v51 = vunpack.c.h.b16 %v878_v44  ;;  %v498_v21 = vmul.f32 0.020408163, %v424_v40  ;;  %v1108_v27 = vld [vmem:[#allocation5 + $0xf8] sm:$0xff] }
 0x168   :  { %v5113_v63 = vcombine.high %v1096_v11, %v1100_v12  ;;  %v3225_v23 = vsel %vm1338_vm3, %v3224_v10, %v3220_v33 }
 0x169   :  { %2572 = vmatpush1.bf16.msra.mxu0 %v5228_v28  ;;  %2654 = vmatpush1.bf16.msra.mxu1 %v5230_v62  ;;  %v3052_v38 = vrot.slane %v2844_v49, %v8531_v54  ;;  %v3057_v8 = vrot.slane %v2845_v51, %v8532_v19  ;;  %v896_v37 = vpack.c.bf16 %v499_v6, %v498_v21  ;;  %v8533_v62 = vld [vmem:[#allocation21_spill] sm:$0xff] }
 0x16a   :  { %v265_v60 = vpop.xlane.xlu1 %264  ;;  %2610 = vmatprep.subr.bf16.mxu0 %v5095_v2  ;;  %2692 = vmatprep.subr.bf16.mxu1 %v5097_v61  ;;  %v262_v36 = vpop.xlane.xlu0 %261  ;;  %v1111_v49 = vld [vmem:[#allocation5 + $0x110] sm:$0xff] }
 0x16b   :  { %v445_v31 = vmul.f32 0.020408163, %v265_v60  ;;  %v3053_v53 = vsel %vm1345_vm4, %v3052_v38, %v3048_v34  ;;  %v2880_v58 = vunpack.c.l.b16 %v896_v37  ;;  %v2881_v14 = vunpack.c.h.b16 %v896_v37  ;;  %v1116_v38 = vld [vmem:[#allocation5 + $0x138] sm:$0xff]  ;;  %v7339_v34 = vld [vmem:[#allocation5 + $0x170] sm:$0xff] }
 0x16c   :  { %v444_v28 = vmul.f32 0.020408163, %v262_v36  ;;  %5235 = vmatmul.mubr.msk.bf16.vlgmr.msra.gmra.mrb[4].mxu0 %vm2442_vm7, %v8533_v62  ;;  %5236 = vmatmul.mubr.msk.bf16.vlgmr.msra.gmra.mrb[8].mxu1 %vm2442_vm7, %v8533_v62  ;;  %v3058_v55 = vsel %vm1352_vm5, %v3057_v8, %v3053_v53  ;;  %v1120_v53 = vld [vmem:[#allocation5 + $0x158] sm:$0xff] }
 0x16d   :  { %2611 = vmatpush1.bf16.msra.mxu0 %v5094_v5  ;;  %2693 = vmatpush1.bf16.msra.mxu1 %v5096_v16  ;;  %v3229_v41 = vrot.slane %v2880_v58, %v8531_v54  ;;  %v3234_v1 = vrot.slane %v2881_v14, %v8532_v19  ;;  %v1107_v5 = vld [vmem:[#allocation5 + $0xf0] sm:$0xff]  ;;  %v1104_v16 = vld [vmem:[#allocation5 + $0xd8] sm:$0xff] }
 0x16e   :  { %v7323_v42 = vpack.c.bf16 %v445_v31, %v444_v28  ;;  %2642 = vmatprep.mubr.bf16.mxu0 %v7252_v47  ;;  %2724 = vmatprep.mubr.bf16.mxu1 %v7252_v47  ;;  %v373_v2 = vpop.xlane.xlu1 %372  ;;  %v370_v44 = vpop.xlane.xlu0 %369  ;;  %v5112_v47 = vcombine.low %v1096_v11, %v1100_v12  ;;  %v5119_v6 = vcombine.high %v1103_v39, %v1107_v5  ;;  %v7337_v12 = vld [vmem:[#allocation5 + $0x150] sm:$0xff]  ;;  %v1124_v58 = vld [vmem:[#allocation5 + $0x178] sm:$0xff] }
 0x16f   :  { %v481_v52 = vmul.f32 0.020408163, %v373_v2  ;;  %2612 = vmatprep.subr.bf16.mxu0 %v5103_v24  ;;  %2694 = vmatprep.subr.bf16.mxu1 %v5105_v57  ;;  %v3230_v61 = vsel %vm1345_vm4, %v3229_v41, %v3225_v23  ;;  %v480_v4 = vmul.f32 0.020408163, %v370_v44  ;;  %v5121_v40 = vcombine.high %v1104_v16, %v1108_v27  ;;  %v1115_v24 = vld [vmem:[#allocation5 + $0x130] sm:$0xff]  ;;  %v1112_v57 = vld [vmem:[#allocation5 + $0x118] sm:$0xff] }
 0x170   :  { %v3235_v20 = vsel %vm1352_vm5, %v3234_v1, %v3230_v61  ;;  %v5120_v30 = vcombine.low %v1104_v16, %v1108_v27  ;;  %v5127_v18 = vcombine.high %v1111_v49, %v1115_v24  ;;  %v5129_v11 = vcombine.high %v1112_v57, %v1116_v38  ;;  %v7353_v44 = vld [vmem:[#allocation5 + $0x1b8] sm:$0xff] }
 0x171   :  { %2613 = vmatpush1.bf16.msra.mxu0 %v5102_v56  ;;  %2695 = vmatpush1.bf16.msra.mxu1 %v5104_v29  ;;  %v7330_v7 = vpack.c.bf16 %v481_v52, %v480_v4  ;;  %v7333_v8 = vsel %vm1713_vm6, %v3235_v20, %v3058_v55  ;;  %v5118_v29 = vcombine.low %v1103_v39, %v1107_v5  ;;  %v2826_v33 = vunpack.c.l.b16 %v7323_v42  ;;  %v7343_v55 = vld [vmem:[#allocation5 + $0x190] sm:$0xff]  ;;  %v7351_v52 = vld [vmem:[#allocation5 + $0x198] sm:$0xff] }
 0x172   :  { %v217_v48 = vpop.xlane.xlu1 %216  ;;  %2614 = vmatprep.subr.bf16.mxu0 %v5111_v35  ;;  %2696 = vmatprep.subr.bf16.mxu1 %v5113_v63  ;;  %v214_v21 = vpop.xlane.xlu0 %213  ;;  %v2827_v10 = vunpack.c.h.b16 %v7323_v42  ;;  %v5126_v28 = vcombine.low %v1111_v49, %v1115_v24  ;;  %v7345_v35 = vld [vmem:[#allocation5 + $0x1b0] sm:$0xff]  ;;  %v5128_v63 = vcombine.low %v1112_v57, %v1116_v38  ;;  %v5134_v41 = vcombine.low %v7337_v12, %v7339_v34  ;;  %v7371_v57 = vld [vmem:[#allocation5 + $0x1d8] sm:$0xff] }
 0x173   :  { %v429_v51 = vmul.f32 0.020408163, %v217_v48  ;;  %v428_v56 = vmul.f32 0.020408163, %v214_v21  ;;  %v5135_v1 = vcombine.high %v7337_v12, %v7339_v34  ;;  %v5136_v39 = vcombine.low %v1120_v53, %v1124_v58  ;;  %v7373_v38 = vld [vmem:[#allocation5 + $0x1f8] sm:$0xff] }
 0x174   :  { %v5137_v23 = vcombine.high %v1120_v53, %v1124_v58  ;;  %v2964_v5 = vrot.slane %v2826_v33, %v8528_v50  ;;  %v2968_v16 = vrot.slane %v2827_v10, %v8529_v17  ;;  %v5142_v4 = vcombine.low %v7343_v55, %v7345_v35  ;;  %v7384_v33 = vld [vmem:[#allocation5 + $0x210] sm:$0xff] }
 0x175   :  { %2615 = vmatpush1.bf16.msra.mxu0 %v5110_v13  ;;  %2697 = vmatpush1.bf16.msra.mxu1 %v5112_v47  ;;  %v7335_v37 = vpack.c.bf16 %v429_v51, %v428_v56  ;;  %v5143_v48 = vcombine.high %v7343_v55, %v7345_v35  ;;  %v2862_v49 = vunpack.c.l.b16 %v7330_v7  ;;  %v2863_v51 = vunpack.c.h.b16 %v7330_v7  ;;  %v7386_v10 = vld [vmem:[#allocation5 + $0x230] sm:$0xff] }
 0x176   :  { %v271_v60 = vpop.xlane.xlu1 %270  ;;  %2616 = vmatprep.subr.bf16.mxu0 %v5119_v6  ;;  %2698 = vmatprep.subr.bf16.mxu1 %v5121_v40  ;;  %v268_v36 = vpop.xlane.xlu0 %267  ;;  %v7361_v6 = vld [vmem:[#allocation5 + $0x1d0] sm:$0xff]  ;;  %v5144_v21 = vcombine.low %v7351_v52, %v7353_v44  ;;  %v5145_v24 = vcombine.high %v7351_v52, %v7353_v44  ;;  %v2969_v7 = vsel %vm1338_vm3, %v2968_v16, %v2964_v5 }
 0x177   :  { %v447_v31 = vmul.f32 0.020408163, %v271_v60  ;;  %v446_v14 = vmul.f32 0.020408163, %v268_v36  ;;  %v7363_v40 = vld [vmem:[#allocation5 + $0x1f0] sm:$0xff]  ;;  %v5152_v53 = vcombine.low %v7371_v57, %v7373_v38  ;;  %v5153_v58 = vcombine.high %v7371_v57, %v7373_v38  ;;  %v1152_v38 = vld [vmem:[#allocation5 + $0x258] sm:$0xff] }
 0x178   :  { %v5150_v12 = vcombine.low %v7361_v6, %v7363_v40  ;;  %v5151_v34 = vcombine.high %v7361_v6, %v7363_v40  ;;  %v3141_v55 = vrot.slane %v2862_v49, %v8528_v50  ;;  %v3145_v35 = vrot.slane %v2863_v51, %v8529_v17 }
 0x179   :  { %2617 = vmatpush1.bf16.msra.mxu0 %v5118_v29  ;;  %2699 = vmatpush1.bf16.msra.mxu1 %v5120_v30  ;;  %v870_v42 = vpack.c.bf16 %v447_v31, %v446_v14  ;;  %v7393_v14 = vld [vmem:[#allocation5 + $0x218] sm:$0xff]  ;;  %v5158_v44 = vcombine.low %v7384_v33, %v7386_v10  ;;  %v5159_v5 = vcombine.high %v7384_v33, %v7386_v10  ;;  %v2811_v16 = vunpack.c.h.b16 %v7335_v37 }
 0x17a   :  { %v325_v2 = vpop.xlane.xlu1 %324  ;;  %2618 = vmatprep.subr.bf16.mxu0 %v5127_v18  ;;  %2700 = vmatprep.subr.bf16.mxu1 %v5129_v11  ;;  %v322_v61 = vpop.xlane.xlu0 %321  ;;  %v3146_v6 = vsel %vm1338_vm3, %v3145_v35, %v3141_v55  ;;  %v1163_v35 = vld [vmem:[#allocation5 + $0x2b0] sm:$0xff] }
 0x17b   :  { %v465_v27 = vmul.f32 0.020408163, %v325_v2  ;;  %v2828_v20 = vunpack.c.l.b16 %v870_v42  ;;  %v2829_v13 = vunpack.c.h.b16 %v870_v42  ;;  %v464_v47 = vmul.f32 0.020408163, %v322_v61  ;;  %v7403_v42 = vld [vmem:[#allocation5 + $0x250] sm:$0xff] }
 0x17c   :  { %v7405_v2 = vld [vmem:[#allocation5 + $0x270] sm:$0xff] }
 0x17d   :  { %2619 = vmatpush1.bf16.msra.mxu0 %v5126_v28  ;;  %2701 = vmatpush1.bf16.msra.mxu1 %v5128_v63  ;;  %v2973_v56 = vrot.slane %v2828_v20, %v8531_v54  ;;  %v2978_v29 = vrot.slane %v2829_v13, %v8532_v19  ;;  %v7377_v30 = vpack.c.bf16 %v465_v27, %v464_v47  ;;  %v7395_v28 = vld [vmem:[#allocation5 + $0x238] sm:$0xff]  ;;  %v2810_v63 = vunpack.c.l.b16 %v7335_v37 }
 0x17e   :  { %v379_v60 = vpop.xlane.xlu1 %378  ;;  %2620 = vmatprep.subr.bf16.mxu0 %v5135_v1  ;;  %2702 = vmatprep.subr.bf16.mxu1 %v5137_v23  ;;  %v376_v11 = vpop.xlane.xlu0 %375  ;;  %v5167_v37 = vcombine.high %v7403_v42, %v7405_v2 }
 0x17f   :  { %v483_v18 = vmul.f32 0.020408163, %v379_v60  ;;  %v2974_v31 = vsel %vm1345_vm4, %v2973_v56, %v2969_v7  ;;  %v482_v36 = vmul.f32 0.020408163, %v376_v11  ;;  %v2885_v40 = vrot.slane %v2810_v63, %v8528_v50  ;;  %v1156_v56 = vld [vmem:[#allocation5 + $0x278] sm:$0xff] }
 0x180   :  { %v7401_v1 = vsel %vm1352_vm5, %v2978_v29, %v2974_v31  ;;  %v2889_v29 = vrot.slane %v2811_v16, %v8529_v17  ;;  %v2846_v60 = vunpack.c.l.b16 %v7377_v30  ;;  %v1160_v63 = vld [vmem:[#allocation5 + $0x298] sm:$0xff] }
 0x181   :  { %2621 = vmatpush1.bf16.msra.mxu0 %v5134_v41  ;;  %2703 = vmatpush1.bf16.msra.mxu1 %v5136_v39  ;;  %v888_v23 = vpack.c.bf16 %v483_v18, %v482_v36  ;;  %v5160_v41 = vcombine.low %v7393_v14, %v7395_v28  ;;  %v5161_v39 = vcombine.high %v7393_v14, %v7395_v28 }
 0x182   :  { %v223_v52 = vpop.xlane.xlu1 %222  ;;  %2622 = vmatprep.subr.bf16.mxu0 %v5143_v48  ;;  %2704 = vmatprep.subr.bf16.mxu1 %v5145_v24  ;;  %v220_v61 = vpop.xlane.xlu0 %219  ;;  %v5166_v48 = vcombine.low %v7403_v42, %v7405_v2  ;;  %v5169_v36 = vcombine.high %v1152_v38, %v1156_v56 }
 0x183   :  { %v431_v27 = vmul.f32 0.020408163, %v223_v52  ;;  %v2864_v20 = vunpack.c.l.b16 %v888_v23  ;;  %v2865_v13 = vunpack.c.h.b16 %v888_v23  ;;  %v430_v47 = vmul.f32 0.020408163, %v220_v61  ;;  %v1164_v23 = vld [vmem:[#allocation5 + $0x2b8] sm:$0xff] }
 0x184   :  { %v2890_v52 = vsel %vm1338_vm3, %v2889_v29, %v2885_v40  ;;  %v7443_v40 = vld [vmem:[#allocation5 + $0x2d0] sm:$0xff] }
 0x185   :  { %2623 = vmatpush1.bf16.msra.mxu0 %v5142_v4  ;;  %2705 = vmatpush1.bf16.msra.mxu1 %v5144_v21  ;;  %v3150_v49 = vrot.slane %v2864_v20, %v8531_v54  ;;  %v3155_v51 = vrot.slane %v2865_v13, %v8532_v19  ;;  %v862_v24 = vpack.c.bf16 %v431_v27, %v430_v47  ;;  %v2847_v4 = vunpack.c.h.b16 %v7377_v30 }
 0x186   :  { %v331_v57 = vpop.xlane.xlu1 %330  ;;  %2624 = vmatprep.subr.bf16.mxu0 %v5151_v34  ;;  %2706 = vmatprep.subr.bf16.mxu1 %v5153_v58  ;;  %v5168_v34 = vcombine.low %v1152_v38, %v1156_v56  ;;  %v7431_v58 = vld [vmem:[#allocation5 + $0x290] sm:$0xff]  ;;  %v1172_v38 = vld [vmem:[#allocation5 + $0x2f8] sm:$0xff] }
 0x187   :  { %v467_v21 = vmul.f32 0.020408163, %v331_v57  ;;  %v328_v7 = vpop.xlane.xlu0 %327  ;;  %v3151_v18 = vsel %vm1345_vm4, %v3150_v49, %v3146_v6  ;;  %v2812_v11 = vunpack.c.l.b16 %v862_v24  ;;  %v2813_v33 = vunpack.c.h.b16 %v862_v24  ;;  %v1171_v24 = vld [vmem:[#allocation5 + $0x2f0] sm:$0xff]  ;;  %v1168_v57 = vld [vmem:[#allocation5 + $0x2d8] sm:$0xff] }
 0x188   :  { %v466_v10 = vmul.f32 0.020408163, %v328_v7  ;;  %v7429_v31 = vsel %vm1352_vm5, %v3155_v51, %v3151_v18  ;;  %v5174_v29 = vcombine.low %v7431_v58, %v1163_v35  ;;  %v5185_v18 = vcombine.high %v1168_v57, %v1172_v38 }
 0x189   :  { %2625 = vmatpush1.bf16.msra.mxu0 %v5150_v12  ;;  %2707 = vmatpush1.bf16.msra.mxu1 %v5152_v53  ;;  %v2894_v14 = vrot.slane %v2812_v11, %v8531_v54  ;;  %v2899_v30 = vrot.slane %v2813_v33, %v8532_v19  ;;  %v3062_v12 = vrot.slane %v2846_v60, %v8528_v50  ;;  %v7457_v11 = vld [vmem:[#allocation5 + $0x310] sm:$0xff]  ;;  %v8534_v33 = vld [vmem:[#allocation22_spill] sm:$0xff] }
 0x18a   :  { %v880_v28 = vpack.c.bf16 %v467_v21, %v466_v10  ;;  %v277_v55 = vpop.xlane.xlu1 %276  ;;  %2626 = vmatprep.subr.bf16.mxu0 %v5159_v5  ;;  %2708 = vmatprep.subr.bf16.mxu1 %v5161_v39  ;;  %v3066_v53 = vrot.slane %v2847_v4, %v8529_v17  ;;  %v5175_v5 = vcombine.high %v7431_v58, %v1163_v35  ;;  %v1180_v35 = vld [vmem:[#allocation5 + $0x338] sm:$0xff] }
 0x18b   :  { %v449_v16 = vmul.f32 0.020408163, %v277_v55  ;;  %v274_v27 = vpop.xlane.xlu0 %273  ;;  %v2895_v61 = vsel %vm1345_vm4, %v2894_v14, %v2890_v52  ;;  %v5177_v39 = vcombine.high %v1160_v63, %v1164_v23  ;;  %v5176_v60 = vcombine.low %v1160_v63, %v1164_v23  ;;  %v1176_v55 = vld [vmem:[#allocation5 + $0x318] sm:$0xff] }
 0x18c   :  { %v2848_v20 = vunpack.c.l.b16 %v880_v28  ;;  %v2849_v13 = vunpack.c.h.b16 %v880_v28  ;;  %v448_v47 = vmul.f32 0.020408163, %v274_v27  ;;  %v7440_v6 = vsel %vm1352_vm5, %v2899_v30, %v2895_v61  ;;  %v1179_v28 = vld [vmem:[#allocation5 + $0x330] sm:$0xff] }
 0x18d   :  { %2627 = vmatpush1.bf16.msra.mxu0 %v5158_v44  ;;  %2709 = vmatpush1.bf16.msra.mxu1 %v5160_v41  ;;  %v3067_v56 = vsel %vm1338_vm3, %v3066_v53, %v3062_v12  ;;  %v5182_v2 = vcombine.low %v7443_v40, %v1171_v24  ;;  %v5193_v27 = vcombine.high %v1176_v55, %v1180_v35  ;;  %v1183_v61 = vld [vmem:[#allocation5 + $0x350] sm:$0xff]  ;;  %vm8590_vm3 = vcmask 589312  }
 0x18e   :  { %v3071_v50 = vrot.slane %v2848_v20, %v8531_v54  ;;  %v3076_v17 = vrot.slane %v2849_v13, %v8532_v19  ;;  %v871_v49 = vpack.c.bf16 %v449_v16, %v448_v47  ;;  %v385_v51 = vpop.xlane.xlu1 %384  ;;  %2628 = vmatprep.subr.bf16.mxu0 %v5167_v37  ;;  %2710 = vmatprep.subr.bf16.mxu1 %v5169_v36  ;;  %v8535_v36 = vld [vmem:[#allocation23_spill] sm:$0xff] }
 0x18f   :  { %v485_v44 = vmul.f32 0.020408163, %v385_v51  ;;  %v382_v41 = vpop.xlane.xlu0 %381  ;;  %v5183_v37 = vcombine.high %v7443_v40, %v1171_v24  ;;  %v5191_v16 = vcombine.high %v7457_v11, %v1179_v28  ;;  %v1188_v40 = vld [vmem:[#allocation5 + $0x378] sm:$0xff]  ;;  %v5192_v51 = vcombine.low %v1176_v55, %v1180_v35 }
 0x190   :  { %v3072_v4 = vsel %vm1345_vm4, %v3071_v50, %v3067_v56  ;;  %v2830_v21 = vunpack.c.l.b16 %v871_v49  ;;  %v2831_v54 = vunpack.c.h.b16 %v871_v49  ;;  %v484_v7 = vmul.f32 0.020408163, %v382_v41  ;;  %vm8598_vm4 = vmmov %vm8590_vm3 }
 0x191   :  { %v7451_v19 = vsel %vm1352_vm5, %v3076_v17, %v3072_v4  ;;  %2629 = vmatpush1.bf16.msra.mxu0 %v5166_v48  ;;  %2711 = vmatpush1.bf16.msra.mxu1 %v5168_v34  ;;  %v5184_v48 = vcombine.low %v1168_v57, %v1172_v38  ;;  %v5190_v49 = vcombine.low %v7457_v11, %v1179_v28  ;;  %v1196_v11 = vld [vmem:[#allocation5 + $0x3b8] sm:$0xff]  ;;  %vm8599_vm5 = vmmov %vm8590_vm3 }
 0x192   :  { %v2983_v10 = vrot.slane %v2830_v21, %v8534_v33  ;;  %v2988_v58 = vrot.slane %v2831_v54, %v8535_v36  ;;  %v889_v14 = vpack.c.bf16 %v485_v44, %v484_v7  ;;  %v229_v30 = vpop.xlane.xlu1 %228  ;;  %2630 = vmatprep.subr.bf16.mxu0 %v5175_v5  ;;  %2712 = vmatprep.subr.bf16.mxu1 %v5177_v39  ;;  %v1184_v39 = vld [vmem:[#allocation5 + $0x358] sm:$0xff]  ;;  %v1195_v7 = vld [vmem:[#allocation5 + $0x3b0] sm:$0xff] }
 0x193   :  { %v433_v63 = vmul.f32 0.020408163, %v229_v30  ;;  %v226_v42 = vpop.xlane.xlu0 %225  ;;  %v5200_v55 = vcombine.low %v1184_v39, %v1188_v40 }
 0x194   :  { %v2984_v34 = vsel %vm1359_vm8, %v2983_v10, %v7401_v1  ;;  %v2866_v23 = vunpack.c.l.b16 %v889_v14  ;;  %v2867_v52 = vunpack.c.h.b16 %v889_v14  ;;  %v432_v12 = vmul.f32 0.020408163, %v226_v42  ;;  %v1187_v1 = vld [vmem:[#allocation5 + $0x370] sm:$0xff] }
 0x195   :  { %v7465_v53 = vsel %vm1366_vm9, %v2988_v58, %v2984_v34  ;;  %2631 = vmatpush1.bf16.msra.mxu0 %v5174_v29  ;;  %2713 = vmatpush1.bf16.msra.mxu1 %v5176_v60  ;;  %v5199_v41 = vcombine.high %v1183_v61, %v1187_v1  ;;  %v5201_v29 = vcombine.high %v1184_v39, %v1188_v40  ;;  %v1025_v39 = vld [vmem:[#allocation2 + $0x400] sm:$0xff] }
 0x196   :  { %v3160_v20 = vrot.slane %v2866_v23, %v8534_v33  ;;  %v3165_v13 = vrot.slane %v2867_v52, %v8535_v36  ;;  %v863_v47 = vpack.c.bf16 %v433_v63, %v432_v12  ;;  %v337_v5 = vpop.xlane.xlu1 %336  ;;  %2632 = vmatprep.subr.bf16.mxu0 %v5183_v37  ;;  %2714 = vmatprep.subr.bf16.mxu1 %v5185_v18  ;;  %v1192_v18 = vld [vmem:[#allocation5 + $0x398] sm:$0xff]  ;;  %v1203_v23 = vld [vmem:[#allocation5 + $0x3f0] sm:$0xff]  ;;  %v1029_v40 = vld [vmem:[#allocation2 + $0x420] sm:$0xff] }
 0x197   :  { %v469_v50 = vmul.f32 0.020408163, %v337_v5  ;;  %v334_v17 = vpop.xlane.xlu0 %333  ;;  %v5198_v30 = vcombine.low %v1183_v61, %v1187_v1  ;;  %v1200_v52 = vld [vmem:[#allocation5 + $0x3d8] sm:$0xff] }
 0x198   :  { %v3161_v24 = vsel %vm1359_vm8, %v3160_v20, %v7429_v31  ;;  %v2814_v57 = vunpack.c.l.b16 %v863_v47  ;;  %v2815_v38 = vunpack.c.h.b16 %v863_v47  ;;  %v468_v56 = vmul.f32 0.020408163, %v334_v17  ;;  %v1191_v31 = vld [vmem:[#allocation5 + $0x390] sm:$0xff]  ;;  %v1204_v12 = vld [vmem:[#allocation5 + $0x3f8] sm:$0xff] }
 0x199   :  { %v7474_v44 = vsel %vm1366_vm9, %v3165_v13, %v3161_v24  ;;  %2633 = vmatpush1.bf16.msra.mxu0 %v5182_v2  ;;  %2715 = vmatpush1.bf16.msra.mxu1 %v5184_v48  ;;  %v5207_v35 = vcombine.high %v1191_v31, %v1195_v7  ;;  %v5209_v48 = vcombine.high %v1192_v18, %v1196_v11  ;;  %v1208_v47 = vld [vmem:[#allocation5 + $0x418] sm:$0xff] }
 0x19a   :  { %v2904_v60 = vrot.slane %v2814_v57, %v8534_v33  ;;  %v2909_v4 = vrot.slane %v2815_v38, %v8535_v36  ;;  %v881_v21 = vpack.c.bf16 %v469_v50, %v468_v56  ;;  %v7478_v54 = vpop.xlane.xlu1 %282  ;;  %2634 = vmatprep.subr.bf16.mxu0 %v5191_v16  ;;  %2716 = vmatprep.subr.bf16.mxu1 %v5193_v27  ;;  %v1212_v1 = vld [vmem:[#allocation5 + $0x438] sm:$0xff]  ;;  %v1033_v56 = vld [vmem:[#allocation2 + $0x440] sm:$0xff] }
 0x19b   :  { %v7480_v37 = vpop.xlane.xlu0 %279  ;;  %v5217_v13 = vcombine.high %v1200_v52, %v1204_v12  ;;  %v5216_v50 = vcombine.low %v1200_v52, %v1204_v12  ;;  %v7504_v24 = vld [vmem:[#allocation5 + $0x458] sm:$0xff]  ;;  %v7538_v52 = vld [vmem:[#allocation2 + $0xa8] sm:$0xff] }
 0x19c   :  { %v2905_v10 = vsel %vm1359_vm8, %v2904_v60, %v7440_v6  ;;  %v2850_v58 = vunpack.c.l.b16 %v881_v21  ;;  %v2851_v14 = vunpack.c.h.b16 %v881_v21  ;;  %v1199_v6 = vld [vmem:[#allocation5 + $0x3d0] sm:$0xff]  ;;  %v1220_v38 = vld [vmem:[#allocation5 + $0x478] sm:$0xff]  ;;  %v5366_v60 = vcombine.low %v1025_v39, %v1029_v40  ;;  %v7510_v21 = vld [vmem:[#allocation2 + $0x20] sm:$0xff] }
 0x19d   :  { %v7485_v28 = vsel %vm1366_vm9, %v2909_v4, %v2905_v10  ;;  %2635 = vmatpush1.bf16.msra.mxu0 %v5190_v49  ;;  %2717 = vmatpush1.bf16.msra.mxu1 %v5192_v51  ;;  %v5215_v20 = vcombine.high %v1199_v6, %v1203_v23  ;;  %v5225_v49 = vcombine.high %v1208_v47, %v1212_v1  ;;  %v7508_v4 = vld [vmem:[#allocation2] sm:$0xff]  ;;  %v7517_v10 = vld [vmem:[#allocation2 + $0x28] sm:$0xff] }
 0x19e   :  { %v3081_v63 = vrot.slane %v2850_v58, %v8534_v33  ;;  %v3086_v42 = vrot.slane %v2851_v14, %v8535_v36  ;;  %v7489_v2 = vpop.xlane.xlu1 %390  ;;  %2636 = vmatprep.subr.bf16.mxu0 %v5199_v41  ;;  %2718 = vmatprep.subr.bf16.mxu1 %v5201_v29  ;;  %v5206_v33 = vcombine.low %v1191_v31, %v1195_v7  ;;  %v1037_v41 = vld [vmem:[#allocation2 + $0x460] sm:$0xff]  ;;  %v7512_v31 = vld [vmem:[#allocation2 + $0x8] sm:$0xff] }
 0x19f   :  { %v7491_v34 = vpop.xlane.xlu0 %387  ;;  %v5208_v36 = vcombine.low %v1192_v18, %v1196_v11  ;;  %v5367_v51 = vcombine.high %v1025_v39, %v1029_v40  ;;  %v5224_v29 = vcombine.low %v1208_v47, %v1212_v1  ;;  %v5233_v18 = vcombine.high %v7504_v24, %v1220_v38  ;;  %v7519_v58 = vld [vmem:[#allocation2 + $0x40] sm:$0xff]  ;;  %v7560_v40 = vld [vmem:[#allocation2 + $0xe8] sm:$0xff] }
 0x1a0   :  { %v3082_v16 = vsel %vm1359_vm8, %v3081_v63, %v7451_v19  ;;  %v5214_v19 = vcombine.low %v1199_v6, %v1203_v23  ;;  %v5375_v11 = vcombine.high %v1033_v56, %v1037_v41  ;;  %v7521_v14 = vld [vmem:[#allocation2 + $0x60] sm:$0xff]  ;;  %v7536_v23 = vld [vmem:[#allocation2 + $0x88] sm:$0xff]  ;;  %v5240_v47 = vcombine.low %v7512_v31, %v7517_v10  ;;  %vm8600_vm8 = vmmov %vm8590_vm3 }
 0x1a1   :  { %v7496_v27 = vsel %vm1366_vm9, %v3086_v42, %v3082_v16  ;;  %2637 = vmatpush1.bf16.msra.mxu0 %v5198_v30  ;;  %2719 = vmatpush1.bf16.msra.mxu1 %v5200_v55  ;;  %v7525_v55 = vld [vmem:[#allocation2 + $0x48] sm:$0xff]  ;;  %v7529_v63 = vld [vmem:[#allocation2 + $0x80] sm:$0xff]  ;;  %v5232_v42 = vcombine.low %v7504_v24, %v1220_v38  ;;  %v5239_v16 = vcombine.high %v7508_v4, %v7510_v21 }
 0x1a2   :  { %8536 = vst [vmem:[#allocation17_spill] sm:$0xff] %v7496_v27  ;;  %v7498_v61 = vpop.xlane.xlu1 %234  ;;  %2638 = vmatprep.subr.bf16.mxu0 %v5207_v35  ;;  %2720 = vmatprep.subr.bf16.mxu1 %v5209_v48  ;;  %v7527_v35 = vld [vmem:[#allocation2 + $0x68] sm:$0xff]  ;;  %v5374_v48 = vcombine.low %v1033_v56, %v1037_v41  ;;  %v7534_v6 = vld [vmem:[#allocation2 + $0xa0] sm:$0xff]  ;;  %v5247_v39 = vcombine.high %v7519_v58, %v7521_v14 }
 0x1a3   :  { %v7500_v5 = vpop.xlane.xlu0 %231  ;;  %v5249_v24 = vcombine.high %v7525_v55, %v7527_v35  ;;  %v7576_v56 = vld [vmem:[#allocation2 + $0x108] sm:$0xff]  ;;  %v7602_v1 = vld [vmem:[#allocation2 + $0x180] sm:$0xff] }
 0x1a4   :  { %v7578_v41 = vld [vmem:[#allocation2 + $0x128] sm:$0xff]  ;;  %v434_v0 = vmul.f32 0.020408163, %v7500_v5 }
 0x1a5   :  { %2639 = vmatpush1.bf16.msra.mxu0 %v5206_v33  ;;  %2721 = vmatpush1.bf16.msra.mxu1 %v5208_v36  ;;  %v7546_v33 = vld [vmem:[#allocation2 + $0xc0] sm:$0xff]  ;;  %v7592_v38 = vld [vmem:[#allocation2 + $0x148] sm:$0xff] }
 0x1a6   :  { %v7502_v17 = vpop.xlane.xlu1 %342  ;;  %2640 = vmatprep.subr.bf16.mxu0 %v5215_v20  ;;  %2722 = vmatprep.subr.bf16.mxu1 %v5217_v13  ;;  %v7548_v36 = vld [vmem:[#allocation2 + $0xe0] sm:$0xff]  ;;  %v7550_v20 = vld [vmem:[#allocation2 + $0xc8] sm:$0xff] }
 0x1a7   :  { %v7506_v57 = vpop.xlane.xlu0 %339  ;;  %v7606_v12 = vld [vmem:[#allocation2 + $0x188] sm:$0xff] }
 0x1a8   :  { %8537 = vst [vmem:[#allocation18_spill] sm:$0xff] %v7606_v12  ;;  %v7703_v12 = vld [vmem:[#allocation2 + $0x2c0] sm:$0xff]  ;;  %v470_v5 = vmul.f32 0.020408163, %v7506_v57 }
 0x1a9   :  { %2641 = vmatpush1.bf16.msra.mxu0 %v5214_v19  ;;  %2723 = vmatpush1.bf16.msra.mxu1 %v5216_v50  ;;  %v7562_v19 = vld [vmem:[#allocation2 + $0x100] sm:$0xff]  ;;  %8547 = vst [vmem:[#allocation23_spill] sm:$0xff] %v7703_v12 }
 0x1aa   :  { %v7514_v7 = vpop.xlane.xlu1 %288  ;;  %2733 = vmatprep.subr.bf16.mxu0 %v5225_v49  ;;  %4008 = vmatprep.subr.bf16.mxu1 %v5367_v51  ;;  %v7564_v50 = vld [vmem:[#allocation2 + $0x120] sm:$0xff]  ;;  %v7594_v51 = vld [vmem:[#allocation2 + $0x168] sm:$0xff] }
 0x1ab   :  { %v7523_v30 = vpop.xlane.xlu0 %285 }
 0x1ac   :  { %2643 = vmatmul.mubr.bf16.vlgmr.msra.gmra.mrb[8].mxu0 %v7268_v25  ;;  %2725 = vmatmul.mubr.bf16.vlgmr.msra.gmra.mrb[12].mxu1 %v7268_v25  ;;  %v5241_v25 = vcombine.high %v7512_v31, %v7517_v10  ;;  %v7590_v10 = vld [vmem:[#allocation2 + $0x160] sm:$0xff]  ;;  %v7634_v31 = vld [vmem:[#allocation2 + $0x1c8] sm:$0xff] }
 0x1ad   :  { %2734 = vmatpush1.bf16.msra.mxu0 %v5224_v29  ;;  %4009 = vmatpush1.bf16.msra.mxu1 %v5366_v60  ;;  %v7580_v29 = vld [vmem:[#allocation2 + $0x140] sm:$0xff]  ;;  %v7618_v60 = vld [vmem:[#allocation2 + $0x1a8] sm:$0xff]  ;;  %8542 = vst [vmem:[#allocation15_spill] sm:$0xff] %v7634_v31 }
 0x1ae   :  { %v7552_v13 = vpop.xlane.xlu1 %396  ;;  %2735 = vmatprep.subr.bf16.mxu0 %v5233_v18  ;;  %4010 = vmatprep.subr.bf16.mxu1 %v5375_v11  ;;  %v7604_v11 = vld [vmem:[#allocation2 + $0x1a0] sm:$0xff]  ;;  %8539 = vst [vmem:[#allocation20_spill] sm:$0xff] %v7618_v60  ;;  %v486_v60 = vmul.f32 0.020408163, %v7491_v34  ;;  %v8551_v34 = vcombine.low %v7525_v55, %v7527_v35  ;;  %v8555_v55 = vcombine.high %v7536_v23, %v7538_v52 }
 0x1af   :  { %v7566_v49 = vpop.xlane.xlu0 %393  ;;  %2765 = vmatprep.mubr.bf16.mxu0 %v8530_v3  ;;  %4040 = vmatprep.mubr.bf16.mxu1 %v8530_v3  ;;  %v7620_v18 = vld [vmem:[#allocation2 + $0x1c0] sm:$0xff] }
 0x1b0   :  { %8540 = vst [vmem:[#allocation13_spill] sm:$0xff] %v7620_v18  ;;  %v487_v18 = vmul.f32 0.020408163, %v7489_v2  ;;  %v8550_v2 = vcombine.low %v7519_v58, %v7521_v14  ;;  %v8554_v14 = vcombine.high %v7529_v63, %v7534_v6  ;;  %v7751_v35 = vld [vmem:[#allocation2 + $0x300] sm:$0xff] }
 0x1b1   :  { %2736 = vmatpush1.bf16.msra.mxu0 %v5232_v42  ;;  %4011 = vmatpush1.bf16.msra.mxu1 %v5374_v48  ;;  %v7612_v42 = vpack.c.b16 %v7333_v8, %v7333_v8  ;;  %v7650_v8 = vld [vmem:[#allocation2 + $0x220] sm:$0xff]  ;;  %v451_v48 = vmul.f32 0.020408163, %v7478_v54 }
 0x1b2   :  { %v7608_v3 = vpop.xlane.xlu1 %240  ;;  %3967 = vmatprep.subr.bf16.mxu0 %v5239_v16  ;;  %4049 = vmatprep.subr.bf16.mxu1 %v5241_v25  ;;  %8544 = vst [vmem:[#allocation21_spill] sm:$0xff] %v7650_v8  ;;  %v7681_v25 = vld [vmem:[#allocation2 + $0x280] sm:$0xff]  ;;  %v7721_v8 = vld [vmem:[#allocation2 + $0x2c8] sm:$0xff] }
 0x1b3   :  { %8538 = vst [vmem:[#allocation19_spill] sm:$0xff] %v7612_v42  ;;  %v7624_v9 = vpop.xlane.xlu0 %237  ;;  %v7683_v16 = vld [vmem:[#allocation2 + $0x2a0] sm:$0xff]  ;;  %8552 = vst [vmem:[#allocation34_spill] sm:$0xff] %v7721_v8 }
 0x1b4   :  { %5237 = vmatmul.mubr.msk.bf16.vlgmr.msra.gmra.mrb[12].mxu0 %vm2442_vm7, %v8533_v62  ;;  %5382 = vmatmul.mubr.msk.bf16.vlgmr.msra.gmra.mrb[16].mxu1 %vm2442_vm7, %v7612_v42  ;;  %v8545_v62 = vcombine.low %v7508_v4, %v7510_v21  ;;  %v7665_v42 = vld [vmem:[#allocation2 + $0x240] sm:$0xff]  ;;  %8546 = vst [vmem:[#allocation22_spill] sm:$0xff] %v7683_v16  ;;  %v435_v21 = vmul.f32 0.020408163, %v7498_v61  ;;  %v471_v61 = vmul.f32 0.020408163, %v7502_v17  ;;  %v7767_v16 = vpack.c.bf16 %v487_v18, %v486_v60 }
 0x1b5   :  { %4050 = vmatpush1.bf16.msra.mxu1 %v5240_v47  ;;  %v7695_v47 = vld [vmem:[#allocation2 + $0x2a8] sm:$0xff]  ;;  %v7705_v4 = vld [vmem:[#allocation2 + $0x2e0] sm:$0xff] }
 0x1b6   :  { %3968 = vmatpush1.bf16.msra.mxu0 %v8545_v62  ;;  %v7671_v27 = vpop.xlane.xlu1 %348  ;;  %4051 = vmatprep.subr.bf16.mxu1 %v5249_v24  ;;  %v7679_v62 = vld [vmem:[#allocation2 + $0x268] sm:$0xff]  ;;  %8548 = vst [vmem:[#allocation32_spill] sm:$0xff] %v7705_v4  ;;  %v7781_v4 = vld [vmem:[#allocation2 + $0x360] sm:$0xff]  ;;  %v7785_v18 = vpack.c.bf16 %v435_v21, %v434_v0  ;;  %v2868_v12 = vunpack.c.l.b16 %v7767_v16 }
 0x1b7   :  { %3969 = vmatprep.subr.bf16.mxu0 %v5247_v39  ;;  %v450_v39 = vmul.f32 0.020408163, %v7480_v37  ;;  %v7687_v24 = vpop.xlane.xlu0 %345  ;;  %v7709_v31 = vpop.f32.mrb[0].mxu1  ;;  %8561 = vst [vmem:[#allocation39_spill] sm:$0xff] %v7781_v4  ;;  %v7783_v60 = vld [vmem:[#allocation2 + $0x348] sm:$0xff]  ;;  %v7803_v0 = vld [vmem:[#allocation2 + $0x3a0] sm:$0xff] }
 0x1b8   :  { %8549 = vst [vmem:[#allocation33_spill] sm:$0xff] %v7709_v31  ;;  %v7725_v31 = vpop.f32.mrb[1].mxu1  ;;  %8565 = vst [vmem:[#allocation41_spill] sm:$0xff] %v7803_v0  ;;  %v7812_v37 = vld [vmem:[#allocation2 + $0x388] sm:$0xff]  ;;  %v3170_v0 = vrot.slane %v2868_v12, %v6823_v45 }
 0x1b9   :  { %4052 = vmatpush1.bf16.msra.mxu1 %v8551_v34  ;;  %8553 = vst [vmem:[#allocation35_spill] sm:$0xff] %v7725_v31  ;;  %v7741_v57 = vpack.c.bf16 %v451_v48, %v450_v39  ;;  %v2525_v34 = vpop.f32.mrb[2].mxu1  ;;  %v7753_v31 = vld [vmem:[#allocation2 + $0x320] sm:$0xff]  ;;  %v8559_v48 = vcombine.low %v7536_v23, %v7538_v52  ;;  %v8562_v23 = vcombine.high %v7546_v33, %v7548_v36 }
 0x1ba   :  { %3970 = vmatpush1.bf16.msra.mxu0 %v8550_v2  ;;  %v7727_v58 = vpop.xlane.xlu1 %294  ;;  %4053 = vmatprep.subr.bf16.mxu1 %v8555_v55  ;;  %v7739_v2 = vld [vmem:[#allocation2 + $0x2e8] sm:$0xff]  ;;  %8557 = vst [vmem:[#allocation37_spill] sm:$0xff] %v7753_v31  ;;  %v2526_v17 = vpop.f32.mrb[3].mxu1  ;;  %v7779_v39 = vld [vmem:[#allocation2 + $0x340] sm:$0xff]  ;;  %v8563_v52 = vcombine.high %v7550_v20, %v7560_v40  ;;  %v8567_v31 = vcombine.low %v7550_v20, %v7560_v40  ;;  %v436_v20 = vmul.f32 0.020408163, %v7624_v9  ;;  %v2817_v40 = vunpack.c.h.b16 %v7785_v18 }
 0x1bb   :  { %3971 = vmatprep.subr.bf16.mxu0 %v8554_v14  ;;  %8556 = vst [vmem:[#allocation36_spill] sm:$0xff] %v7739_v2  ;;  %v7743_v54 = vpop.xlane.xlu0 %291  ;;  %v7763_v14 = vld [vmem:[#allocation2 + $0x308] sm:$0xff]  ;;  %v8558_v17 = vcombine.low %v7529_v63, %v7534_v6  ;;  %8560 = vst [vmem:[#allocation38_spill] sm:$0xff] %v7779_v39  ;;  %v7787_v63 = vpack.c.bf16 %v471_v61, %v470_v5  ;;  %v7801_v34 = vld [vmem:[#allocation2 + $0x380] sm:$0xff]  ;;  %v2832_v21 = vunpack.c.l.b16 %v7741_v57  ;;  %v453_v61 = vmul.f32 0.020408163, %v7514_v7 }
 0x1bc   :  { %v7765_v55 = vld [vmem:[#allocation2 + $0x328] sm:$0xff]  ;;  %v452_v5 = vmul.f32 0.020408163, %v7523_v30  ;;  %v2816_v30 = vunpack.c.l.b16 %v7785_v18  ;;  %v489_v2 = vmul.f32 0.020408163, %v7552_v13  ;;  %v8570_v13 = vcombine.low %v7562_v19, %v7564_v50 }
 0x1bd   :  { %4054 = vmatpush1.bf16.msra.mxu1 %v8559_v48  ;;  %v7814_v48 = vld [vmem:[#allocation2 + $0x3a8] sm:$0xff]  ;;  %v2852_v4 = vunpack.c.l.b16 %v7787_v63  ;;  %v2853_v9 = vunpack.c.h.b16 %v7787_v63 }
 0x1be   :  { %3972 = vmatpush1.bf16.msra.mxu0 %v8558_v17  ;;  %v7789_v6 = vpop.xlane.xlu1 %402  ;;  %4055 = vmatprep.subr.bf16.mxu1 %v8563_v52  ;;  %v7799_v17 = vld [vmem:[#allocation2 + $0x368] sm:$0xff]  ;;  %v8566_v52 = vcombine.low %v7546_v33, %v7548_v36  ;;  %v8568_v33 = vcombine.high %v7562_v19, %v7564_v50  ;;  %v8569_v36 = vcombine.high %v7576_v56, %v7578_v41 }
 0x1bf   :  { %3973 = vmatprep.subr.bf16.mxu0 %v8562_v23  ;;  %8564 = vst [vmem:[#allocation40_spill] sm:$0xff] %v7799_v17  ;;  %v7808_v23 = vpop.xlane.xlu0 %399  ;;  %v7851_v7 = vpack.c.bf16 %v453_v61, %v452_v5  ;;  %v488_v17 = vmul.f32 0.020408163, %v7566_v49  ;;  %v3091_v12 = vrot.slane %v2852_v4, %v6823_v45  ;;  %v5353_v19 = vcombine.high %v7812_v37, %v7814_v48 }
 0x1c1   :  { %4056 = vmatpush1.bf16.msra.mxu1 %v8567_v31  ;;  %v2833_v31 = vunpack.c.h.b16 %v7741_v57  ;;  %v473_v57 = vmul.f32 0.020408163, %v7671_v27  ;;  %v8572_v27 = vcombine.high %v7580_v29, %v7590_v10  ;;  %v7886_v61 = vpack.c.bf16 %v489_v2, %v488_v17  ;;  %v7903_v2 = vld [vmem:[#allocation2 + $0x3e0] sm:$0xff] }
 0x1c2   :  { %3974 = vmatpush1.bf16.msra.mxu0 %v8566_v52  ;;  %v247_v39 = vpop.xlane.xlu1 %246  ;;  %4057 = vmatprep.subr.bf16.mxu1 %v8569_v36  ;;  %v2993_v52 = vrot.slane %v2832_v21, %v6823_v45  ;;  %v437_v36 = vmul.f32 0.020408163, %v7608_v3  ;;  %v472_v21 = vmul.f32 0.020408163, %v7687_v24  ;;  %v2914_v3 = vrot.slane %v2816_v30, %v6823_v45 }
 0x1c3   :  { %3975 = vmatprep.subr.bf16.mxu0 %v8568_v33  ;;  %v244_v8 = vpop.xlane.xlu0 %243  ;;  %v2869_v33 = vunpack.c.h.b16 %v7767_v16  ;;  %v8571_v16 = vcombine.low %v7576_v56, %v7578_v41  ;;  %v8573_v24 = vcombine.high %v7592_v38, %v7594_v51  ;;  %v2998_v50 = vrot.slane %v2833_v31, %v6826_v15 }
 0x1c4   :  { %v2834_v56 = vunpack.c.l.b16 %v7851_v7  ;;  %v455_v41 = vmul.f32 0.020408163, %v7727_v58  ;;  %v454_v45 = vmul.f32 0.020408163, %v7743_v54  ;;  %v2994_v18 = vsel %vm1373_vm10, %v2993_v52, %v7465_v53  ;;  %v7901_v58 = vld [vmem:[#allocation2 + $0x3c0] sm:$0xff] }
 0x1c5   :  { %4058 = vmatpush1.bf16.msra.mxu1 %v8571_v16  ;;  %v3175_v63 = vrot.slane %v2869_v33, %v6826_v15  ;;  %v7888_v5 = vpack.c.bf16 %v437_v36, %v436_v20  ;;  %v3171_v30 = vsel %vm1373_vm10, %v3170_v0, %v7474_v44  ;;  %v2919_v31 = vrot.slane %v2817_v40, %v6826_v15  ;;  %v8576_v44 = vld [vmem:[#allocation17_spill] sm:$0xff]  ;;  %v8581_v33 = vld [vmem:[#allocation24_spill] sm:$0xff] }
 0x1c6   :  { %3976 = vmatpush1.bf16.msra.mxu0 %v8570_v13  ;;  %v355_v49 = vpop.xlane.xlu1 %354  ;;  %4059 = vmatprep.subr.bf16.mxu1 %v8573_v24  ;;  %v7893_v13 = vpack.c.bf16 %v473_v57, %v472_v21  ;;  %v8574_v54 = vcombine.low %v7580_v29, %v7590_v10  ;;  %v8575_v53 = vcombine.low %v7592_v38, %v7594_v51  ;;  %v2835_v40 = vunpack.c.h.b16 %v7851_v7  ;;  %v8578_v51 = vld [vmem:[#allocation18_spill] sm:$0xff]  ;;  %v8579_v38 = vld [vmem:[#allocation20_spill] sm:$0xff] }
 0x1c7   :  { %3977 = vmatprep.subr.bf16.mxu0 %v8572_v27  ;;  %v352_v4 = vpop.xlane.xlu0 %351  ;;  %v2915_v17 = vsel %vm1373_vm10, %v2914_v3, %v7485_v28  ;;  %v3092_v0 = vsel %vm1373_vm10, %v3091_v12, %v8576_v44  ;;  %v3096_v20 = vrot.slane %v2853_v9, %v6826_v15  ;;  %v8577_v10 = vcombine.high %v7602_v1, %v7604_v11 }
 0x1c8   :  { %v8580_v52 = vcombine.high %v8578_v51, %v8579_v38  ;;  %v3003_v36 = vrot.slane %v2834_v56, %v8581_v33  ;;  %v874_v57 = vpack.c.bf16 %v455_v41, %v454_v45  ;;  %v491_v28 = vmul.f32 0.020408163, %v7789_v6 }
 0x1c9   :  { %4060 = vmatpush1.bf16.msra.mxu1 %v8575_v53  ;;  %v490_v21 = vmul.f32 0.020408163, %v7808_v23  ;;  %v2870_v15 = vunpack.c.l.b16 %v7886_v61  ;;  %v2818_v7 = vunpack.c.l.b16 %v7888_v5  ;;  %v5358_v3 = vcombine.low %v7901_v58, %v7903_v2 }
 0x1ca   :  { %3978 = vmatpush1.bf16.msra.mxu0 %v8574_v54  ;;  %v301_v29 = vpop.xlane.xlu1 %300  ;;  %4061 = vmatprep.subr.bf16.mxu1 %v8580_v52  ;;  %v5359_v9 = vcombine.high %v7901_v58, %v7903_v2  ;;  %v2999_v12 = vsel %vm1380_vm11, %v2998_v50, %v2994_v18  ;;  %v2854_v27 = vunpack.c.l.b16 %v7893_v13  ;;  %v439_v24 = vmul.f32 0.020408163, %v247_v39  ;;  %v8584_v50 = vld [vmem:[#allocation13_spill] sm:$0xff]  ;;  %v8585_v18 = vld [vmem:[#allocation14_spill] sm:$0xff]  ;;  %v8588_v39 = vld [vmem:[#allocation16_spill] sm:$0xff] }
 0x1cb   :  { %3979 = vmatprep.subr.bf16.mxu0 %v8577_v10  ;;  %v298_v16 = vpop.xlane.xlu0 %297  ;;  %v438_v56 = vmul.f32 0.020408163, %v244_v8  ;;  %v8582_v6 = vcombine.low %v7602_v1, %v7604_v11  ;;  %v8583_v23 = vcombine.low %v8578_v51, %v8579_v38  ;;  %v3176_v41 = vsel %vm1380_vm11, %v3175_v63, %v3171_v30  ;;  %v8587_v8 = vld [vmem:[#allocation15_spill] sm:$0xff]  ;;  %v8591_v11 = vld [vmem:[#allocation25_spill] sm:$0xff] }
 0x1cc   :  { %v2920_v45 = vsel %vm1380_vm11, %v2919_v31, %v2915_v17  ;;  %v3097_v54 = vsel %vm1380_vm11, %v3096_v20, %v3092_v0  ;;  %v8586_v44 = vcombine.high %v8584_v50, %v8585_v18  ;;  %v8589_v10 = vcombine.high %v8587_v8, %v8588_v39  ;;  %v899_v58 = vld [vmem:[#allocation2 + $0x10] sm:$0xff] }
 0x1cd   :  { %4062 = vmatpush1.bf16.msra.mxu1 %v8583_v23  ;;  %v3004_v1 = vsel %vm8590_vm3, %v3003_v36, %v2999_v12  ;;  %v3008_v51 = vrot.slane %v2835_v40, %v8591_v11  ;;  %v2836_v38 = vunpack.c.l.b16 %v874_v57  ;;  %v7945_v52 = vpack.c.bf16 %v491_v28, %v490_v21  ;;  %v903_v2 = vld [vmem:[#allocation2 + $0x30] sm:$0xff] }
 0x1ce   :  { %3980 = vmatpush1.bf16.msra.mxu0 %v8582_v6  ;;  %v409_v53 = vpop.xlane.xlu1 %408  ;;  %4063 = vmatprep.subr.bf16.mxu1 %v8589_v10  ;;  %v2871_v30 = vunpack.c.h.b16 %v7886_v61  ;;  %v3180_v31 = vrot.slane %v2870_v15, %v8581_v33  ;;  %v2819_v17 = vunpack.c.h.b16 %v7888_v5  ;;  %v2924_v0 = vrot.slane %v2818_v7, %v8581_v33  ;;  %v8594_v7 = vld [vmem:[#allocation21_spill] sm:$0xff] }
 0x1cf   :  { %3981 = vmatprep.subr.bf16.mxu0 %v8586_v44  ;;  %v406_v63 = vpop.xlane.xlu0 %405  ;;  %v2855_v20 = vunpack.c.h.b16 %v7893_v13  ;;  %v3101_v6 = vrot.slane %v2854_v27, %v8581_v33  ;;  %v866_v23 = vpack.c.bf16 %v439_v24, %v438_v56  ;;  %v475_v36 = vmul.f32 0.020408163, %v355_v49  ;;  %v8597_v33 = vld [vmem:[#allocation26_spill] sm:$0xff] }
 0x1d0   :  { %v8592_v40 = vcombine.low %v8584_v50, %v8585_v18  ;;  %v8593_v28 = vcombine.low %v8587_v8, %v8588_v39  ;;  %v2837_v61 = vunpack.c.h.b16 %v874_v57  ;;  %v474_v21 = vmul.f32 0.020408163, %v352_v4 }
 0x1d1   :  { %v457_v15 = vmul.f32 0.020408163, %v301_v29  ;;  %v456_v5 = vmul.f32 0.020408163, %v298_v16  ;;  %v8595_v13 = vcombine.high %v7638_v22, %v8594_v7  ;;  %v8596_v49 = vcombine.high %v7652_v43, %v7654_v59 }
 0x1d2   :  { %3982 = vmatpush1.bf16.msra.mxu0 %v8592_v40  ;;  %4064 = vmatpush1.bf16.msra.mxu1 %v8593_v28  ;;  %v253_v12 = vpop.xlane.xlu1 %252  ;;  %v3013_v27 = vrot.slane %v2836_v38, %v8597_v33  ;;  %v2872_v24 = vunpack.c.l.b16 %v7945_v52  ;;  %v493_v56 = vmul.f32 0.020408163, %v409_v53  ;;  %v492_v50 = vmul.f32 0.020408163, %v406_v63  ;;  %v8603_v38 = vld [vmem:[#allocation27_spill] sm:$0xff] }
 0x1d3   :  { %3983 = vmatprep.subr.bf16.mxu0 %v8595_v13  ;;  %4065 = vmatprep.subr.bf16.mxu1 %v8596_v49  ;;  %v250_v18 = vpop.xlane.xlu0 %249  ;;  %v3009_v4 = vsel %vm1394_vm13, %v3008_v51, %v3004_v1  ;;  %v3181_v29 = vsel %vm8598_vm4, %v3180_v31, %v3176_v41  ;;  %v3185_v57 = vrot.slane %v2871_v30, %v8591_v11  ;;  %v2820_v10 = vunpack.c.l.b16 %v866_v23  ;;  %v7980_v41 = vld [vmem:[#allocation2 + $0x3c8] sm:$0xff] }
 0x1d4   :  { %v2929_v16 = vrot.slane %v2819_v17, %v8591_v11  ;;  %v2925_v44 = vsel %vm8599_vm5, %v2924_v0, %v2920_v45  ;;  %v3102_v8 = vsel %vm8600_vm8, %v3101_v6, %v3097_v54  ;;  %v3106_v39 = vrot.slane %v2855_v20, %v8591_v11  ;;  %v7982_v51 = vld [vmem:[#allocation2 + $0x3e8] sm:$0xff] }
 0x1d5   :  { %v8601_v53 = vcombine.low %v7638_v22, %v8594_v7  ;;  %v8602_v1 = vcombine.low %v7652_v43, %v7654_v59  ;;  %v3018_v63 = vrot.slane %v2837_v61, %v8603_v38  ;;  %v884_v45 = vpack.c.bf16 %v475_v36, %v474_v21 }
 0x1d6   :  { %v875_v30 = vpack.c.bf16 %v457_v15, %v456_v5  ;;  %v361_v54 = vpop.xlane.xlu1 %360  ;;  %v8604_v11 = vcombine.high %v7665_v42, %v7667_v32  ;;  %v8605_v22 = vcombine.high %v7669_v46, %v7679_v62  ;;  %v3014_v59 = vsel %vm1401_vm14, %v3013_v27, %v3009_v4 }
 0x1d7   :  { %3984 = vmatpush1.bf16.msra.mxu0 %v8601_v53  ;;  %4066 = vmatpush1.bf16.msra.mxu1 %v8602_v1  ;;  %v2873_v43 = vunpack.c.h.b16 %v7945_v52  ;;  %v3190_v31 = vrot.slane %v2872_v24, %v8597_v33  ;;  %v7994_v17 = vpack.c.bf16 %v493_v56, %v492_v50  ;;  %v358_v0 = vpop.xlane.xlu0 %357  ;;  %v3186_v20 = vsel %vm1394_vm13, %v3185_v57, %v3181_v29  ;;  %v8608_v24 = vld [vmem:[#allocation22_spill] sm:$0xff] }
 0x1d8   :  { %3985 = vmatprep.subr.bf16.mxu0 %v8604_v11  ;;  %4067 = vmatprep.subr.bf16.mxu1 %v8605_v22  ;;  %v2821_v6 = vunpack.c.h.b16 %v866_v23  ;;  %v5360_v36 = vcombine.low %v7980_v41, %v7982_v51  ;;  %v5361_v40 = vcombine.high %v7980_v41, %v7982_v51  ;;  %v2930_v28 = vsel %vm1394_vm13, %v2929_v16, %v2925_v44 }
 0x1d9   :  { %v2934_v61 = vrot.slane %v2820_v10, %v8597_v33  ;;  %v441_v21 = vmul.f32 0.020408163, %v253_v12  ;;  %v440_v52 = vmul.f32 0.020408163, %v250_v18  ;;  %v8606_v15 = vcombine.low %v7665_v42, %v7667_v32 }
 0x1da   :  { %v8607_v5 = vcombine.low %v7669_v46, %v7679_v62  ;;  %v3107_v23 = vsel %vm1394_vm13, %v3106_v39, %v3102_v8  ;;  %v3019_v7 = vsel %vm1408_vm15, %v3018_v63, %v3014_v59  ;;  %v2856_v13 = vunpack.c.l.b16 %v884_v45  ;;  %v307_v27 = vpop.xlane.xlu1 %306  ;;  %v8613_v63 = vld [vmem:[#allocation28_spill] sm:$0xff]  ;;  %v8614_v59 = vld [vmem:[#allocation23_spill] sm:$0xff] }
 0x1db   :  { %3986 = vmatpush1.bf16.msra.mxu0 %v8606_v15  ;;  %v2838_v49 = vunpack.c.l.b16 %v875_v30  ;;  %v8609_v56 = vcombine.high %v7681_v25, %v8608_v24  ;;  %v8610_v12 = vcombine.high %v7693_v26, %v7695_v47  ;;  %v3191_v32 = vsel %vm1401_vm14, %v3190_v31, %v3186_v20  ;;  %v304_v50 = vpop.xlane.xlu0 %303  ;;  %v8618_v31 = vld [vmem:[#allocation36_spill] sm:$0xff]  ;;  %v8620_v15 = vld [vmem:[#allocation29_spill] sm:$0xff] }
 0x1dc   :  { %4068 = vmatpush1.bf16.msra.mxu1 %v8607_v5  ;;  %v3195_v46 = vrot.slane %v2873_v43, %v8603_v38  ;;  %v2874_v42 = vunpack.c.l.b16 %v7994_v17  ;;  %v459_v62 = vmul.f32 0.020408163, %v307_v27  ;;  %v2939_v18 = vrot.slane %v2821_v6, %v8603_v38  ;;  %v8615_v43 = vld [vmem:[#allocation32_spill] sm:$0xff] }
 0x1dd   :  { %3987 = vmatprep.subr.bf16.mxu0 %v8609_v56  ;;  %4069 = vmatprep.subr.bf16.mxu1 %v8610_v12  ;;  %v477_v4 = vmul.f32 0.020408163, %v361_v54  ;;  %v476_v29 = vmul.f32 0.020408163, %v358_v0  ;;  %v458_v57 = vmul.f32 0.020408163, %v304_v50  ;;  %v2935_v16 = vsel %vm1401_vm14, %v2934_v61, %v2930_v28 }
 0x1de   :  { %v2857_v44 = vunpack.c.h.b16 %v884_v45  ;;  %v2839_v8 = vunpack.c.h.b16 %v875_v30  ;;  %v8022_v39 = vpack.c.bf16 %v441_v21, %v440_v52  ;;  %v8611_v10 = vcombine.low %v7681_v25, %v8608_v24  ;;  %v415_v22 = vpop.xlane.xlu1 %414  ;;  %v8617_v30 = vld [vmem:[#allocation34_spill] sm:$0xff] }
 0x1df   :  { %v8612_v53 = vcombine.low %v7693_v26, %v7695_v47  ;;  %v3111_v1 = vrot.slane %v2856_v13, %v8597_v33  ;;  %v3023_v54 = vrot.slane %v2838_v49, %v8613_v63  ;;  %v876_v11 = vpack.c.bf16 %v459_v62, %v458_v57  ;;  %v412_v33 = vpop.xlane.xlu0 %411 }
 0x1e0   :  { %3988 = vmatpush1.bf16.msra.mxu0 %v8611_v10  ;;  %v8616_v45 = vcombine.high %v8614_v59, %v8615_v43  ;;  %v8619_v0 = vcombine.high %v8617_v30, %v8618_v31  ;;  %v3196_v25 = vsel %vm1408_vm15, %v3195_v46, %v3191_v32  ;;  %v2875_v20 = vunpack.c.h.b16 %v7994_v17 }
 0x1e1   :  { %4070 = vmatpush1.bf16.msra.mxu1 %v8612_v53  ;;  %v3200_v26 = vrot.slane %v2874_v42, %v8613_v63  ;;  %v495_v47 = vmul.f32 0.020408163, %v415_v22  ;;  %v2940_v6 = vsel %vm1408_vm15, %v2939_v18, %v2935_v16  ;;  %v885_v28 = vpack.c.bf16 %v477_v4, %v476_v29  ;;  %v8626_v18 = vld [vmem:[#allocation30_spill] sm:$0xff] }
 0x1e2   :  { %3989 = vmatprep.subr.bf16.mxu0 %v8616_v45  ;;  %4071 = vmatprep.subr.bf16.mxu1 %v8619_v0  ;;  %v2840_v61 = vunpack.c.l.b16 %v876_v11  ;;  %v494_v21 = vmul.f32 0.020408163, %v412_v33  ;;  %v3116_v52 = vrot.slane %v2857_v44, %v8603_v38  ;;  %v3028_v5 = vrot.slane %v2839_v8, %v8620_v15  ;;  %v259_v32 = vpop.xlane.xlu1 %258  ;;  %v8623_v38 = vld [vmem:[#allocation37_spill] sm:$0xff] }
 0x1e3   :  { %v2822_v13 = vunpack.c.l.b16 %v8022_v39  ;;  %v2841_v49 = vunpack.c.h.b16 %v876_v11  ;;  %v8621_v27 = vcombine.low %v8614_v59, %v8615_v43  ;;  %v8622_v17 = vcombine.low %v8617_v30, %v8618_v31  ;;  %v8630_v31 = vld [vmem:[#allocation38_spill] sm:$0xff] }
 0x1e4   :  { %v3112_v24 = vsel %vm1401_vm14, %v3111_v1, %v3107_v23  ;;  %v3024_v56 = vsel %vm1415_vm0, %v3023_v54, %v3019_v7  ;;  %v894_v12 = vpack.c.bf16 %v495_v47, %v494_v21  ;;  %v8624_v46 = vcombine.high %v7751_v35, %v8623_v38  ;;  %v256_v23 = vpop.xlane.xlu0 %255  ;;  %v8627_v1 = vld [vmem:[#allocation31_spill] sm:$0xff] }
 0x1e5   :  { %3990 = vmatpush1.bf16.msra.mxu0 %v8621_v27  ;;  %4072 = vmatpush1.bf16.msra.mxu1 %v8622_v17  ;;  %v8625_v42 = vcombine.high %v7763_v14, %v7765_v55  ;;  %v3201_v62 = vsel %vm1415_vm0, %v3200_v26, %v3196_v25  ;;  %v3205_v50 = vrot.slane %v2875_v20, %v8620_v15  ;;  %v443_v29 = vmul.f32 0.020408163, %v259_v32  ;;  %v8633_v25 = vld [vmem:[#allocation40_spill] sm:$0xff] }
 0x1e6   :  { %3991 = vmatprep.subr.bf16.mxu0 %v8624_v46  ;;  %v3033_v4 = vrot.slane %v2840_v61, %v8626_v18  ;;  %v2858_v57 = vunpack.c.l.b16 %v885_v28  ;;  %v2876_v7 = vunpack.c.l.b16 %v894_v12  ;;  %v2877_v16 = vunpack.c.h.b16 %v894_v12  ;;  %v367_v30 = vpop.xlane.xlu1 %366  ;;  %v8637_v46 = vld [vmem:[#allocation41_spill] sm:$0xff] }
 0x1e7   :  { %4073 = vmatprep.subr.bf16.mxu1 %v8625_v42  ;;  %v442_v44 = vmul.f32 0.020408163, %v256_v23  ;;  %v3029_v8 = vsel %vm1422_vm1, %v3028_v5, %v3024_v56  ;;  %v2823_v10 = vunpack.c.h.b16 %v8022_v39  ;;  %v2944_v53 = vrot.slane %v2822_v13, %v8613_v63  ;;  %v8631_v39 = vld [vmem:[#allocation39_spill] sm:$0xff] }
 0x1e8   :  { %v3038_v54 = vrot.slane %v2841_v49, %v8627_v1  ;;  %v8628_v11 = vcombine.low %v7751_v35, %v8623_v38  ;;  %v8629_v22 = vcombine.low %v7763_v14, %v7765_v55  ;;  %v3210_v59 = vrot.slane %v2876_v7, %v8626_v18  ;;  %v364_v47 = vpop.xlane.xlu0 %363  ;;  %v1026_v13 = vld [vmem:[#allocation2 + $0x408] sm:$0xff] }
 0x1e9   :  { %v3215_v43 = vrot.slane %v2877_v16, %v8627_v1  ;;  %v868_v45 = vpack.c.bf16 %v443_v29, %v442_v44  ;;  %v8632_v0 = vcombine.high %v8630_v31, %v8631_v39  ;;  %v8634_v20 = vcombine.high %v7783_v60, %v8633_v25  ;;  %v1030_v49 = vld [vmem:[#allocation2 + $0x428] sm:$0xff] }
 0x1ea   :  { %3992 = vmatpush1.bf16.msra.mxu0 %v8628_v11  ;;  %4074 = vmatpush1.bf16.msra.mxu1 %v8629_v22  ;;  %v3206_v35 = vsel %vm1422_vm1, %v3205_v50, %v3201_v62  ;;  %v2859_v26 = vunpack.c.h.b16 %v885_v28  ;;  %v3034_v14 = vsel %vm1429_vm2, %v3033_v4, %v3029_v8  ;;  %v479_v55 = vmul.f32 0.020408163, %v367_v30  ;;  %v1027_v62 = vld [vmem:[#allocation2 + $0x410] sm:$0xff] }
 0x1eb   :  { %3993 = vmatprep.subr.bf16.mxu0 %v8632_v0  ;;  %4075 = vmatprep.subr.bf16.mxu1 %v8634_v20  ;;  %v3121_v33 = vrot.slane %v2858_v57, %v8613_v63  ;;  %v3211_v61 = vsel %vm1429_vm2, %v3210_v59, %v3206_v35  ;;  %v2824_v21 = vunpack.c.l.b16 %v868_v45  ;;  %v478_v5 = vmul.f32 0.020408163, %v364_v47  ;;  %v1031_v50 = vld [vmem:[#allocation2 + $0x430] sm:$0xff] }
 0x1ec   :  { %v2945_v27 = vsel %vm1415_vm0, %v2944_v53, %v2940_v6  ;;  %v2949_v17 = vrot.slane %v2823_v10, %v8620_v15  ;;  %v2825_v56 = vunpack.c.h.b16 %v868_v45  ;;  %v8635_v28 = vcombine.low %v8630_v31, %v8631_v39  ;;  %v904_v39 = vld [vmem:[#allocation2 + $0x38] sm:$0xff]  ;;  %v907_v20 = vld [vmem:[#allocation2 + $0x50] sm:$0xff] }
 0x1ed   :  { %v8636_v12 = vcombine.low %v7783_v60, %v8633_v25  ;;  %v3216_v63 = vsel %vm1436_vm12, %v3215_v43, %v3211_v61  ;;  %v2954_v32 = vrot.slane %v2824_v21, %v8626_v18  ;;  %v886_v38 = vpack.c.bf16 %v479_v55, %v478_v5  ;;  %v911_v35 = vld [vmem:[#allocation2 + $0x70] sm:$0xff] }
 0x1ee   :  { %3994 = vmatpush1.bf16.msra.mxu0 %v8635_v28  ;;  %v8638_v42 = vcombine.high %v7801_v34, %v8637_v46  ;;  %v3039_v6 = vsel %vm1436_vm12, %v3038_v54, %v3034_v14  ;;  %v3117_v60 = vsel %vm1408_vm15, %v3116_v52, %v3112_v24  ;;  %v3126_v4 = vrot.slane %v2859_v26, %v8620_v15  ;;  %v908_v26 = vld [vmem:[#allocation2 + $0x58] sm:$0xff]  ;;  %v919_v5 = vld [vmem:[#allocation2 + $0xb0] sm:$0xff] }
 0x1ef   :  { %4076 = vmatpush1.bf16.msra.mxu1 %v8636_v12  ;;  %v3237_v29 = vsel %vm1713_vm6, %v3216_v63, %v3039_v6  ;;  %v5369_v23 = vcombine.high %v1026_v13, %v1030_v49  ;;  %v3122_v57 = vsel %vm1415_vm0, %v3121_v33, %v3117_v60  ;;  %v2860_v7 = vunpack.c.l.b16 %v886_v38  ;;  %v912_v14 = vld [vmem:[#allocation2 + $0x78] sm:$0xff]  ;;  %v915_v33 = vld [vmem:[#allocation2 + $0x90] sm:$0xff] }
 0x1f0   :  { %3995 = vmatprep.subr.bf16.mxu0 %v8638_v42  ;;  %4077 = vmatprep.subr.bf16.mxu1 %v5353_v19  ;;  %v2861_v16 = vunpack.c.h.b16 %v886_v38  ;;  %v8105_v44 = vpack.c.b16 %v3237_v29, %v3237_v29  ;;  %v2950_v8 = vsel %vm1422_vm1, %v2949_v17, %v2945_v27  ;;  %v2959_v19 = vrot.slane %v2825_v56, %v8627_v1  ;;  %v8642_v27 = vld [vmem:[#allocation19_spill] sm:$0xff]  ;;  %v923_v63 = vld [vmem:[#allocation2 + $0xd0] sm:$0xff]  ;;  %v924_v38 = vld [vmem:[#allocation2 + $0xd8] sm:$0xff] }
 0x1f1   :  { %v8639_v10 = vcombine.low %v7801_v34, %v8637_v46  ;;  %v8640_v52 = vcombine.low %v7812_v37, %v7814_v48  ;;  %v5371_v15 = vcombine.high %v1027_v62, %v1031_v50  ;;  %v2955_v24 = vsel %vm1429_vm2, %v2954_v32, %v2950_v8  ;;  %v1034_v37 = vld [vmem:[#allocation2 + $0x448] sm:$0xff]  ;;  %v927_v32 = vld [vmem:[#allocation2 + $0xf0] sm:$0xff]  ;;  %v928_v46 = vld [vmem:[#allocation2 + $0xf8] sm:$0xff] }
 0x1f2   :  { %v3131_v53 = vrot.slane %v2860_v7, %v8626_v18  ;;  %v3136_v54 = vrot.slane %v2861_v16, %v8627_v1  ;;  %3999 = vmatprep.mubr.bf16.mxu0 %v8105_v44  ;;  %4081 = vmatprep.mubr.bf16.mxu1 %v8105_v44  ;;  %v3127_v11 = vsel %vm1422_vm1, %v3126_v4, %v3122_v57  ;;  %v1038_v48 = vld [vmem:[#allocation2 + $0x468] sm:$0xff]  ;;  %v1035_v18 = vld [vmem:[#allocation2 + $0x450] sm:$0xff]  ;;  %v8641_v25 = vmov 0   ;;  %v932_v29 = vld [vmem:[#allocation2 + $0x118] sm:$0xff] }
 0x1f3   :  { %3996 = vmatpush1.bf16.msra.mxu0 %v8639_v10  ;;  %4078 = vmatpush1.bf16.msra.mxu1 %v8640_v52  ;;  %v1039_v1 = vld [vmem:[#allocation2 + $0x470] sm:$0xff]  ;;  %v5368_v59 = vcombine.low %v1026_v13, %v1030_v49  ;;  %v5377_v30 = vcombine.high %v1034_v37, %v1038_v48  ;;  %v5376_v41 = vcombine.low %v1034_v37, %v1038_v48  ;;  %v916_v13 = vld [vmem:[#allocation2 + $0x98] sm:$0xff] }
 0x1f4   :  { %3997 = vmatprep.subr.bf16.mxu0 %v5359_v9  ;;  %4079 = vmatprep.subr.bf16.mxu1 %v5361_v40  ;;  %v3132_v34 = vsel %vm1429_vm2, %v3131_v53, %v3127_v11  ;;  %v2960_v9 = vsel %vm1436_vm12, %v2959_v19, %v2955_v24  ;;  %v5370_v40 = vcombine.low %v1027_v62, %v1031_v50  ;;  %v920_v49 = vld [vmem:[#allocation2 + $0xb8] sm:$0xff]  ;;  %v931_v60 = vld [vmem:[#allocation2 + $0x110] sm:$0xff] }
 0x1f5   :  { %v3137_v22 = vsel %vm1436_vm12, %v3136_v54, %v3132_v34  ;;  %v5379_v31 = vcombine.high %v1035_v18, %v1039_v1  ;;  %v5378_v51 = vcombine.low %v1035_v18, %v1039_v1  ;;  %v5242_v55 = vcombine.low %v899_v58, %v903_v2  ;;  %v935_v4 = vld [vmem:[#allocation2 + $0x130] sm:$0xff]  ;;  %v940_v10 = vld [vmem:[#allocation2 + $0x158] sm:$0xff] }
 0x1f6   :  { %v3236_v43 = vsel %vm1713_vm6, %v3137_v22, %v2960_v9  ;;  %v5251_v61 = vcombine.high %v907_v20, %v911_v35  ;;  %v5253_v21 = vcombine.high %v908_v26, %v912_v14  ;;  %v5250_v17 = vcombine.low %v907_v20, %v911_v35  ;;  %v939_v8 = vld [vmem:[#allocation2 + $0x150] sm:$0xff]  ;;  %v944_v52 = vld [vmem:[#allocation2 + $0x178] sm:$0xff] }
 0x1f7   :  { %3998 = vmatpush1.bf16.msra.mxu0 %v5358_v3  ;;  %4080 = vmatpush1.bf16.msra.mxu1 %v5360_v36  ;;  %v8137_v45 = vpack.c.b16 %v3236_v43, %v3236_v43  ;;  %v900_v3 = vld [vmem:[#allocation2 + $0x18] sm:$0xff]  ;;  %v5243_v36 = vcombine.high %v899_v58, %v903_v2  ;;  %v5252_v56 = vcombine.low %v908_v26, %v912_v14  ;;  %v943_v19 = vld [vmem:[#allocation2 + $0x170] sm:$0xff]  ;;  %vm5072_vm6 = vcmask 74752  }
 0x1f8   :  { %4090 = vmatprep.subr.bf16.mxu0 %v5369_v23  ;;  %4172 = vmatprep.subr.bf16.mxu1 %v5371_v15  ;;  %v5245_v0 = vcombine.high %v900_v3, %v904_v39  ;;  %v5244_v47 = vcombine.low %v900_v3, %v904_v39  ;;  %v5259_v28 = vcombine.high %v915_v33, %v919_v5  ;;  %v936_v23 = vld [vmem:[#allocation2 + $0x138] sm:$0xff]  ;;  %v947_v11 = vld [vmem:[#allocation2 + $0x190] sm:$0xff] }
 0x1f9   :  { %v5261_v12 = vcombine.high %v916_v13, %v920_v49  ;;  %v5258_v42 = vcombine.low %v915_v33, %v919_v5  ;;  %v5260_v6 = vcombine.low %v916_v13, %v920_v49  ;;  %v5267_v62 = vcombine.high %v923_v63, %v927_v32  ;;  %v951_v37 = vld [vmem:[#allocation2 + $0x1b0] sm:$0xff]  ;;  %v948_v34 = vld [vmem:[#allocation2 + $0x198] sm:$0xff] }
 0x1fa   :  { %4000 = vmatmul.mubr.bf16.vlgmr.msra.gmra.mrb[16].mxu0 %v8137_v45  ;;  %4082 = vmatmul.mubr.bf16.vlgmr.msra.gmra.mrb[20].mxu1 %v8137_v45  ;;  %v5269_v50 = vcombine.high %v924_v38, %v928_v46  ;;  %v5266_v57 = vcombine.low %v923_v63, %v927_v32  ;;  %v5268_v7 = vcombine.low %v924_v38, %v928_v46  ;;  %v952_v48 = vld [vmem:[#allocation2 + $0x1b8] sm:$0xff]  ;;  %v963_v39 = vld [vmem:[#allocation2 + $0x210] sm:$0xff] }
 0x1fb   :  { %4091 = vmatpush1.bf16.msra.mxu0 %v5368_v59  ;;  %4173 = vmatpush1.bf16.msra.mxu1 %v5370_v40  ;;  %v5275_v16 = vcombine.high %v931_v60, %v935_v4  ;;  %v5274_v15 = vcombine.low %v931_v60, %v935_v4  ;;  %v5276_v24 = vcombine.low %v932_v29, %v936_v23  ;;  %v955_v59 = vld [vmem:[#allocation2 + $0x1d0] sm:$0xff]  ;;  %v956_v43 = vld [vmem:[#allocation2 + $0x1d8] sm:$0xff] }
 0x1fc   :  { %4092 = vmatprep.subr.bf16.mxu0 %v5377_v30  ;;  %4174 = vmatprep.subr.bf16.mxu1 %v5379_v31  ;;  %v5283_v53 = vcombine.high %v939_v8, %v943_v19  ;;  %v5285_v54 = vcombine.high %v940_v10, %v944_v52  ;;  %v5282_v18 = vcombine.low %v939_v8, %v943_v19  ;;  %v959_v40 = vld [vmem:[#allocation2 + $0x1f0] sm:$0xff]  ;;  %v960_v30 = vld [vmem:[#allocation2 + $0x1f8] sm:$0xff] }
 0x1fd   :  { %4122 = vmatprep.mubr.bf16.mxu0 %v8641_v25  ;;  %4204 = vmatprep.mubr.bf16.mxu1 %v8641_v25  ;;  %v5284_v1 = vcombine.low %v940_v10, %v944_v52  ;;  %v5291_v9 = vcombine.high %v947_v11, %v951_v37  ;;  %v5293_v22 = vcombine.high %v948_v34, %v952_v48  ;;  %v971_v14 = vld [vmem:[#allocation2 + $0x250] sm:$0xff]  ;;  %v976_v33 = vld [vmem:[#allocation2 + $0x278] sm:$0xff] }
 0x1fe   :  { %v5290_v31 = vcombine.low %v947_v11, %v951_v37  ;;  %v5292_v58 = vcombine.low %v948_v34, %v952_v48  ;;  %v5299_v2 = vcombine.high %v955_v59, %v959_v40  ;;  %v5301_v3 = vcombine.high %v956_v43, %v960_v30  ;;  %v979_v49 = vld [vmem:[#allocation2 + $0x290] sm:$0xff] }
 0x1ff   :  { %4093 = vmatpush1.bf16.msra.mxu0 %v5376_v41  ;;  %4175 = vmatpush1.bf16.msra.mxu1 %v5378_v51  ;;  %v967_v41 = vld [vmem:[#allocation2 + $0x230] sm:$0xff]  ;;  %v964_v51 = vld [vmem:[#allocation2 + $0x218] sm:$0xff]  ;;  %v5300_v20 = vcombine.low %v956_v43, %v960_v30 }
 0x200   :  { %4131 = vmatprep.subr.bf16.mxu0 %v5243_v36  ;;  %4213 = vmatprep.subr.bf16.mxu1 %v5245_v0  ;;  %v968_v36 = vld [vmem:[#allocation2 + $0x238] sm:$0xff]  ;;  %v5298_v0 = vcombine.low %v955_v59, %v959_v40  ;;  %v5307_v35 = vcombine.high %v963_v39, %v967_v41  ;;  %v987_v46 = vld [vmem:[#allocation2 + $0x2d0] sm:$0xff] }
 0x201   :  { %v5309_v26 = vcombine.high %v964_v51, %v968_v36  ;;  %v1003_v52 = vld [vmem:[#allocation2 + $0x350] sm:$0xff] }
 0x202   :  { %5383 = vmatmul.mubr.msk.bf16.vlgmr.msra.gmra.mrb[20].mxu0 %vm2442_vm7, %v8642_v27  ;;  %5384 = vmatmul.mubr.msk.bf16.vlgmr.msra.gmra.mrb[24].mxu1 %vm2442_vm7, %v8642_v27  ;;  %v1011_v48 = vld [vmem:[#allocation2 + $0x390] sm:$0xff] }
 0x203   :  { %4132 = vmatpush1.bf16.msra.mxu0 %v5242_v55  ;;  %4214 = vmatpush1.bf16.msra.mxu1 %v5244_v47  ;;  %v975_v55 = vld [vmem:[#allocation2 + $0x270] sm:$0xff]  ;;  %v972_v47 = vld [vmem:[#allocation2 + $0x258] sm:$0xff] }
 0x204   :  { %4163 = vmatprep.mubr.bf16.mxu0 %v8105_v44  ;;  %4245 = vmatprep.mubr.bf16.mxu1 %v8105_v44  ;;  %v5277_v44 = vcombine.high %v932_v29, %v936_v23  ;;  %v5315_v5 = vcombine.high %v971_v14, %v975_v55  ;;  %v5317_v13 = vcombine.high %v972_v47, %v976_v33  ;;  %v995_v23 = vld [vmem:[#allocation2 + $0x310] sm:$0xff] }
 0x205   :  { %4133 = vmatprep.subr.bf16.mxu0 %v5251_v61  ;;  %4215 = vmatprep.subr.bf16.mxu1 %v5253_v21  ;;  %v5306_v61 = vcombine.low %v963_v39, %v967_v41  ;;  %v5308_v21 = vcombine.low %v964_v51, %v968_v36  ;;  %v5316_v63 = vcombine.low %v972_v47, %v976_v33  ;;  %v1019_v30 = vld [vmem:[#allocation2 + $0x3d0] sm:$0xff]  ;;  %v1028_v36 = vld [vmem:[#allocation2 + $0x418] sm:$0xff]  ;;  %v5550_v47 = vld [vmem:[%s8421_s4 + $0xc0] sm:$0xff]  }
 0x206   :  { %v8643_v33 = vld [vmem:[#allocation33_spill] sm:$0xff] }
 0x207   :  { %4134 = vmatpush1.bf16.msra.mxu0 %v5250_v17  ;;  %4216 = vmatpush1.bf16.msra.mxu1 %v5252_v56  ;;  %v983_v17 = vld [vmem:[#allocation2 + $0x2b0] sm:$0xff]  ;;  %v980_v56 = vld [vmem:[#allocation2 + $0x298] sm:$0xff] }
 0x208   :  { %4135 = vmatprep.subr.bf16.mxu0 %v5259_v28  ;;  %4217 = vmatprep.subr.bf16.mxu1 %v5261_v12  ;;  %v984_v28 = vld [vmem:[#allocation2 + $0x2b8] sm:$0xff]  ;;  %v5314_v12 = vcombine.low %v971_v14, %v975_v55  ;;  %v5323_v32 = vcombine.high %v979_v49, %v983_v17 }
 0x209   :  { %v5325_v38 = vcombine.high %v980_v56, %v984_v28  ;;  %v5324_v60 = vcombine.low %v980_v56, %v984_v28 }
 0x20b   :  { %4136 = vmatpush1.bf16.msra.mxu0 %v5258_v42  ;;  %4218 = vmatpush1.bf16.msra.mxu1 %v5260_v6  ;;  %v991_v42 = vld [vmem:[#allocation2 + $0x2f0] sm:$0xff]  ;;  %v988_v6 = vld [vmem:[#allocation2 + $0x2d8] sm:$0xff] }
 0x20c   :  { %4137 = vmatprep.subr.bf16.mxu0 %v5267_v62  ;;  %4219 = vmatprep.subr.bf16.mxu1 %v5269_v50  ;;  %v992_v62 = vld [vmem:[#allocation2 + $0x2f8] sm:$0xff]  ;;  %v5322_v50 = vcombine.low %v979_v49, %v983_v17  ;;  %v5331_v4 = vcombine.high %v987_v46, %v991_v42  ;;  %v8644_v17 = vld [vmem:[#allocation35_spill] sm:$0xff] }
 0x20d   :  { %v5333_v29 = vcombine.high %v988_v6, %v992_v62  ;;  %v5332_v8 = vcombine.low %v988_v6, %v992_v62  ;;  %v1040_v49 = vld [vmem:[#allocation2 + $0x478] sm:$0xff]  ;;  %v5554_v6 = vld [vmem:[%s8421_s4 + $0xc8] sm:$0xff]  }
 0x20f   :  { %4138 = vmatpush1.bf16.msra.mxu0 %v5266_v57  ;;  %4220 = vmatpush1.bf16.msra.mxu1 %v5268_v7  ;;  %v999_v57 = vld [vmem:[#allocation2 + $0x330] sm:$0xff]  ;;  %v996_v7 = vld [vmem:[#allocation2 + $0x318] sm:$0xff] }
 0x210   :  { %4139 = vmatprep.subr.bf16.mxu0 %v5275_v16  ;;  %4221 = vmatprep.subr.bf16.mxu1 %v5277_v44  ;;  %v1000_v16 = vld [vmem:[#allocation2 + $0x338] sm:$0xff]  ;;  %v5330_v44 = vcombine.low %v987_v46, %v991_v42  ;;  %v5339_v19 = vcombine.high %v995_v23, %v999_v57  ;;  %v5551_v42 = vld [vmem:[%s8421_s4 + $0x80] sm:$0xff]  }
 0x211   :  { %v5341_v10 = vcombine.high %v996_v7, %v1000_v16  ;;  %v5340_v11 = vcombine.low %v996_v7, %v1000_v16 }
 0x213   :  { %4140 = vmatpush1.bf16.msra.mxu0 %v5274_v15  ;;  %4222 = vmatpush1.bf16.msra.mxu1 %v5276_v24  ;;  %v1007_v15 = vld [vmem:[#allocation2 + $0x370] sm:$0xff]  ;;  %v1004_v24 = vld [vmem:[#allocation2 + $0x358] sm:$0xff] }
 0x214   :  { %4141 = vmatprep.subr.bf16.mxu0 %v5283_v53  ;;  %4223 = vmatprep.subr.bf16.mxu1 %v5285_v54  ;;  %v1008_v53 = vld [vmem:[#allocation2 + $0x378] sm:$0xff]  ;;  %v5338_v54 = vcombine.low %v995_v23, %v999_v57  ;;  %v5347_v37 = vcombine.high %v1003_v52, %v1007_v15 }
 0x215   :  { %v5349_v34 = vcombine.high %v1004_v24, %v1008_v53  ;;  %v5348_v59 = vcombine.low %v1004_v24, %v1008_v53  ;;  %v5553_v24 = vld [vmem:[%s8421_s4 + $0x10] sm:$0xff]  }
 0x216   :  { %v5558_v53 = vld [vmem:[%s8421_s4 + $0xd0] sm:$0xff]  }
 0x217   :  { %4142 = vmatpush1.bf16.msra.mxu0 %v5282_v18  ;;  %4224 = vmatpush1.bf16.msra.mxu1 %v5284_v1  ;;  %v1015_v18 = vld [vmem:[#allocation2 + $0x3b0] sm:$0xff]  ;;  %v1012_v1 = vld [vmem:[#allocation2 + $0x398] sm:$0xff] }
 0x218   :  { %4143 = vmatprep.subr.bf16.mxu0 %v5291_v9  ;;  %4225 = vmatprep.subr.bf16.mxu1 %v5293_v22  ;;  %v1016_v9 = vld [vmem:[#allocation2 + $0x3b8] sm:$0xff]  ;;  %v5346_v22 = vcombine.low %v1003_v52, %v1007_v15  ;;  %v5355_v40 = vcombine.high %v1011_v48, %v1015_v18  ;;  %v5552_v52 = vld [vmem:[%s8421_s4 + $0x50] sm:$0xff]   ;;  %v5555_v15 = vld [vmem:[%s8421_s4 + $0x88] sm:$0xff]  }
 0x219   :  { %v5357_v43 = vcombine.high %v1012_v1, %v1016_v9  ;;  %v5356_v39 = vcombine.low %v1012_v1, %v1016_v9  ;;  %v5564_v1 = vld [vmem:[%s8421_s4 + $0x68] sm:$0xff]   ;;  %v5566_v9 = vld [vmem:[%s8421_s4 + $0xe0] sm:$0xff]  }
 0x21b   :  { %4144 = vmatpush1.bf16.msra.mxu0 %v5290_v31  ;;  %4226 = vmatpush1.bf16.msra.mxu1 %v5292_v58  ;;  %v1023_v31 = vld [vmem:[#allocation2 + $0x3f0] sm:$0xff]  ;;  %v1020_v58 = vld [vmem:[#allocation2 + $0x3d8] sm:$0xff] }
 0x21c   :  { %4145 = vmatprep.subr.bf16.mxu0 %v5299_v2  ;;  %4227 = vmatprep.subr.bf16.mxu1 %v5301_v3  ;;  %v1024_v2 = vld [vmem:[#allocation2 + $0x3f8] sm:$0xff]  ;;  %v5354_v3 = vcombine.low %v1011_v48, %v1015_v18  ;;  %v5363_v41 = vcombine.high %v1019_v30, %v1023_v31  ;;  %v5561_v18 = vld [vmem:[%s8421_s4 + $0x20] sm:$0xff]  }
 0x21d   :  { %v5365_v51 = vcombine.high %v1020_v58, %v1024_v2  ;;  %v5563_v48 = vld [vmem:[%s8421_s4 + $0x98] sm:$0xff]  }
 0x21f   :  { %4146 = vmatpush1.bf16.msra.mxu0 %v5298_v0  ;;  %4228 = vmatpush1.bf16.msra.mxu1 %v5300_v20  ;;  %v1032_v0 = vld [vmem:[#allocation2 + $0x438] sm:$0xff]  ;;  %v5362_v20 = vcombine.low %v1019_v30, %v1023_v31  ;;  %v5571_v30 = vld [vmem:[%s8421_s4 + $0xa8] sm:$0xff]   ;;  %v5569_v31 = vld [vmem:[%s8421_s4 + $0x30] sm:$0xff]  }
 0x220   :  { %4147 = vmatprep.subr.bf16.mxu0 %v5307_v35  ;;  %4229 = vmatprep.subr.bf16.mxu1 %v5309_v26  ;;  %v5364_v35 = vcombine.low %v1020_v58, %v1024_v2  ;;  %v5373_v55 = vcombine.high %v1028_v36, %v1032_v0  ;;  %v5572_v58 = vld [vmem:[%s8421_s4 + $0x78] sm:$0xff]   ;;  %v5574_v2 = vld [vmem:[%s8421_s4 + $0xf0] sm:$0xff]  }
 0x223   :  { %4148 = vmatpush1.bf16.msra.mxu0 %v5306_v61  ;;  %4230 = vmatpush1.bf16.msra.mxu1 %v5308_v21 }
 0x224   :  { %4149 = vmatprep.subr.bf16.mxu0 %v5315_v5  ;;  %4231 = vmatprep.subr.bf16.mxu1 %v5317_v13  ;;  %v1036_v13 = vld [vmem:[#allocation2 + $0x458] sm:$0xff] }
 0x225   :  { %v5381_v46 = vcombine.high %v1036_v13, %v1040_v49  ;;  %v5380_v62 = vcombine.low %v1036_v13, %v1040_v49 }
 0x227   :  { %4150 = vmatpush1.bf16.msra.mxu0 %v5314_v12  ;;  %4232 = vmatpush1.bf16.msra.mxu1 %v5316_v63 }
 0x228   :  { %4151 = vmatprep.subr.bf16.mxu0 %v5323_v32  ;;  %4233 = vmatprep.subr.bf16.mxu1 %v5325_v38  ;;  %v5372_v38 = vcombine.low %v1028_v36, %v1032_v0  ;;  %v5578_v36 = vld [vmem:[%s8421_s4 + $0x140] sm:$0xff]  }
 0x229   :  { %v5582_v0 = vld [vmem:[%s8421_s4 + $0x1c0] sm:$0xff]  }
 0x22b   :  { %4152 = vmatpush1.bf16.msra.mxu0 %v5322_v50  ;;  %4234 = vmatpush1.bf16.msra.mxu1 %v5324_v60 }
 0x22c   :  { %4153 = vmatprep.subr.bf16.mxu0 %v5331_v4  ;;  %4235 = vmatprep.subr.bf16.mxu1 %v5333_v29  ;;  %v5546_v4 = vld [vmem:[%s8421_s4 + $0x40] sm:$0xff]  }
 0x22f   :  { %4154 = vmatpush1.bf16.msra.mxu0 %v5330_v44  ;;  %4236 = vmatpush1.bf16.msra.mxu1 %v5332_v8  ;;  %v5547_v8 = vld [vmem:[%s8421_s4] sm:$0xff]  }
 0x230   :  { %4155 = vmatprep.subr.bf16.mxu0 %v5339_v19  ;;  %4237 = vmatprep.subr.bf16.mxu1 %v5341_v10  ;;  %v5548_v19 = vld [vmem:[%s8421_s4 + $0x48] sm:$0xff]  }
 0x231   :  { %v5549_v10 = vld [vmem:[%s8421_s4 + $0x8] sm:$0xff]  }
 0x233   :  { %4156 = vmatpush1.bf16.msra.mxu0 %v5338_v54  ;;  %4238 = vmatpush1.bf16.msra.mxu1 %v5340_v11  ;;  %v5559_v54 = vld [vmem:[%s8421_s4 + $0x90] sm:$0xff]   ;;  %v5557_v11 = vld [vmem:[%s8421_s4 + $0x18] sm:$0xff]  }
 0x234   :  { %4157 = vmatprep.subr.bf16.mxu0 %v5347_v37  ;;  %4239 = vmatprep.subr.bf16.mxu1 %v5349_v34  ;;  %v5560_v37 = vld [vmem:[%s8421_s4 + $0x60] sm:$0xff]   ;;  %v5562_v34 = vld [vmem:[%s8421_s4 + $0xd8] sm:$0xff]  }
 0x237   :  { %4158 = vmatpush1.bf16.msra.mxu0 %v5346_v22  ;;  %4240 = vmatpush1.bf16.msra.mxu1 %v5348_v59  ;;  %v2480_v26 = vpop.f32.mrb[0].mxu0  ;;  %v2562_v14 = vpop.f32.mrb[4].mxu1  ;;  %v5567_v22 = vld [vmem:[%s8421_s4 + $0xa0] sm:$0xff]   ;;  %v5565_v59 = vld [vmem:[%s8421_s4 + $0x28] sm:$0xff]  }
 0x238   :  { %4159 = vmatprep.subr.bf16.mxu0 %v5355_v40  ;;  %4241 = vmatprep.subr.bf16.mxu1 %v5357_v43  ;;  %v8153_v61 = vadd.f32 %v8643_v33, %v2480_v26  ;;  %v2482_v21 = vpop.f32.mrb[1].mxu0  ;;  %v2564_v5 = vpop.f32.mrb[5].mxu1  ;;  %v5568_v40 = vld [vmem:[%s8421_s4 + $0x70] sm:$0xff]   ;;  %v5570_v43 = vld [vmem:[%s8421_s4 + $0xe8] sm:$0xff]  }
 0x239   :  { %v8156_v56 = vadd.f32 %v8644_v17, %v2482_v21  ;;  %v2484_v28 = vpop.f32.mrb[2].mxu0  ;;  %v2566_v12 = vpop.f32.mrb[6].mxu1 }
 0x23a   :  { %v2485_v63 = vpop.f32.mrb[3].mxu0  ;;  %v2567_v32 = vpop.f32.mrb[7].mxu1 }
 0x23b   :  { %4160 = vmatpush1.bf16.msra.mxu0 %v5354_v3  ;;  %4242 = vmatpush1.bf16.msra.mxu1 %v5356_v39  ;;  %v5575_v3 = vld [vmem:[%s8421_s4 + $0xb0] sm:$0xff]   ;;  %v5573_v39 = vld [vmem:[%s8421_s4 + $0x38] sm:$0xff]  }
 0x23c   :  { %4161 = vmatprep.subr.bf16.mxu0 %v5363_v41  ;;  %4243 = vmatprep.subr.bf16.mxu1 %v5365_v51  ;;  %v5576_v41 = vld [vmem:[%s8421_s4 + $0xf8] sm:$0xff]  }
 0x23d   :  { %v5577_v51 = vld [vmem:[%s8421_s4 + $0xb8] sm:$0xff]  }
 0x23f   :  { %4162 = vmatpush1.bf16.msra.mxu0 %v5362_v20  ;;  %4244 = vmatpush1.bf16.msra.mxu1 %v5364_v35  ;;  %v2603_v50 = vpop.f32.mrb[4].mxu0  ;;  %v8167_v60 = vpop.f32.mrb[8].mxu1 }
 0x240   :  { %4254 = vmatprep.subr.bf16.mxu0 %v5373_v55  ;;  %5473 = vmatprep.subr.bf16.mxu1 %v5550_v47  ;;  %v8172_v29 = vadd.f32 %v2603_v50, %v2562_v14  ;;  %v2605_v23 = vpop.f32.mrb[5].mxu0  ;;  %v8174_v57 = vpop.f32.mrb[9].mxu1 }
 0x241   :  { %v2607_v7 = vpop.f32.mrb[6].mxu0  ;;  %v2689_v16 = vpop.f32.mrb[10].mxu1 }
 0x242   :  { %4164 = vmatmul.mubr.bf16.vlgmr.msra.gmra.mrb[24].mxu0 %v8137_v45  ;;  %4246 = vmatmul.mubr.bf16.vlgmr.msra.gmra.mrb[28].mxu1 %v8137_v45  ;;  %v8176_v45 = vadd.f32 %v2605_v23, %v2564_v5  ;;  %v2690_v44 = vpop.f32.mrb[11].mxu1 }
 0x243   :  { %4255 = vmatpush1.bf16.msra.mxu0 %v5372_v38  ;;  %4286 = vmatprep.mubr.bf16.mxu0 %v8641_v25  ;;  %v2608_v25 = vpop.f32.mrb[7].mxu0 }
 0x244   :  { %4256 = vmatprep.subr.bf16.mxu0 %v5381_v46  ;;  %5474 = vmatpush3.bf16.msra.mxu1 %v5551_v42 }
 0x245   :  { %5475 = vmatprep.subr.bf16.mxu1 %v5554_v6 }
 0x247   :  { %4257 = vmatpush1.bf16.msra.mxu0 %v5380_v62  ;;  %v8645_v62 = vld [vmem:[#allocation12_spill] sm:$0xff] }
 0x248   :  { %5451 = vmatprep.subr.bf16.mxu0 %v5546_v4  ;;  %5476 = vmatpush3.bf16.msra.mxu1 %v5555_v15  ;;  %v4299_v50 = vsub.s32 0, %v8645_v62  ;;  %v4303_v4 = vsub.s32 1, %v8645_v62 }
 0x249   :  { %5477 = vmatprep.subr.bf16.mxu1 %v5558_v53 }
 0x24a   :  { %5385 = vmatmul.mubr.msk.bf16.vlgmr.msra.gmra.mrb[28].mxu0 %vm2442_vm7, %v8642_v27  ;;  %v5556_v27 = vld [vmem:[%s8421_s4 + $0x58] sm:$0xff]  }
 0x24b   :  { %5452 = vmatpush3.bf16.msra.mxu0 %v5547_v8 }
 0x24c   :  { %5453 = vmatprep.subr.bf16.mxu0 %v5548_v19  ;;  %5478 = vmatpush3.bf16.msra.mxu1 %v5559_v54 }
 0x24d   :  { %5479 = vmatprep.subr.bf16.mxu1 %v5562_v34 }
 0x24f   :  { %5454 = vmatpush3.bf16.msra.mxu0 %v5549_v10 }
 0x250   :  { %5455 = vmatprep.subr.bf16.mxu0 %v5552_v52  ;;  %5480 = vmatpush3.bf16.msra.mxu1 %v5563_v48 }
 0x251   :  { %5481 = vmatprep.subr.bf16.mxu1 %v5566_v9 }
 0x253   :  { %5456 = vmatpush3.bf16.msra.mxu0 %v5553_v24 }
 0x254   :  { %5457 = vmatprep.subr.bf16.mxu0 %v5556_v27  ;;  %5482 = vmatpush3.bf16.msra.mxu1 %v5567_v22 }
 0x255   :  { %5483 = vmatprep.subr.bf16.mxu1 %v5570_v43 }
 0x257   :  { %5458 = vmatpush3.bf16.msra.mxu0 %v5557_v11  ;;  %v4307_v11 = vsub.s32 2, %v8645_v62 }
 0x258   :  { %5459 = vmatprep.subr.bf16.mxu0 %v5560_v37  ;;  %5484 = vmatpush3.bf16.msra.mxu1 %v5571_v30  ;;  %v4311_v37 = vsub.s32 3, %v8645_v62 }
 0x259   :  { %5485 = vmatprep.subr.bf16.mxu1 %v5574_v2 }
 0x25b   :  { %5460 = vmatpush3.bf16.msra.mxu0 %v5561_v18 }
 0x25c   :  { %5461 = vmatprep.subr.bf16.mxu0 %v5564_v1  ;;  %5486 = vmatpush3.bf16.msra.mxu1 %v5575_v3 }
 0x25d   :  { %5487 = vmatprep.subr.bf16.mxu1 %v5576_v41 }
 0x25f   :  { %5462 = vmatpush3.bf16.msra.mxu0 %v5565_v59 }
 0x260   :  { %5463 = vmatprep.subr.bf16.mxu0 %v5568_v40  ;;  %5488 = vmatpush3.bf16.msra.mxu1 %v5577_v51 }
 0x261   :  { %5517 = vmatprep.subr.bf16.mxu1 %v5582_v0 }
 0x263   :  { %5464 = vmatpush3.bf16.msra.mxu0 %v5569_v31 }
 0x264   :  { %5465 = vmatprep.subr.bf16.mxu0 %v5572_v58 }
 0x267   :  { %5466 = vmatpush3.bf16.msra.mxu0 %v5573_v39 }
 0x268   :  { %5495 = vmatprep.subr.bf16.mxu0 %v5578_v36 }
 0x27f   :  { %v2644_v20 = vpop.f32.mrb[8].mxu0  ;;  %v2726_v35 = vpop.f32.mrb[12].mxu1 }
 0x280   :  { %v8271_v26 = vadd.f32 %v8167_v60, %v2644_v20  ;;  %v2646_v14 = vpop.f32.mrb[9].mxu0  ;;  %v2728_v55 = vpop.f32.mrb[13].mxu1  ;;  %v8281_v60 = vld [vmem:[#allocation7] sm:$0xff] }
 0x281   :  { %v8274_v47 = vadd.f32 %v8174_v57, %v2646_v14  ;;  %v2648_v33 = vpop.f32.mrb[10].mxu0  ;;  %v2730_v21 = vpop.f32.mrb[14].mxu1  ;;  %v4300_v16 = vrot.slane %v8281_v60, %v4299_v50  ;;  %v4304_v10 = vrot.slane %v8281_v60, %v4303_v4  ;;  %v4308_v18 = vrot.slane %v8281_v60, %v4307_v11  ;;  %v5596_v11 = vld [vmem:[%s8421_s4 + $0x168] sm:$0xff]  }
 0x282   :  { %v2649_v5 = vpop.f32.mrb[11].mxu0  ;;  %v2731_v13 = vpop.f32.mrb[15].mxu1 }
 0x287   :  { %v2767_v49 = vpop.f32.mrb[12].mxu0  ;;  %v4042_v17 = vpop.f32.mrb[16].mxu1 }
 0x288   :  { %v8276_v28 = vadd.f32 %v2767_v49, %v2726_v35  ;;  %v2769_v12 = vpop.f32.mrb[13].mxu0  ;;  %v4044_v63 = vpop.f32.mrb[17].mxu1 }
 0x289   :  { %v8278_v32 = vadd.f32 %v2769_v12, %v2728_v55  ;;  %v2771_v38 = vpop.f32.mrb[14].mxu0  ;;  %v4046_v46 = vpop.f32.mrb[18].mxu1 }
 0x28a   :  { %v2772_v42 = vpop.f32.mrb[15].mxu0  ;;  %v4047_v6 = vpop.f32.mrb[19].mxu1 }
 0x28b   :  { %v5580_v42 = vld [vmem:[%s8421_s4 + $0x148] sm:$0xff]  }
 0x2cd   :  { %v4001_v23 = vpop.f32.mrb[16].mxu0  ;;  %v4083_v57 = vpop.f32.mrb[20].mxu1 }
 0x2ce   :  { %v4002_v7 = vadd.f32 %v4001_v23, %v8153_v61  ;;  %v4084_v25 = vadd.f32 %v4083_v57, %v8172_v29  ;;  %v4003_v44 = vpop.f32.mrb[17].mxu0  ;;  %v4085_v8 = vpop.f32.mrb[21].mxu1  ;;  %v5581_v23 = vld [vmem:[%s8421_s4 + $0x108] sm:$0xff]   ;;  %v5584_v57 = vld [vmem:[%s8421_s4 + $0x150] sm:$0xff]  }
 0x2cf   :  { %v4004_v19 = vadd.f32 %v4003_v44, %v8156_v56  ;;  %v4086_v52 = vadd.f32 %v4085_v8, %v8176_v45  ;;  %v4005_v15 = vpop.f32.mrb[18].mxu0  ;;  %v4087_v24 = vpop.f32.mrb[22].mxu1  ;;  %v4312_v45 = vrot.slane %v8281_v60, %v4311_v37  ;;  %v5586_v44 = vld [vmem:[%s8421_s4 + $0x1c8] sm:$0xff]   ;;  %v5585_v8 = vld [vmem:[%s8421_s4 + $0x110] sm:$0xff]   ;;  %v5598_v37 = vld [vmem:[%s8421_s4 + $0x1e0] sm:$0xff]  }
 0x2d0   :  { %v4043_v27 = vadd.f32 %v4042_v17, %v4002_v7  ;;  %v4006_v53 = vpop.f32.mrb[19].mxu0  ;;  %v4088_v54 = vpop.f32.mrb[23].mxu1  ;;  %v5589_v15 = vld [vmem:[%s8421_s4 + $0x118] sm:$0xff]   ;;  %v5592_v24 = vld [vmem:[%s8421_s4 + $0x160] sm:$0xff]  }
 0x2d1   :  { %v4045_v61 = vadd.f32 %v4044_v63, %v4004_v19  ;;  %v5579_v63 = vld [vmem:[%s8421_s4 + $0x100] sm:$0xff]   ;;  %v5588_v19 = vld [vmem:[%s8421_s4 + $0x158] sm:$0xff]  }
 0x2d2   :  { %v4337_v34 = vadd.f32 %v4300_v16, %v4043_v27  ;;  %v5583_v16 = vld [vmem:[%s8421_s4 + $0x180] sm:$0xff]   ;;  %v5591_v27 = vld [vmem:[%s8421_s4 + $0x190] sm:$0xff]   ;;  %v5594_v53 = vld [vmem:[%s8421_s4 + $0x1d8] sm:$0xff]  }
 0x2d3   :  { %v4338_v29 = vadd.f32 %v4304_v10, %v4045_v61  ;;  %v5587_v10 = vld [vmem:[%s8421_s4 + $0x188] sm:$0xff]   ;;  %v5593_v54 = vld [vmem:[%s8421_s4 + $0x120] sm:$0xff]   ;;  %v5595_v61 = vld [vmem:[%s8421_s4 + $0x198] sm:$0xff]  }
 0x2d4   :  { %v4345_v48 = vadd.f32 3.0, %v4337_v34 }
 0x2d5   :  { %v4346_v56 = vadd.f32 3.0, %v4338_v29  ;;  %v4124_v1 = vpop.f32.mrb[20].mxu0  ;;  %v8293_v9 = vpop.f32.mrb[24].mxu1 }
 0x2d6   :  { %v4353_v22 = vmax.f32 %v4345_v48, 0.0  ;;  %v4125_v59 = vadd.f32 %v4124_v1, %v4084_v25  ;;  %v4126_v40 = vpop.f32.mrb[21].mxu0  ;;  %v8296_v43 = vpop.f32.mrb[25].mxu1  ;;  %v5599_v48 = vld [vmem:[%s8421_s4 + $0x1a0] sm:$0xff]   ;;  %v5604_v1 = vld [vmem:[%s8421_s4 + $0x178] sm:$0xff]  }
 0x2d7   :  { %v4354_v30 = vmax.f32 %v4346_v56, 0.0  ;;  %v4127_v31 = vadd.f32 %v4126_v40, %v4086_v52  ;;  %v4128_v58 = vpop.f32.mrb[22].mxu0  ;;  %v4210_v2 = vpop.f32.mrb[26].mxu1  ;;  %v5590_v52 = vld [vmem:[%s8421_s4 + $0x1d0] sm:$0xff]  }
 0x2d8   :  { %v4361_v3 = vmin.f32 %v4353_v22, 6.0  ;;  %v4339_v39 = vadd.f32 %v4308_v18, %v4125_v59  ;;  %v4129_v41 = vpop.f32.mrb[23].mxu0  ;;  %v4211_v51 = vpop.f32.mrb[27].mxu1  ;;  %v5602_v18 = vld [vmem:[%s8421_s4 + $0x1e8] sm:$0xff]   ;;  %v5601_v56 = vld [vmem:[%s8421_s4 + $0x130] sm:$0xff]   ;;  %v5605_v59 = vld [vmem:[%s8421_s4 + $0x138] sm:$0xff]  }
 0x2d9   :  { %v4340_v36 = vadd.f32 %v4312_v45, %v4127_v31  ;;  %v4362_v0 = vmin.f32 %v4354_v30, 6.0  ;;  %v5603_v45 = vld [vmem:[%s8421_s4 + $0x1a8] sm:$0xff]   ;;  %v5606_v22 = vld [vmem:[%s8421_s4 + $0x1f0] sm:$0xff]   ;;  %v5608_v30 = vld [vmem:[%s8421_s4 + $0x1f8] sm:$0xff]   ;;  %v4315_v58 = vsub.s32 4, %v8645_v62  ;;  %v4319_v2 = vsub.s32 5, %v8645_v62 }
 0x2da   :  { %v4369_v20 = vmul.f32 %v4361_v3, %v4337_v34  ;;  %v4347_v35 = vadd.f32 3.0, %v4339_v39  ;;  %v5597_v34 = vld [vmem:[%s8421_s4 + $0x128] sm:$0xff]   ;;  %v5607_v40 = vld [vmem:[%s8421_s4 + $0x1b0] sm:$0xff]   ;;  %v5609_v31 = vld [vmem:[%s8421_s4 + $0x1b8] sm:$0xff]  }
 0x2db   :  { %v4348_v14 = vadd.f32 3.0, %v4340_v36  ;;  %v4370_v55 = vmul.f32 %v4362_v0, %v4338_v29  ;;  %v5600_v29 = vld [vmem:[%s8421_s4 + $0x170] sm:$0xff]   ;;  %v4316_v51 = vrot.slane %v8281_v60, %v4315_v58 }
 0x2dc   :  { %v4377_v33 = vmul.f32 0.16666667, %v4369_v20  ;;  %v4355_v21 = vmax.f32 %v4347_v35, 0.0 }
 0x2dd   :  { %v4356_v5 = vmax.f32 %v4348_v14, 0.0  ;;  %v4378_v13 = vmul.f32 0.16666667, %v4370_v55  ;;  %v4320_v14 = vrot.slane %v8281_v60, %v4319_v2 }
 0x2de   :  { %v4363_v49 = vmin.f32 %v4355_v21, 6.0  ;;  %v4385_v46 = vpack.c.bf16 %v4377_v33, %v4377_v33 }
 0x2df   :  { %v4364_v17 = vmin.f32 %v4356_v5, 6.0  ;;  %v4386_v12 = vpack.c.bf16 %v4378_v13, %v4378_v13 }
 0x2e0   :  { %v4371_v38 = vmul.f32 %v4363_v49, %v4339_v39 }
 0x2e1   :  { %v4372_v6 = vmul.f32 %v4364_v17, %v4340_v36  ;;  %4944 = vmatprep.mubr.bf16.mxu0 %v4386_v12 }
 0x2e2   :  { %v4379_v50 = vmul.f32 0.16666667, %v4371_v38  ;;  %4945 = vmatmul.mubr.bf16.vlgmr.msra.gmra.mrb[32].mxu0 %v4385_v46 }
 0x2e3   :  { %v4380_v4 = vmul.f32 0.16666667, %v4372_v6  ;;  %5496 = vmatpush3.bf16.msra.mxu0 %v5579_v63 }
 0x2e4   :  { %5497 = vmatprep.subr.bf16.mxu0 %v5580_v42  ;;  %v4387_v25 = vpack.c.bf16 %v4379_v50, %v4379_v50 }
 0x2e5   :  { %v4388_v7 = vpack.c.bf16 %v4380_v4, %v4380_v4 }
 0x2e7   :  { %4984 = vmatprep.mubr.bf16.mxu1 %v4388_v7  ;;  %5498 = vmatpush3.bf16.msra.mxu0 %v5581_v23 }
 0x2e8   :  { %4985 = vmatmul.mubr.bf16.vlgmr.msra.gmra.mrb[32].mxu1 %v4387_v25  ;;  %5499 = vmatprep.subr.bf16.mxu0 %v5584_v57 }
 0x2e9   :  { %5518 = vmatpush3.bf16.msra.mxu1 %v5583_v16 }
 0x2ea   :  { %5519 = vmatprep.subr.bf16.mxu1 %v5586_v44 }
 0x2eb   :  { %5500 = vmatpush3.bf16.msra.mxu0 %v5585_v8 }
 0x2ec   :  { %5501 = vmatprep.subr.bf16.mxu0 %v5588_v19 }
 0x2ed   :  { %5520 = vmatpush3.bf16.msra.mxu1 %v5587_v10 }
 0x2ee   :  { %5521 = vmatprep.subr.bf16.mxu1 %v5590_v52 }
 0x2ef   :  { %5502 = vmatpush3.bf16.msra.mxu0 %v5589_v15 }
 0x2f0   :  { %5503 = vmatprep.subr.bf16.mxu0 %v5592_v24 }
 0x2f1   :  { %5522 = vmatpush3.bf16.msra.mxu1 %v5591_v27 }
 0x2f2   :  { %5523 = vmatprep.subr.bf16.mxu1 %v5594_v53 }
 0x2f3   :  { %5504 = vmatpush3.bf16.msra.mxu0 %v5593_v54 }
 0x2f4   :  { %5505 = vmatprep.subr.bf16.mxu0 %v5596_v11 }
 0x2f5   :  { %5524 = vmatpush3.bf16.msra.mxu1 %v5595_v61 }
 0x2f6   :  { %5525 = vmatprep.subr.bf16.mxu1 %v5598_v37 }
 0x2f7   :  { %5506 = vmatpush3.bf16.msra.mxu0 %v5597_v34 }
 0x2f8   :  { %5507 = vmatprep.subr.bf16.mxu0 %v5600_v29 }
 0x2f9   :  { %5526 = vmatpush3.bf16.msra.mxu1 %v5599_v48 }
 0x2fa   :  { %5527 = vmatprep.subr.bf16.mxu1 %v5602_v18 }
 0x2fb   :  { %5508 = vmatpush3.bf16.msra.mxu0 %v5601_v56 }
 0x2fc   :  { %5509 = vmatprep.subr.bf16.mxu0 %v5604_v1 }
 0x2fd   :  { %5528 = vmatpush3.bf16.msra.mxu1 %v5603_v45 }
 0x2fe   :  { %5529 = vmatprep.subr.bf16.mxu1 %v5606_v22 }
 0x2ff   :  { %5510 = vmatpush3.bf16.msra.mxu0 %v5605_v59 }
 0x301   :  { %5530 = vmatpush3.bf16.msra.mxu1 %v5607_v40  ;;  %v5386_v40 = vld [vmem:[%s8422_s5] ss:$0 sm:$0xff]  ;;  %s5742_s5 = scalar_lea.vmem %s5081_s7, 32 }
 0x302   :  { %5531 = vmatprep.subr.bf16.mxu1 %v5608_v30  ;;  %p5743_p10 = scmp.ne.s32.totalorder %s5081_s7, %s5742_s5  ;;  %p5748_p12 = scmp.lt.s32.totalorder %s5742_s5, %s5742_s5 }
 0x304   :  { %p5749_p13 = por %p5748_p12, %p5747_p11 }
 0x305   :  { %5532 = vmatpush3.bf16.msra.mxu1 %v5609_v31 }
 0x306   :  { %p5750_p0 = pnand %p5749_p13, %p5743_p10 }
 0x315   :  { %v4165_v3 = vpop.f32.mrb[24].mxu0  ;;  %v4247_v39 = vpop.f32.mrb[28].mxu1 }
 0x316   :  { %v4166_v41 = vadd.f32 %v4165_v3, %v8271_v26  ;;  %v4248_v36 = vadd.f32 %v4247_v39, %v8276_v28  ;;  %v4167_v0 = vpop.f32.mrb[25].mxu0  ;;  %v4249_v20 = vpop.f32.mrb[29].mxu1  ;;  %v4323_v26 = vsub.s32 6, %v8645_v62  ;;  %v4327_v28 = vsub.s32 7, %v8645_v62 }
 0x317   :  { %v4168_v35 = vadd.f32 %v4167_v0, %v8274_v47  ;;  %v4250_v55 = vadd.f32 %v4249_v20, %v8278_v32  ;;  %v4169_v33 = vpop.f32.mrb[26].mxu0  ;;  %v4251_v21 = vpop.f32.mrb[30].mxu1 }
 0x318   :  { %v4207_v5 = vadd.f32 %v8293_v9, %v4166_v41  ;;  %v4170_v13 = vpop.f32.mrb[27].mxu0  ;;  %v4252_v49 = vpop.f32.mrb[31].mxu1  ;;  %v4324_v47 = vrot.slane %v8281_v60, %v4323_v26  ;;  %v4328_v32 = vrot.slane %v8281_v60, %v4327_v28 }
 0x319   :  { %v4209_v17 = vadd.f32 %v8296_v43, %v4168_v35 }
 0x31a   :  { %v4341_v12 = vadd.f32 %v4316_v51, %v4207_v5 }
 0x31b   :  { %v4342_v63 = vadd.f32 %v4320_v14, %v4209_v17 }
 0x31c   :  { %v4349_v38 = vadd.f32 3.0, %v4341_v12 }
 0x31d   :  { %v4350_v46 = vadd.f32 3.0, %v4342_v63  ;;  %v4288_v42 = vpop.f32.mrb[28].mxu0 }
 0x31e   :  { %v4357_v6 = vmax.f32 %v4349_v38, 0.0  ;;  %v4289_v50 = vadd.f32 %v4288_v42, %v4248_v36  ;;  %v4290_v9 = vpop.f32.mrb[29].mxu0 }
 0x31f   :  { %v4358_v4 = vmax.f32 %v4350_v46, 0.0  ;;  %v4291_v23 = vadd.f32 %v4290_v9, %v4250_v55  ;;  %v4292_v57 = vpop.f32.mrb[30].mxu0 }
 0x320   :  { %v4365_v7 = vmin.f32 %v4357_v6, 6.0  ;;  %v4343_v16 = vadd.f32 %v4324_v47, %v4289_v50  ;;  %v4293_v43 = vpop.f32.mrb[31].mxu0 }
 0x321   :  { %v4344_v25 = vadd.f32 %v4328_v32, %v4291_v23  ;;  %v4366_v62 = vmin.f32 %v4358_v4, 6.0 }
 0x322   :  { %v4373_v44 = vmul.f32 %v4365_v7, %v4341_v12  ;;  %v4351_v8 = vadd.f32 3.0, %v4343_v16 }
 0x323   :  { %v4352_v19 = vadd.f32 3.0, %v4344_v25  ;;  %v4374_v10 = vmul.f32 %v4366_v62, %v4342_v63 }
 0x324   :  { %v4381_v52 = vmul.f32 0.16666667, %v4373_v44  ;;  %v4359_v15 = vmax.f32 %v4351_v8, 0.0 }
 0x325   :  { %v4360_v24 = vmax.f32 %v4352_v19, 0.0  ;;  %v4382_v27 = vmul.f32 0.16666667, %v4374_v10 }
 0x326   :  { %v4367_v60 = vmin.f32 %v4359_v15, 6.0  ;;  %v4389_v61 = vpack.c.bf16 %v4381_v52, %v4381_v52 }
 0x327   :  { %v4368_v53 = vmin.f32 %v4360_v24, 6.0  ;;  %v4390_v54 = vpack.c.bf16 %v4382_v27, %v4382_v27 }
 0x328   :  { %v4375_v11 = vmul.f32 %v4367_v60, %v4343_v16 }
 0x329   :  { %v4376_v37 = vmul.f32 %v4368_v53, %v4344_v25  ;;  %5024 = vmatprep.mubr.bf16.mxu0 %v4390_v54 }
 0x32a   :  { %v4383_v34 = vmul.f32 0.16666667, %v4375_v11  ;;  %5025 = vmatmul.mubr.bf16.vlgmr.msra.gmra.mrb[36].mxu0 %v4389_v61 }
 0x32b   :  { %v4384_v29 = vmul.f32 0.16666667, %v4376_v37 }
 0x32c   :  { %v4391_v18 = vpack.c.bf16 %v4383_v34, %v4383_v34 }
 0x32d   :  { %v4392_v48 = vpack.c.bf16 %v4384_v29, %v4384_v29 }
 0x32f   :  { %5064 = vmatprep.mubr.bf16.mxu1 %v4392_v48 }
 0x330   :  { %5065 = vmatmul.mubr.bf16.vlgmr.msra.gmra.mrb[36].mxu1 %v4391_v18 }
 0x3b5   :  { %v5467_v56 = vpop.f32.mrb[32].mxu0 }
 0x3b6   :  { %v5468_v1 = vpop.f32.mrb[33].mxu0 }
 0x3b7   :  { %v5469_v45 = vadd.f32 %v5468_v1, %v5467_v56  ;;  %v5470_v22 = vpop.f32.mrb[34].mxu0 }
 0x3b8   :  { %v5471_v59 = vpop.f32.mrb[35].mxu0 }
 0x3b9   :  { %v4947_v58 = vadd.f32 %v5469_v45, %v5386_v40 }
 0x3bb   :  { %v5489_v30 = vpop.f32.mrb[32].mxu1 }
 0x3bc   :  { %v5490_v31 = vpop.f32.mrb[33].mxu1 }
 0x3bd   :  { %v5491_v2 = vadd.f32 %v5490_v31, %v5489_v30  ;;  %v5492_v3 = vpop.f32.mrb[34].mxu1 }
 0x3be   :  { %v5493_v39 = vpop.f32.mrb[35].mxu1 }
 0x3bf   :  { %v4987_v41 = vadd.f32 %v5491_v2, %v4947_v58 }
 0x3fd   :  { %v5511_v51 = vpop.f32.mrb[36].mxu0 }
 0x3fe   :  { %v5512_v36 = vpop.f32.mrb[37].mxu0 }
 0x3ff   :  { %v5513_v0 = vadd.f32 %v5512_v36, %v5511_v51  ;;  %v5514_v20 = vpop.f32.mrb[38].mxu0 }
 0x400   :  { %v5515_v35 = vpop.f32.mrb[39].mxu0 }
 0x401   :  { %v5027_v14 = vadd.f32 %v5513_v0, %v4987_v41 }
 0x403   :  { %v5533_v55 = vpop.f32.mrb[36].mxu1 }
 0x404   :  { %v5534_v33 = vpop.f32.mrb[37].mxu1 }
 0x405   :  { %v5535_v21 = vadd.f32 %v5534_v33, %v5533_v55  ;;  %v5536_v5 = vpop.f32.mrb[38].mxu1 }
 0x406   :  { %v5537_v13 = vpop.f32.mrb[39].mxu1 }
 0x407   :  { %v5067_v49 = vadd.f32 %v5535_v21, %v5027_v14 }
 0x409   :  { %5073 = vst.msk [vmem:[#allocation8] sm:$0x3] %vm5072_vm6, %v5067_v49 }
 0x40a   :  { %5753 = shalt.err (!%p5750_p0)
}
 0x40b   :  { %s5754_s24 = scalar_lea.hbm %s8423_s6, 32 }
 0x40c   :  { %p5755_p1 = scmp.ne.s32.totalorder %s8423_s6, %s5754_s24  ;;  %p5758_p2 = scmp.lt.u32.totalorder %s5754_s24, %s8423_s6 }
 0x40e   :  { %p5760_p3 = pnand %p5758_p2, %p5755_p1 }
 0x410   :  { %5763 = shalt.err (!%p5760_p3)
}
 0x411   :  { %5083 = dma.vmem_to_hbm [thread:$0]  %s5081_s7, 32, %s8423_s6, [#allocation4]  }
 0x412   :  { %5768 = dma.done.wait [#allocation4], 32  }
 0x413   :  { %5769 = vsyncadd [#allocation4], 4294967264 }
 0x414   :  { %5087 = vsyncpa [#allocation3], 1 }
 0x415   :  { %5088 = vsyncpa [#allocation6], 1 }
 0x416   :  { %5089 = vsyncpa [#allocation4], 1 }

</bundles_post_ra>
